<compile_context>
chip_gen: v7x
topology: tpu7x:2x2x1
jax: 0.10.0
libtpu: 0.0.40
codegen_flags: <defaults>
</compile_context>

<pallas_src>
import functools

import jax
import jax.numpy as jnp
from jax import lax
from jax.experimental import pallas as pl
from jax.experimental.pallas import tpu as pltpu

EPS = 1e-8  # TODO(synk): reference RMSNorm eps not given; 1e-8 assumed.


def _round_up(x, m):
    return (x + m - 1) // m * m


def _gelu_tanh(x):
    # TODO(synk): PyTorch nn.GELU defaults to the exact erf form; the tanh
    # approximation is used here.
    c = 0.7978845608028654  # sqrt(2/pi)
    return 0.5 * x * (1.0 + jnp.tanh(c * (x + 0.044715 * x * x * x)))


def _rms_norm(x, gain):
    ms = jnp.mean(x * x, axis=-1, keepdims=True)
    return x * lax.rsqrt(ms + EPS) * gain


# ---------------------------------------------------------------------------
# Fused kernel: input stage (l==0) + decoder layer + output proj (l==L-1).
# ---------------------------------------------------------------------------
def _citl_kernel(n_heads,
                 key_ref, int_ref, kf_ref,
                 kw1_ref, kb1_ref, kw2_ref, kb2_ref, kg_ref,
                 iw1_ref, ib1_ref, iw2_ref, ib2_ref, ig_ref,
                 g1_ref, wq_ref, bq_ref, wk_ref, bk_ref, wv_ref, bv_ref,
                 rel_ref, wo_ref, bo_ref, g2_ref, w1_ref, b1_ref,
                 w2_ref, b2_ref,
                 ow_ref, ob_ref,
                 o_ref,
                 resid_ref):
    l = pl.program_id(1)
    n_layers = pl.num_programs(1)

    bg, seq, d = key_ref.shape          # batch-group size, seq len, d_model
    rows_total = bg * seq               # matmul M dimension for dense ops
    dh = d // n_heads
    scale = 1.0 / float(dh) ** 0.5

    # ---- layer 0 prologue: key/interm FFN + RMSNorm + keyframe select -----
    @pl.when(l == 0)
    def _():
        def ffn_norm(x2, w1, b1, w2, b2, g):
            hh = _gelu_tanh(jnp.dot(x2.astype(jnp.bfloat16), w1,
                                    preferred_element_type=jnp.float32) + b1)
            y = jnp.dot(hh.astype(jnp.bfloat16), w2,
                        preferred_element_type=jnp.float32) + b2
            return _rms_norm(y, g)

        kx = key_ref[...].reshape(rows_total, d)
        ix = int_ref[...].reshape(rows_total, d)
        kf = kf_ref[...].reshape(rows_total, 1)
        key_h = ffn_norm(kx, kw1_ref[...], kb1_ref[...], kw2_ref[...],
                         kb2_ref[...], kg_ref[...])
        int_h = ffn_norm(ix, iw1_ref[...], ib1_ref[...], iw2_ref[...],
                         ib2_ref[...], ig_ref[...])
        resid_ref[...] = jnp.where(kf != 0.0, key_h, int_h)

    x = resid_ref[...]                                   # (R, D) f32 residual

    # ---- expand compact rel-pos table (H, 2T-1) -> (H, T, T) --------------
    r = 2 * seq - 1
    ii = lax.broadcasted_iota(jnp.int32, (seq, seq, r), 0)
    jj = lax.broadcasted_iota(jnp.int32, (seq, seq, r), 1)
    rr = lax.broadcasted_iota(jnp.int32, (seq, seq, r), 2)
    onehot = (ii - jj + (seq - 1) == rr).astype(jnp.float32)
    onehot = onehot.reshape(seq * seq, r)                # leading-dim merge
    bias = lax.dot_general(rel_ref[0], onehot, (((1,), (1,)), ((), ())),
                           preferred_element_type=jnp.float32)   # (H, T*T)
    bias = bias.reshape(n_heads, seq, seq)

    # ---- self-attention (pre-norm, additive relative bias) ----------------
    # TODO(synk): reference TransformerBlock internals are not given; a
    # pre-norm RMSNorm block with Shaw/T5-style additive relative bias is
    # assumed.
    hn = _rms_norm(x, g1_ref[0]).astype(jnp.bfloat16)
    q = jnp.dot(hn, wq_ref[0], preferred_element_type=jnp.float32) + bq_ref[0]
    k = jnp.dot(hn, wk_ref[0], preferred_element_type=jnp.float32) + bk_ref[0]
    v = jnp.dot(hn, wv_ref[0], preferred_element_type=jnp.float32) + bv_ref[0]
    q = q * scale

    q3 = q.reshape(rows_total, n_heads, dh)
    k3 = k.reshape(rows_total, n_heads, dh)
    v3 = v.reshape(rows_total, n_heads, dh)

    ctx_parts = []
    for b in range(bg):                  # static unroll over batch group
        rows = slice(b * seq, (b + 1) * seq)
        qh = jnp.transpose(q3[rows], (1, 0, 2)).astype(jnp.bfloat16)  # (H,T,dh)
        kh = jnp.transpose(k3[rows], (1, 0, 2)).astype(jnp.bfloat16)
        vh = jnp.transpose(v3[rows], (1, 0, 2)).astype(jnp.bfloat16)
        s = jnp.einsum('hqd,hkd->hqk', qh, kh,
                       preferred_element_type=jnp.float32) + bias      # (H,T,T)
        s = s - jnp.max(s, axis=-1, keepdims=True)
        p = jnp.exp(s)
        p = p * pl.reciprocal(jnp.sum(p, axis=-1, keepdims=True), approx=True)
        c = jnp.einsum('hqk,hkd->hqd', p.astype(jnp.bfloat16), vh,
                       preferred_element_type=jnp.float32)             # (H,T,dh)
        ctx_parts.append(jnp.transpose(c, (1, 0, 2)).reshape(seq, d))
    ctx = ctx_parts[0] if bg == 1 else jnp.concatenate(ctx_parts, axis=0)

    attn = jnp.dot(ctx.astype(jnp.bfloat16), wo_ref[0],
                   preferred_element_type=jnp.float32) + bo_ref[0]
    x = x + attn

    # ---- feed-forward ------------------------------------------------------
    h2 = _rms_norm(x, g2_ref[0]).astype(jnp.bfloat16)
    f = _gelu_tanh(jnp.dot(h2, w1_ref[0],
                           preferred_element_type=jnp.float32) + b1_ref[0])
    f = jnp.dot(f.astype(jnp.bfloat16), w2_ref[0],
                preferred_element_type=jnp.float32) + b2_ref[0]
    x = x + f
    resid_ref[...] = x

    # ---- fused lane-dense output projection on the last layer -------------
    @pl.when(l == n_layers - 1)
    def _():
        p_pad = ow_ref.shape[1]
        y = jnp.dot(x.astype(jnp.bfloat16), ow_ref[...],
                    preferred_element_type=jnp.float32) + ob_ref[...]
        o_ref[...] = y.reshape(bg, seq, p_pad)


# ---------------------------------------------------------------------------
# Wrapper.
# ---------------------------------------------------------------------------
def _vmem_limit_bytes():
    # Generation-aware scoped-VMEM budget: ~3/4 of physical VMEM, capped at
    # 100 MiB (v5e/v6e: ~96-100 MiB of 128 MiB; v7x: 48 MiB of 64 MiB).
    try:
        cap = int(pltpu.get_tpu_info().vmem_capacity_bytes)
    except Exception:
        cap = 64 << 20
    return int(max(32 << 20, min(cap * 3 // 4, 100 << 20)))


def citl_decoder_forward(params, key_x, interm_x, keyframes):
    B, T, D = key_x.shape
    H = params["n_heads"]
    P = params["d_pose"]
    dp = params["decoder"]
    L = dp["wq"].shape[0]
    Pp = params["out_w"].shape[-1]       # lane-padded output width

    # Megacore: keep a parallel batch-group axis of 2 when the batch is large
    # enough (both v7x TensorCores stay busy, weights fetched <= 2x per layer);
    # otherwise fold the whole batch so weights stream exactly once per layer.
    G = 2 if (B % 2 == 0 and B >= 4) else 1
    Bg = B // G

    kf = keyframes.astype(jnp.float32).reshape(B, T, 1)

    def const_spec(shape):
        nd = len(shape)
        return pl.BlockSpec(tuple(shape), lambda g, l, _nd=nd: (0,) * _nd)

    def layer_spec(shape):
        nd = len(shape)
        return pl.BlockSpec((1,) + tuple(shape[1:]),
                            lambda g, l, _nd=nd: (l,) + (0,) * (_nd - 1))

    def batch_spec(tail):
        return pl.BlockSpec((Bg,) + tuple(tail), lambda g, l: (g, 0, 0))

    const_args = [params["key_w1"], params["key_b1"], params["key_w2"],
                  params["key_b2"], params["key_g"],
                  params["interm_w1"], params["interm_b1"], params["interm_w2"],
                  params["interm_b2"], params["interm_g"]]
    layer_args = [dp["g1"], dp["wq"], dp["bq"], dp["wk"], dp["bk"], dp["wv"],
                  dp["bv"], dp["rel"], dp["wo"], dp["bo"], dp["g2"], dp["w1"],
                  dp["b1"], dp["w2"], dp["b2"]]
    tail_args = [params["out_w"], params["out_b"]]

    in_specs = ([batch_spec((T, D)), batch_spec((T, D)), batch_spec((T, 1))]
                + [const_spec(a.shape) for a in const_args]
                + [layer_spec(a.shape) for a in layer_args]
                + [const_spec(a.shape) for a in tail_args])

    out = pl.pallas_call(
        functools.partial(_citl_kernel, H),
        out_shape=jax.ShapeDtypeStruct((B, T, Pp), jnp.float32),
        grid=(G, L),
        in_specs=in_specs,
        out_specs=pl.BlockSpec((Bg, T, Pp), lambda g, l: (g, 0, 0)),
        scratch_shapes=[pltpu.VMEM((Bg * T, D), jnp.float32)],
        compiler_params=pltpu.CompilerParams(
            dimension_semantics=("parallel", "arbitrary"),
            vmem_limit_bytes=_vmem_limit_bytes()),
    )(key_x, interm_x, kf, *const_args, *layer_args, *tail_args)

    return out[..., :P]


# ---------------------------------------------------------------------------
# Deterministic synthetic parameter init (matmul weights stored bf16 in HBM).
# ---------------------------------------------------------------------------
def init_params(key, d_model, d_pose, n_layers, n_heads, seq_len):
    d_ff = 4 * d_model
    keys = iter(jax.random.split(key, 64))

    def lin(k, fan_in, fan_out):
        return (jax.random.normal(k, (fan_in, fan_out), jnp.float32)
                * 0.05).astype(jnp.bfloat16)

    def stack_w(k, di, do):
        return (jax.random.normal(k, (n_layers, di, do), jnp.float32)
                * 0.05).astype(jnp.bfloat16)

    p = {"n_heads": n_heads, "d_pose": d_pose}
    for name in ("key", "interm"):
        p[f"{name}_w1"] = lin(next(keys), d_model, d_ff)
        p[f"{name}_b1"] = jnp.zeros((1, d_ff), jnp.float32)
        p[f"{name}_w2"] = lin(next(keys), d_ff, d_model)
        p[f"{name}_b2"] = jnp.zeros((1, d_model), jnp.float32)
        p[f"{name}_g"] = jnp.ones((1, d_model), jnp.float32)

    dp = {}
    dp["g1"] = jnp.ones((n_layers, 1, d_model), jnp.float32)
    dp["g2"] = jnp.ones((n_layers, 1, d_model), jnp.float32)
    dp["wq"] = stack_w(next(keys), d_model, d_model)
    dp["wk"] = stack_w(next(keys), d_model, d_model)
    dp["wv"] = stack_w(next(keys), d_model, d_model)
    dp["wo"] = stack_w(next(keys), d_model, d_model)
    dp["bq"] = jnp.zeros((n_layers, 1, d_model), jnp.float32)
    dp["bk"] = jnp.zeros((n_layers, 1, d_model), jnp.float32)
    dp["bv"] = jnp.zeros((n_layers, 1, d_model), jnp.float32)
    dp["bo"] = jnp.zeros((n_layers, 1, d_model), jnp.float32)
    dp["w1"] = stack_w(next(keys), d_model, d_ff)
    dp["b1"] = jnp.zeros((n_layers, 1, d_ff), jnp.float32)
    dp["w2"] = stack_w(next(keys), d_ff, d_model)
    dp["b2"] = jnp.zeros((n_layers, 1, d_model), jnp.float32)
    # TODO(synk): exact relative_pe scheme of the reference block is not given;
    # a Shaw/T5-style learned additive bias over relative offsets is used.
    # Stored compactly as (L, H, 2T-1) and expanded inside the kernel.
    dp["rel"] = (jax.random.normal(
        next(keys), (n_layers, n_heads, 2 * seq_len - 1), jnp.float32) * 0.05)
    p["decoder"] = dp

    # Output projection lane-padded to a multiple of 128; wrapper slices back.
    p_pad = max(128, _round_up(d_pose, 128))
    ow = jax.random.normal(next(keys), (d_model, d_pose), jnp.float32) * 0.05
    ow_full = jnp.zeros((d_model, p_pad), jnp.float32).at[:, :d_pose].set(ow)
    p["out_w"] = ow_full.astype(jnp.bfloat16)
    p["out_b"] = jnp.zeros((1, p_pad), jnp.float32)
    return p


if __name__ == "__main__":
    # batch, seq, d_model, n_heads, n_layers, d_pose (d_model lane-dense = 128)
    B, T, D, H, L, P = 2, 8, 128, 4, 2, 16
    root = jax.random.PRNGKey(0)
    k_par, k_key, k_int, k_kf = jax.random.split(root, 4)

    params = init_params(k_par, D, P, L, H, T)
    key_x = jax.random.normal(k_key, (B, T, D), jnp.float32)
    interm_x = jax.random.normal(k_int, (B, T, D), jnp.float32)
    keyframes = jax.random.bernoulli(k_kf, 0.3, (B, T))

    out = citl_decoder_forward(params, key_x, interm_x, keyframes)
    jax.block_until_ready(out)
    assert out.shape == (B, T, P) and out.dtype == jnp.float32
    assert bool(jnp.all(jnp.isfinite(out)))
    print("KERNEL_OK")
</pallas_src>

<mosaic_0001>
module attributes {stable_mosaic.version = 11 : i64} {
  func.func @_citl_kernel(%arg0: i32, %arg1: i32, %arg2: memref<2x8x128xf32, #tpu.memory_space<vmem>>, %arg3: memref<2x8x128xf32, #tpu.memory_space<vmem>>, %arg4: memref<2x8x1xf32, #tpu.memory_space<vmem>>, %arg5: memref<128x512xbf16, #tpu.memory_space<vmem>>, %arg6: memref<1x512xf32, #tpu.memory_space<vmem>>, %arg7: memref<512x128xbf16, #tpu.memory_space<vmem>>, %arg8: memref<1x128xf32, #tpu.memory_space<vmem>>, %arg9: memref<1x128xf32, #tpu.memory_space<vmem>>, %arg10: memref<128x512xbf16, #tpu.memory_space<vmem>>, %arg11: memref<1x512xf32, #tpu.memory_space<vmem>>, %arg12: memref<512x128xbf16, #tpu.memory_space<vmem>>, %arg13: memref<1x128xf32, #tpu.memory_space<vmem>>, %arg14: memref<1x128xf32, #tpu.memory_space<vmem>>, %arg15: memref<1x1x128xf32, #tpu.memory_space<vmem>>, %arg16: memref<1x128x128xbf16, #tpu.memory_space<vmem>>, %arg17: memref<1x1x128xf32, #tpu.memory_space<vmem>>, %arg18: memref<1x128x128xbf16, #tpu.memory_space<vmem>>, %arg19: memref<1x1x128xf32, #tpu.memory_space<vmem>>, %arg20: memref<1x128x128xbf16, #tpu.memory_space<vmem>>, %arg21: memref<1x1x128xf32, #tpu.memory_space<vmem>>, %arg22: memref<1x4x15xf32, #tpu.memory_space<vmem>>, %arg23: memref<1x128x128xbf16, #tpu.memory_space<vmem>>, %arg24: memref<1x1x128xf32, #tpu.memory_space<vmem>>, %arg25: memref<1x1x128xf32, #tpu.memory_space<vmem>>, %arg26: memref<1x128x512xbf16, #tpu.memory_space<vmem>>, %arg27: memref<1x1x512xf32, #tpu.memory_space<vmem>>, %arg28: memref<1x512x128xbf16, #tpu.memory_space<vmem>>, %arg29: memref<1x1x128xf32, #tpu.memory_space<vmem>>, %arg30: memref<128x128xbf16, #tpu.memory_space<vmem>>, %arg31: memref<1x128xf32, #tpu.memory_space<vmem>>, %arg32: memref<2x8x128xf32, #tpu.memory_space<vmem>>, %arg33: memref<16x128xf32, #tpu.memory_space<vmem>>) attributes {dimension_semantics = [#tpu.dimension_semantics<parallel>, #tpu.dimension_semantics<arbitrary>], iteration_bounds = array<i64: 1, 2>, scalar_prefetch = 0 : i64, scratch_operands = 1 : i64, tpu.core_type = #tpu.core_type<tc>, window_params = [{transform_indices = @transform_0, window_bounds = array<i64: 2, 8, 128>}, {transform_indices = @transform_1, window_bounds = array<i64: 2, 8, 128>}, {transform_indices = @transform_2, window_bounds = array<i64: 2, 8, 1>}, {pipeline_mode = #tpu.pipeline_mode<synchronous>, transform_indices = @transform_3, window_bounds = array<i64: 128, 512>}, {pipeline_mode = #tpu.pipeline_mode<synchronous>, transform_indices = @transform_4, window_bounds = array<i64: 1, 512>}, {pipeline_mode = #tpu.pipeline_mode<synchronous>, transform_indices = @transform_5, window_bounds = array<i64: 512, 128>}, {pipeline_mode = #tpu.pipeline_mode<synchronous>, transform_indices = @transform_6, window_bounds = array<i64: 1, 128>}, {pipeline_mode = #tpu.pipeline_mode<synchronous>, transform_indices = @transform_7, window_bounds = array<i64: 1, 128>}, {pipeline_mode = #tpu.pipeline_mode<synchronous>, transform_indices = @transform_8, window_bounds = array<i64: 128, 512>}, {pipeline_mode = #tpu.pipeline_mode<synchronous>, transform_indices = @transform_9, window_bounds = array<i64: 1, 512>}, {pipeline_mode = #tpu.pipeline_mode<synchronous>, transform_indices = @transform_10, window_bounds = array<i64: 512, 128>}, {pipeline_mode = #tpu.pipeline_mode<synchronous>, transform_indices = @transform_11, window_bounds = array<i64: 1, 128>}, {pipeline_mode = #tpu.pipeline_mode<synchronous>, transform_indices = @transform_12, window_bounds = array<i64: 1, 128>}, {transform_indices = @transform_13, window_bounds = array<i64: 1, 1, 128>}, {transform_indices = @transform_14, window_bounds = array<i64: 1, 128, 128>}, {transform_indices = @transform_15, window_bounds = array<i64: 1, 1, 128>}, {transform_indices = @transform_16, window_bounds = array<i64: 1, 128, 128>}, {transform_indices = @transform_17, window_bounds = array<i64: 1, 1, 128>}, {transform_indices = @transform_18, window_bounds = array<i64: 1, 128, 128>}, {transform_indices = @transform_19, window_bounds = array<i64: 1, 1, 128>}, {transform_indices = @transform_20, window_bounds = array<i64: 1, 4, 15>}, {transform_indices = @transform_21, window_bounds = array<i64: 1, 128, 128>}, {transform_indices = @transform_22, window_bounds = array<i64: 1, 1, 128>}, {transform_indices = @transform_23, window_bounds = array<i64: 1, 1, 128>}, {transform_indices = @transform_24, window_bounds = array<i64: 1, 128, 512>}, {transform_indices = @transform_25, window_bounds = array<i64: 1, 1, 512>}, {transform_indices = @transform_26, window_bounds = array<i64: 1, 512, 128>}, {transform_indices = @transform_27, window_bounds = array<i64: 1, 1, 128>}, {pipeline_mode = #tpu.pipeline_mode<synchronous>, transform_indices = @transform_28, window_bounds = array<i64: 128, 128>}, {pipeline_mode = #tpu.pipeline_mode<synchronous>, transform_indices = @transform_29, window_bounds = array<i64: 1, 128>}, {transform_indices = @transform_30, window_bounds = array<i64: 2, 8, 128>}]} {
    %c0_i32 = arith.constant 0 : i32
    %0 = arith.cmpi eq, %arg1, %c0_i32 : i32
    %1 = arith.extui %0 : i1 to i32
    %c0_i32_0 = arith.constant 0 : i32
    %2 = arith.cmpi ne, %1, %c0_i32_0 : i32
    scf.if %2 {
      %c0_75 = arith.constant 0 : index
      %c0_76 = arith.constant 0 : index
      %c0_77 = arith.constant 0 : index
      %167 = vector.load %arg2[%c0_75, %c0_76, %c0_77] : memref<2x8x128xf32, #tpu.memory_space<vmem>>, vector<2x8x128xf32>
      %168 = vector.shape_cast %167 : vector<2x8x128xf32> to vector<16x128xf32>
      %c0_78 = arith.constant 0 : index
      %c0_79 = arith.constant 0 : index
      %c0_80 = arith.constant 0 : index
      %169 = vector.load %arg3[%c0_78, %c0_79, %c0_80] : memref<2x8x128xf32, #tpu.memory_space<vmem>>, vector<2x8x128xf32>
      %170 = vector.shape_cast %169 : vector<2x8x128xf32> to vector<16x128xf32>
      %c0_81 = arith.constant 0 : index
      %c0_82 = arith.constant 0 : index
      %c0_83 = arith.constant 0 : index
      %171 = vector.load %arg4[%c0_81, %c0_82, %c0_83] : memref<2x8x1xf32, #tpu.memory_space<vmem>>, vector<2x8x1xf32>
      %172 = vector.shape_cast %171 : vector<2x8x1xf32> to vector<16x1xf32>
      %c0_84 = arith.constant 0 : index
      %c0_85 = arith.constant 0 : index
      %173 = vector.load %arg5[%c0_84, %c0_85] : memref<128x512xbf16, #tpu.memory_space<vmem>>, vector<128x512xbf16>
      %c0_86 = arith.constant 0 : index
      %c0_87 = arith.constant 0 : index
      %174 = vector.load %arg6[%c0_86, %c0_87] : memref<1x512xf32, #tpu.memory_space<vmem>>, vector<1x512xf32>
      %c0_88 = arith.constant 0 : index
      %c0_89 = arith.constant 0 : index
      %175 = vector.load %arg7[%c0_88, %c0_89] : memref<512x128xbf16, #tpu.memory_space<vmem>>, vector<512x128xbf16>
      %c0_90 = arith.constant 0 : index
      %c0_91 = arith.constant 0 : index
      %176 = vector.load %arg8[%c0_90, %c0_91] : memref<1x128xf32, #tpu.memory_space<vmem>>, vector<1x128xf32>
      %c0_92 = arith.constant 0 : index
      %c0_93 = arith.constant 0 : index
      %177 = vector.load %arg9[%c0_92, %c0_93] : memref<1x128xf32, #tpu.memory_space<vmem>>, vector<1x128xf32>
      %178 = arith.truncf %168 : vector<16x128xf32> to vector<16x128xbf16>
      %cst_94 = arith.constant dense<0.000000e+00> : vector<16x512xf32>
      %179 = tpu.matmul %178, %173, %cst_94 {dimension_numbers = #tpu.dot_dimension_numbers<[1], [0], [0], [1], [0, 0, 1, 1], [], []>} : vector<16x128xbf16>, vector<128x512xbf16>, vector<16x512xf32> -> vector<16x512xf32>
      %180 = vector.broadcast %174 : vector<1x512xf32> to vector<16x512xf32>
      %181 = arith.addf %179, %180 : vector<16x512xf32>
      %cst_95 = arith.constant 5.000000e-01 : f32
      %182 = vector.broadcast %cst_95 : f32 to vector<16x512xf32>
      %183 = arith.mulf %182, %181 : vector<16x512xf32>
      %cst_96 = arith.constant 4.471500e-02 : f32
      %184 = vector.broadcast %cst_96 : f32 to vector<16x512xf32>
      %185 = arith.mulf %184, %181 : vector<16x512xf32>
      %186 = arith.mulf %185, %181 : vector<16x512xf32>
      %187 = arith.mulf %186, %181 : vector<16x512xf32>
      %188 = arith.addf %181, %187 : vector<16x512xf32>
      %cst_97 = arith.constant 0.797884583 : f32
      %189 = vector.broadcast %cst_97 : f32 to vector<16x512xf32>
      %190 = arith.mulf %189, %188 : vector<16x512xf32>
      %191 = math.tanh %190 : vector<16x512xf32>
      %cst_98 = arith.constant 1.000000e+00 : f32
      %192 = vector.broadcast %cst_98 : f32 to vector<16x512xf32>
      %193 = arith.addf %192, %191 : vector<16x512xf32>
      %194 = arith.mulf %183, %193 : vector<16x512xf32>
      %195 = arith.truncf %194 : vector<16x512xf32> to vector<16x512xbf16>
      %cst_99 = arith.constant dense<0.000000e+00> : vector<16x128xf32>
      %196 = tpu.matmul %195, %175, %cst_99 {dimension_numbers = #tpu.dot_dimension_numbers<[1], [0], [0], [1], [0, 0, 1, 1], [], []>} : vector<16x512xbf16>, vector<512x128xbf16>, vector<16x128xf32> -> vector<16x128xf32>
      %197 = vector.broadcast %176 : vector<1x128xf32> to vector<16x128xf32>
      %198 = arith.addf %196, %197 : vector<16x128xf32>
      %199 = arith.mulf %198, %198 : vector<16x128xf32>
      %cst_100 = arith.constant dense<0.000000e+00> : vector<16xf32>
      %200 = vector.multi_reduction <add>, %199, %cst_100 [1] : vector<16x128xf32> to vector<16xf32>
      %201 = vector.shape_cast %200 : vector<16xf32> to vector<16x1xf32>
      %cst_101 = arith.constant 1.280000e+02 : f32
      %202 = vector.broadcast %cst_101 : f32 to vector<16x1xf32>
      %203 = arith.divf %201, %202 : vector<16x1xf32>
      %cst_102 = arith.constant 9.99999993E-9 : f32
      %204 = vector.broadcast %cst_102 : f32 to vector<16x1xf32>
      %205 = arith.addf %203, %204 : vector<16x1xf32>
      %206 = math.rsqrt %205 : vector<16x1xf32>
      %207 = vector.broadcast %206 : vector<16x1xf32> to vector<16x128xf32>
      %208 = arith.mulf %198, %207 : vector<16x128xf32>
      %209 = vector.broadcast %177 : vector<1x128xf32> to vector<16x128xf32>
      %210 = arith.mulf %208, %209 : vector<16x128xf32>
      %c0_103 = arith.constant 0 : index
      %c0_104 = arith.constant 0 : index
      %211 = vector.load %arg10[%c0_103, %c0_104] : memref<128x512xbf16, #tpu.memory_space<vmem>>, vector<128x512xbf16>
      %c0_105 = arith.constant 0 : index
      %c0_106 = arith.constant 0 : index
      %212 = vector.load %arg11[%c0_105, %c0_106] : memref<1x512xf32, #tpu.memory_space<vmem>>, vector<1x512xf32>
      %c0_107 = arith.constant 0 : index
      %c0_108 = arith.constant 0 : index
      %213 = vector.load %arg12[%c0_107, %c0_108] : memref<512x128xbf16, #tpu.memory_space<vmem>>, vector<512x128xbf16>
      %c0_109 = arith.constant 0 : index
      %c0_110 = arith.constant 0 : index
      %214 = vector.load %arg13[%c0_109, %c0_110] : memref<1x128xf32, #tpu.memory_space<vmem>>, vector<1x128xf32>
      %c0_111 = arith.constant 0 : index
      %c0_112 = arith.constant 0 : index
      %215 = vector.load %arg14[%c0_111, %c0_112] : memref<1x128xf32, #tpu.memory_space<vmem>>, vector<1x128xf32>
      %216 = arith.truncf %170 : vector<16x128xf32> to vector<16x128xbf16>
      %cst_113 = arith.constant dense<0.000000e+00> : vector<16x512xf32>
      %217 = tpu.matmul %216, %211, %cst_113 {dimension_numbers = #tpu.dot_dimension_numbers<[1], [0], [0], [1], [0, 0, 1, 1], [], []>} : vector<16x128xbf16>, vector<128x512xbf16>, vector<16x512xf32> -> vector<16x512xf32>
      %218 = vector.broadcast %212 : vector<1x512xf32> to vector<16x512xf32>
      %219 = arith.addf %217, %218 : vector<16x512xf32>
      %cst_114 = arith.constant 5.000000e-01 : f32
      %220 = vector.broadcast %cst_114 : f32 to vector<16x512xf32>
      %221 = arith.mulf %220, %219 : vector<16x512xf32>
      %cst_115 = arith.constant 4.471500e-02 : f32
      %222 = vector.broadcast %cst_115 : f32 to vector<16x512xf32>
      %223 = arith.mulf %222, %219 : vector<16x512xf32>
      %224 = arith.mulf %223, %219 : vector<16x512xf32>
      %225 = arith.mulf %224, %219 : vector<16x512xf32>
      %226 = arith.addf %219, %225 : vector<16x512xf32>
      %cst_116 = arith.constant 0.797884583 : f32
      %227 = vector.broadcast %cst_116 : f32 to vector<16x512xf32>
      %228 = arith.mulf %227, %226 : vector<16x512xf32>
      %229 = math.tanh %228 : vector<16x512xf32>
      %cst_117 = arith.constant 1.000000e+00 : f32
      %230 = vector.broadcast %cst_117 : f32 to vector<16x512xf32>
      %231 = arith.addf %230, %229 : vector<16x512xf32>
      %232 = arith.mulf %221, %231 : vector<16x512xf32>
      %233 = arith.truncf %232 : vector<16x512xf32> to vector<16x512xbf16>
      %cst_118 = arith.constant dense<0.000000e+00> : vector<16x128xf32>
      %234 = tpu.matmul %233, %213, %cst_118 {dimension_numbers = #tpu.dot_dimension_numbers<[1], [0], [0], [1], [0, 0, 1, 1], [], []>} : vector<16x512xbf16>, vector<512x128xbf16>, vector<16x128xf32> -> vector<16x128xf32>
      %235 = vector.broadcast %214 : vector<1x128xf32> to vector<16x128xf32>
      %236 = arith.addf %234, %235 : vector<16x128xf32>
      %237 = arith.mulf %236, %236 : vector<16x128xf32>
      %cst_119 = arith.constant dense<0.000000e+00> : vector<16xf32>
      %238 = vector.multi_reduction <add>, %237, %cst_119 [1] : vector<16x128xf32> to vector<16xf32>
      %239 = vector.shape_cast %238 : vector<16xf32> to vector<16x1xf32>
      %cst_120 = arith.constant 1.280000e+02 : f32
      %240 = vector.broadcast %cst_120 : f32 to vector<16x1xf32>
      %241 = arith.divf %239, %240 : vector<16x1xf32>
      %cst_121 = arith.constant 9.99999993E-9 : f32
      %242 = vector.broadcast %cst_121 : f32 to vector<16x1xf32>
      %243 = arith.addf %241, %242 : vector<16x1xf32>
      %244 = math.rsqrt %243 : vector<16x1xf32>
      %245 = vector.broadcast %244 : vector<16x1xf32> to vector<16x128xf32>
      %246 = arith.mulf %236, %245 : vector<16x128xf32>
      %247 = vector.broadcast %215 : vector<1x128xf32> to vector<16x128xf32>
      %248 = arith.mulf %246, %247 : vector<16x128xf32>
      %cst_122 = arith.constant 0.000000e+00 : f32
      %249 = vector.broadcast %cst_122 : f32 to vector<16x1xf32>
      %250 = arith.cmpf one, %172, %249 : vector<16x1xf32>
      %251 = vector.shape_cast %250 : vector<16x1xi1> to vector<16x1xi1>
      %252 = vector.broadcast %251 : vector<16x1xi1> to vector<16x128xi1>
      %253 = arith.select %252, %210, %248 : vector<16x128xi1>, vector<16x128xf32>
      %c0_123 = arith.constant 0 : index
      %c0_124 = arith.constant 0 : index
      %254 = vector.load %arg33[%c0_123, %c0_124] : memref<16x128xf32, #tpu.memory_space<vmem>>, vector<16x128xf32>
      tpu.vector_store %arg33[%c0_123, %c0_124], %253 {strides = array<i32>} : memref<16x128xf32, #tpu.memory_space<vmem>>, vector<16x128xf32>,
    } else {
    }
    %c0 = arith.constant 0 : index
    %c0_1 = arith.constant 0 : index
    %3 = vector.load %arg33[%c0, %c0_1] : memref<16x128xf32, #tpu.memory_space<vmem>>, vector<16x128xf32>
    %4 = tpu.iota {dimensions = array<i32: 0>} : vector<8x8x15xi32>
    %5 = tpu.iota {dimensions = array<i32: 1>} : vector<8x8x15xi32>
    %6 = tpu.iota {dimensions = array<i32: 2>} : vector<8x8x15xi32>
    %7 = arith.subi %4, %5 : vector<8x8x15xi32>
    %c7_i32 = arith.constant 7 : i32
    %8 = vector.broadcast %c7_i32 : i32 to vector<8x8x15xi32>
    %9 = arith.addi %7, %8 : vector<8x8x15xi32>
    %10 = arith.cmpi eq, %9, %6 : vector<8x8x15xi32>
    %11 = arith.extui %10 : vector<8x8x15xi1> to vector<8x8x15xi32>
    %12 = arith.sitofp %11 : vector<8x8x15xi32> to vector<8x8x15xf32>
    %13 = vector.shape_cast %12 : vector<8x8x15xf32> to vector<64x15xf32>
    %c0_2 = arith.constant 0 : index
    %c0_3 = arith.constant 0 : index
    %c0_4 = arith.constant 0 : index
    %14 = vector.load %arg22[%c0_2, %c0_3, %c0_4] : memref<1x4x15xf32, #tpu.memory_space<vmem>>, vector<1x4x15xf32>
    %15 = vector.shape_cast %14 : vector<1x4x15xf32> to vector<4x15xf32>
    %cst = arith.constant dense<0.000000e+00> : vector<4x64xf32>
    %16 = tpu.matmul %15, %13, %cst {dimension_numbers = #tpu.dot_dimension_numbers<[1], [1], [0], [0], [0, 0, 1, 0], [], []>} : vector<4x15xf32>, vector<64x15xf32>, vector<4x64xf32> -> vector<4x64xf32>
    %17 = vector.shape_cast %16 : vector<4x64xf32> to vector<4x8x8xf32>
    %c0_5 = arith.constant 0 : index
    %c0_6 = arith.constant 0 : index
    %c0_7 = arith.constant 0 : index
    %18 = vector.load %arg15[%c0_5, %c0_6, %c0_7] : memref<1x1x128xf32, #tpu.memory_space<vmem>>, vector<1x1x128xf32>
    %19 = vector.shape_cast %18 : vector<1x1x128xf32> to vector<1x128xf32>
    %20 = arith.mulf %3, %3 : vector<16x128xf32>
    %cst_8 = arith.constant dense<0.000000e+00> : vector<16xf32>
    %21 = vector.multi_reduction <add>, %20, %cst_8 [1] : vector<16x128xf32> to vector<16xf32>
    %22 = vector.shape_cast %21 : vector<16xf32> to vector<16x1xf32>
    %cst_9 = arith.constant 1.280000e+02 : f32
    %23 = vector.broadcast %cst_9 : f32 to vector<16x1xf32>
    %24 = arith.divf %22, %23 : vector<16x1xf32>
    %cst_10 = arith.constant 9.99999993E-9 : f32
    %25 = vector.broadcast %cst_10 : f32 to vector<16x1xf32>
    %26 = arith.addf %24, %25 : vector<16x1xf32>
    %27 = math.rsqrt %26 : vector<16x1xf32>
    %28 = vector.broadcast %27 : vector<16x1xf32> to vector<16x128xf32>
    %29 = arith.mulf %3, %28 : vector<16x128xf32>
    %30 = vector.broadcast %19 : vector<1x128xf32> to vector<16x128xf32>
    %31 = arith.mulf %29, %30 : vector<16x128xf32>
    %32 = arith.truncf %31 : vector<16x128xf32> to vector<16x128xbf16>
    %c0_11 = arith.constant 0 : index
    %c0_12 = arith.constant 0 : index
    %c0_13 = arith.constant 0 : index
    %33 = vector.load %arg16[%c0_11, %c0_12, %c0_13] : memref<1x128x128xbf16, #tpu.memory_space<vmem>>, vector<1x128x128xbf16>
    %34 = vector.shape_cast %33 : vector<1x128x128xbf16> to vector<128x128xbf16>
    %cst_14 = arith.constant dense<0.000000e+00> : vector<16x128xf32>
    %35 = tpu.matmul %32, %34, %cst_14 {dimension_numbers = #tpu.dot_dimension_numbers<[1], [0], [0], [1], [0, 0, 1, 1], [], []>} : vector<16x128xbf16>, vector<128x128xbf16>, vector<16x128xf32> -> vector<16x128xf32>
    %c0_15 = arith.constant 0 : index
    %c0_16 = arith.constant 0 : index
    %c0_17 = arith.constant 0 : index
    %36 = vector.load %arg17[%c0_15, %c0_16, %c0_17] : memref<1x1x128xf32, #tpu.memory_space<vmem>>, vector<1x1x128xf32>
    %37 = vector.shape_cast %36 : vector<1x1x128xf32> to vector<1x128xf32>
    %38 = vector.broadcast %37 : vector<1x128xf32> to vector<16x128xf32>
    %39 = arith.addf %35, %38 : vector<16x128xf32>
    %c0_18 = arith.constant 0 : index
    %c0_19 = arith.constant 0 : index
    %c0_20 = arith.constant 0 : index
    %40 = vector.load %arg18[%c0_18, %c0_19, %c0_20] : memref<1x128x128xbf16, #tpu.memory_space<vmem>>, vector<1x128x128xbf16>
    %41 = vector.shape_cast %40 : vector<1x128x128xbf16> to vector<128x128xbf16>
    %cst_21 = arith.constant dense<0.000000e+00> : vector<16x128xf32>
    %42 = tpu.matmul %32, %41, %cst_21 {dimension_numbers = #tpu.dot_dimension_numbers<[1], [0], [0], [1], [0, 0, 1, 1], [], []>} : vector<16x128xbf16>, vector<128x128xbf16>, vector<16x128xf32> -> vector<16x128xf32>
    %c0_22 = arith.constant 0 : index
    %c0_23 = arith.constant 0 : index
    %c0_24 = arith.constant 0 : index
    %43 = vector.load %arg19[%c0_22, %c0_23, %c0_24] : memref<1x1x128xf32, #tpu.memory_space<vmem>>, vector<1x1x128xf32>
    %44 = vector.shape_cast %43 : vector<1x1x128xf32> to vector<1x128xf32>
    %45 = vector.broadcast %44 : vector<1x128xf32> to vector<16x128xf32>
    %46 = arith.addf %42, %45 : vector<16x128xf32>
    %c0_25 = arith.constant 0 : index
    %c0_26 = arith.constant 0 : index
    %c0_27 = arith.constant 0 : index
    %47 = vector.load %arg20[%c0_25, %c0_26, %c0_27] : memref<1x128x128xbf16, #tpu.memory_space<vmem>>, vector<1x128x128xbf16>
    %48 = vector.shape_cast %47 : vector<1x128x128xbf16> to vector<128x128xbf16>
    %cst_28 = arith.constant dense<0.000000e+00> : vector<16x128xf32>
    %49 = tpu.matmul %32, %48, %cst_28 {dimension_numbers = #tpu.dot_dimension_numbers<[1], [0], [0], [1], [0, 0, 1, 1], [], []>} : vector<16x128xbf16>, vector<128x128xbf16>, vector<16x128xf32> -> vector<16x128xf32>
    %c0_29 = arith.constant 0 : index
    %c0_30 = arith.constant 0 : index
    %c0_31 = arith.constant 0 : index
    %50 = vector.load %arg21[%c0_29, %c0_30, %c0_31] : memref<1x1x128xf32, #tpu.memory_space<vmem>>, vector<1x1x128xf32>
    %51 = vector.shape_cast %50 : vector<1x1x128xf32> to vector<1x128xf32>
    %52 = vector.broadcast %51 : vector<1x128xf32> to vector<16x128xf32>
    %53 = arith.addf %49, %52 : vector<16x128xf32>
    %cst_32 = arith.constant 0.176776692 : f32
    %54 = vector.broadcast %cst_32 : f32 to vector<16x128xf32>
    %55 = arith.mulf %39, %54 : vector<16x128xf32>
    %56 = vector.shape_cast %55 : vector<16x128xf32> to vector<16x4x32xf32>
    %57 = vector.shape_cast %46 : vector<16x128xf32> to vector<16x4x32xf32>
    %58 = vector.shape_cast %53 : vector<16x128xf32> to vector<16x4x32xf32>
    %59 = vector.extract_strided_slice %56 {offsets = [0, 0, 0], sizes = [8, 4, 32], strides = [1, 1, 1]} : vector<16x4x32xf32> to vector<8x4x32xf32>
    %60 = tpu.transpose %59, [1, 0, 2] : vector<8x4x32xf32> -> vector<4x8x32xf32>
    %61 = arith.truncf %60 : vector<4x8x32xf32> to vector<4x8x32xbf16>
    %62 = vector.extract_strided_slice %57 {offsets = [0, 0, 0], sizes = [8, 4, 32], strides = [1, 1, 1]} : vector<16x4x32xf32> to vector<8x4x32xf32>
    %63 = tpu.transpose %62, [1, 0, 2] : vector<8x4x32xf32> -> vector<4x8x32xf32>
    %64 = arith.truncf %63 : vector<4x8x32xf32> to vector<4x8x32xbf16>
    %65 = vector.extract_strided_slice %58 {offsets = [0, 0, 0], sizes = [8, 4, 32], strides = [1, 1, 1]} : vector<16x4x32xf32> to vector<8x4x32xf32>
    %66 = tpu.transpose %65, [1, 0, 2] : vector<8x4x32xf32> -> vector<4x8x32xf32>
    %67 = arith.truncf %66 : vector<4x8x32xf32> to vector<4x8x32xbf16>
    "tpu.trace_start"() <{level = 10 : i32, message = "hqd,hkd->hqk"}> : () -> ()
    %cst_33 = arith.constant dense<0.000000e+00> : vector<4x8x8xf32>
    %68 = tpu.matmul %61, %64, %cst_33 {dimension_numbers = #tpu.dot_dimension_numbers<[2], [2], [1], [1], [0, 0, 0, 1, 1, 1], [0], [0]>} : vector<4x8x32xbf16>, vector<4x8x32xbf16>, vector<4x8x8xf32> -> vector<4x8x8xf32>
    "tpu.trace_stop"() : () -> ()
    %69 = arith.addf %68, %17 : vector<4x8x8xf32>
    %cst_34 = arith.constant dense<0xFF800000> : vector<4x8xf32>
    %70 = vector.multi_reduction <maximumf>, %69, %cst_34 [2] : vector<4x8x8xf32> to vector<4x8xf32>
    %71 = vector.shape_cast %70 : vector<4x8xf32> to vector<4x8x1xf32>
    %72 = vector.broadcast %71 : vector<4x8x1xf32> to vector<4x8x8xf32>
    %73 = arith.subf %69, %72 : vector<4x8x8xf32>
    %74 = math.exp %73 : vector<4x8x8xf32>
    %cst_35 = arith.constant dense<0.000000e+00> : vector<4x8xf32>
    %75 = vector.multi_reduction <add>, %74, %cst_35 [2] : vector<4x8x8xf32> to vector<4x8xf32>
    %76 = vector.shape_cast %75 : vector<4x8xf32> to vector<4x8x1xf32>
    %77 = tpu.reciprocal %76 {approx = true} : vector<4x8x1xf32> -> vector<4x8x1xf32>
    %78 = vector.broadcast %77 : vector<4x8x1xf32> to vector<4x8x8xf32>
    %79 = arith.mulf %74, %78 : vector<4x8x8xf32>
    %80 = arith.truncf %79 : vector<4x8x8xf32> to vector<4x8x8xbf16>
    "tpu.trace_start"() <{level = 10 : i32, message = "hqk,hkd->hqd"}> : () -> ()
    %cst_36 = arith.constant dense<0.000000e+00> : vector<4x8x32xf32>
    %81 = tpu.matmul %80, %67, %cst_36 {dimension_numbers = #tpu.dot_dimension_numbers<[2], [1], [1], [2], [0, 0, 0, 1, 1, 2], [0], [0]>} : vector<4x8x8xbf16>, vector<4x8x32xbf16>, vector<4x8x32xf32> -> vector<4x8x32xf32>
    "tpu.trace_stop"() : () -> ()
    %82 = tpu.transpose %81, [1, 0, 2] : vector<4x8x32xf32> -> vector<8x4x32xf32>
    %83 = vector.shape_cast %82 : vector<8x4x32xf32> to vector<8x128xf32>
    %84 = vector.extract_strided_slice %56 {offsets = [8, 0, 0], sizes = [8, 4, 32], strides = [1, 1, 1]} : vector<16x4x32xf32> to vector<8x4x32xf32>
    %85 = tpu.transpose %84, [1, 0, 2] : vector<8x4x32xf32> -> vector<4x8x32xf32>
    %86 = arith.truncf %85 : vector<4x8x32xf32> to vector<4x8x32xbf16>
    %87 = vector.extract_strided_slice %57 {offsets = [8, 0, 0], sizes = [8, 4, 32], strides = [1, 1, 1]} : vector<16x4x32xf32> to vector<8x4x32xf32>
    %88 = tpu.transpose %87, [1, 0, 2] : vector<8x4x32xf32> -> vector<4x8x32xf32>
    %89 = arith.truncf %88 : vector<4x8x32xf32> to vector<4x8x32xbf16>
    %90 = vector.extract_strided_slice %58 {offsets = [8, 0, 0], sizes = [8, 4, 32], strides = [1, 1, 1]} : vector<16x4x32xf32> to vector<8x4x32xf32>
    %91 = tpu.transpose %90, [1, 0, 2] : vector<8x4x32xf32> -> vector<4x8x32xf32>
    %92 = arith.truncf %91 : vector<4x8x32xf32> to vector<4x8x32xbf16>
    "tpu.trace_start"() <{level = 10 : i32, message = "hqd,hkd->hqk"}> : () -> ()
    %cst_37 = arith.constant dense<0.000000e+00> : vector<4x8x8xf32>
    %93 = tpu.matmul %86, %89, %cst_37 {dimension_numbers = #tpu.dot_dimension_numbers<[2], [2], [1], [1], [0, 0, 0, 1, 1, 1], [0], [0]>} : vector<4x8x32xbf16>, vector<4x8x32xbf16>, vector<4x8x8xf32> -> vector<4x8x8xf32>
    "tpu.trace_stop"() : () -> ()
    %94 = arith.addf %93, %17 : vector<4x8x8xf32>
    %cst_38 = arith.constant dense<0xFF800000> : vector<4x8xf32>
    %95 = vector.multi_reduction <maximumf>, %94, %cst_38 [2] : vector<4x8x8xf32> to vector<4x8xf32>
    %96 = vector.shape_cast %95 : vector<4x8xf32> to vector<4x8x1xf32>
    %97 = vector.broadcast %96 : vector<4x8x1xf32> to vector<4x8x8xf32>
    %98 = arith.subf %94, %97 : vector<4x8x8xf32>
    %99 = math.exp %98 : vector<4x8x8xf32>
    %cst_39 = arith.constant dense<0.000000e+00> : vector<4x8xf32>
    %100 = vector.multi_reduction <add>, %99, %cst_39 [2] : vector<4x8x8xf32> to vector<4x8xf32>
    %101 = vector.shape_cast %100 : vector<4x8xf32> to vector<4x8x1xf32>
    %102 = tpu.reciprocal %101 {approx = true} : vector<4x8x1xf32> -> vector<4x8x1xf32>
    %103 = vector.broadcast %102 : vector<4x8x1xf32> to vector<4x8x8xf32>
    %104 = arith.mulf %99, %103 : vector<4x8x8xf32>
    %105 = arith.truncf %104 : vector<4x8x8xf32> to vector<4x8x8xbf16>
    "tpu.trace_start"() <{level = 10 : i32, message = "hqk,hkd->hqd"}> : () -> ()
    %cst_40 = arith.constant dense<0.000000e+00> : vector<4x8x32xf32>
    %106 = tpu.matmul %105, %92, %cst_40 {dimension_numbers = #tpu.dot_dimension_numbers<[2], [1], [1], [2], [0, 0, 0, 1, 1, 2], [0], [0]>} : vector<4x8x8xbf16>, vector<4x8x32xbf16>, vector<4x8x32xf32> -> vector<4x8x32xf32>
    "tpu.trace_stop"() : () -> ()
    %107 = tpu.transpose %106, [1, 0, 2] : vector<4x8x32xf32> -> vector<8x4x32xf32>
    %108 = vector.shape_cast %107 : vector<8x4x32xf32> to vector<8x128xf32>
    %109 = tpu.concatenate %83, %108 in 0 : vector<8x128xf32>, vector<8x128xf32> -> vector<16x128xf32>
    %110 = arith.truncf %109 : vector<16x128xf32> to vector<16x128xbf16>
    %c0_41 = arith.constant 0 : index
    %c0_42 = arith.constant 0 : index
    %c0_43 = arith.constant 0 : index
    %111 = vector.load %arg23[%c0_41, %c0_42, %c0_43] : memref<1x128x128xbf16, #tpu.memory_space<vmem>>, vector<1x128x128xbf16>
    %112 = vector.shape_cast %111 : vector<1x128x128xbf16> to vector<128x128xbf16>
    %cst_44 = arith.constant dense<0.000000e+00> : vector<16x128xf32>
    %113 = tpu.matmul %110, %112, %cst_44 {dimension_numbers = #tpu.dot_dimension_numbers<[1], [0], [0], [1], [0, 0, 1, 1], [], []>} : vector<16x128xbf16>, vector<128x128xbf16>, vector<16x128xf32> -> vector<16x128xf32>
    %c0_45 = arith.constant 0 : index
    %c0_46 = arith.constant 0 : index
    %c0_47 = arith.constant 0 : index
    %114 = vector.load %arg24[%c0_45, %c0_46, %c0_47] : memref<1x1x128xf32, #tpu.memory_space<vmem>>, vector<1x1x128xf32>
    %115 = vector.shape_cast %114 : vector<1x1x128xf32> to vector<1x128xf32>
    %116 = vector.broadcast %115 : vector<1x128xf32> to vector<16x128xf32>
    %117 = arith.addf %113, %116 : vector<16x128xf32>
    %118 = arith.addf %3, %117 : vector<16x128xf32>
    %c0_48 = arith.constant 0 : index
    %c0_49 = arith.constant 0 : index
    %c0_50 = arith.constant 0 : index
    %119 = vector.load %arg25[%c0_48, %c0_49, %c0_50] : memref<1x1x128xf32, #tpu.memory_space<vmem>>, vector<1x1x128xf32>
    %120 = vector.shape_cast %119 : vector<1x1x128xf32> to vector<1x128xf32>
    %121 = arith.mulf %118, %118 : vector<16x128xf32>
    %cst_51 = arith.constant dense<0.000000e+00> : vector<16xf32>
    %122 = vector.multi_reduction <add>, %121, %cst_51 [1] : vector<16x128xf32> to vector<16xf32>
    %123 = vector.shape_cast %122 : vector<16xf32> to vector<16x1xf32>
    %cst_52 = arith.constant 1.280000e+02 : f32
    %124 = vector.broadcast %cst_52 : f32 to vector<16x1xf32>
    %125 = arith.divf %123, %124 : vector<16x1xf32>
    %cst_53 = arith.constant 9.99999993E-9 : f32
    %126 = vector.broadcast %cst_53 : f32 to vector<16x1xf32>
    %127 = arith.addf %125, %126 : vector<16x1xf32>
    %128 = math.rsqrt %127 : vector<16x1xf32>
    %129 = vector.broadcast %128 : vector<16x1xf32> to vector<16x128xf32>
    %130 = arith.mulf %118, %129 : vector<16x128xf32>
    %131 = vector.broadcast %120 : vector<1x128xf32> to vector<16x128xf32>
    %132 = arith.mulf %130, %131 : vector<16x128xf32>
    %133 = arith.truncf %132 : vector<16x128xf32> to vector<16x128xbf16>
    %c0_54 = arith.constant 0 : index
    %c0_55 = arith.constant 0 : index
    %c0_56 = arith.constant 0 : index
    %134 = vector.load %arg26[%c0_54, %c0_55, %c0_56] : memref<1x128x512xbf16, #tpu.memory_space<vmem>>, vector<1x128x512xbf16>
    %135 = vector.shape_cast %134 : vector<1x128x512xbf16> to vector<128x512xbf16>
    %cst_57 = arith.constant dense<0.000000e+00> : vector<16x512xf32>
    %136 = tpu.matmul %133, %135, %cst_57 {dimension_numbers = #tpu.dot_dimension_numbers<[1], [0], [0], [1], [0, 0, 1, 1], [], []>} : vector<16x128xbf16>, vector<128x512xbf16>, vector<16x512xf32> -> vector<16x512xf32>
    %c0_58 = arith.constant 0 : index
    %c0_59 = arith.constant 0 : index
    %c0_60 = arith.constant 0 : index
    %137 = vector.load %arg27[%c0_58, %c0_59, %c0_60] : memref<1x1x512xf32, #tpu.memory_space<vmem>>, vector<1x1x512xf32>
    %138 = vector.shape_cast %137 : vector<1x1x512xf32> to vector<1x512xf32>
    %139 = vector.broadcast %138 : vector<1x512xf32> to vector<16x512xf32>
    %140 = arith.addf %136, %139 : vector<16x512xf32>
    %cst_61 = arith.constant 5.000000e-01 : f32
    %141 = vector.broadcast %cst_61 : f32 to vector<16x512xf32>
    %142 = arith.mulf %141, %140 : vector<16x512xf32>
    %cst_62 = arith.constant 4.471500e-02 : f32
    %143 = vector.broadcast %cst_62 : f32 to vector<16x512xf32>
    %144 = arith.mulf %143, %140 : vector<16x512xf32>
    %145 = arith.mulf %144, %140 : vector<16x512xf32>
    %146 = arith.mulf %145, %140 : vector<16x512xf32>
    %147 = arith.addf %140, %146 : vector<16x512xf32>
    %cst_63 = arith.constant 0.797884583 : f32
    %148 = vector.broadcast %cst_63 : f32 to vector<16x512xf32>
    %149 = arith.mulf %148, %147 : vector<16x512xf32>
    %150 = math.tanh %149 : vector<16x512xf32>
    %cst_64 = arith.constant 1.000000e+00 : f32
    %151 = vector.broadcast %cst_64 : f32 to vector<16x512xf32>
    %152 = arith.addf %151, %150 : vector<16x512xf32>
    %153 = arith.mulf %142, %152 : vector<16x512xf32>
    %154 = arith.truncf %153 : vector<16x512xf32> to vector<16x512xbf16>
    %c0_65 = arith.constant 0 : index
    %c0_66 = arith.constant 0 : index
    %c0_67 = arith.constant 0 : index
    %155 = vector.load %arg28[%c0_65, %c0_66, %c0_67] : memref<1x512x128xbf16, #tpu.memory_space<vmem>>, vector<1x512x128xbf16>
    %156 = vector.shape_cast %155 : vector<1x512x128xbf16> to vector<512x128xbf16>
    %cst_68 = arith.constant dense<0.000000e+00> : vector<16x128xf32>
    %157 = tpu.matmul %154, %156, %cst_68 {dimension_numbers = #tpu.dot_dimension_numbers<[1], [0], [0], [1], [0, 0, 1, 1], [], []>} : vector<16x512xbf16>, vector<512x128xbf16>, vector<16x128xf32> -> vector<16x128xf32>
    %c0_69 = arith.constant 0 : index
    %c0_70 = arith.constant 0 : index
    %c0_71 = arith.constant 0 : index
    %158 = vector.load %arg29[%c0_69, %c0_70, %c0_71] : memref<1x1x128xf32, #tpu.memory_space<vmem>>, vector<1x1x128xf32>
    %159 = vector.shape_cast %158 : vector<1x1x128xf32> to vector<1x128xf32>
    %160 = vector.broadcast %159 : vector<1x128xf32> to vector<16x128xf32>
    %161 = arith.addf %157, %160 : vector<16x128xf32>
    %162 = arith.addf %118, %161 : vector<16x128xf32>
    %c0_72 = arith.constant 0 : index
    %c0_73 = arith.constant 0 : index
    %163 = vector.load %arg33[%c0_72, %c0_73] : memref<16x128xf32, #tpu.memory_space<vmem>>, vector<16x128xf32>
    tpu.vector_store %arg33[%c0_72, %c0_73], %162 {strides = array<i32>} : memref<16x128xf32, #tpu.memory_space<vmem>>, vector<16x128xf32>,
    %c1_i32 = arith.constant 1 : i32
    %164 = arith.cmpi eq, %arg1, %c1_i32 : i32
    %165 = arith.extui %164 : i1 to i32
    %c0_i32_74 = arith.constant 0 : i32
    %166 = arith.cmpi ne, %165, %c0_i32_74 : i32
    scf.if %166 {
      %167 = arith.truncf %162 : vector<16x128xf32> to vector<16x128xbf16>
      %c0_75 = arith.constant 0 : index
      %c0_76 = arith.constant 0 : index
      %168 = vector.load %arg30[%c0_75, %c0_76] : memref<128x128xbf16, #tpu.memory_space<vmem>>, vector<128x128xbf16>
      %cst_77 = arith.constant dense<0.000000e+00> : vector<16x128xf32>
      %169 = tpu.matmul %167, %168, %cst_77 {dimension_numbers = #tpu.dot_dimension_numbers<[1], [0], [0], [1], [0, 0, 1, 1], [], []>} : vector<16x128xbf16>, vector<128x128xbf16>, vector<16x128xf32> -> vector<16x128xf32>
      %c0_78 = arith.constant 0 : index
      %c0_79 = arith.constant 0 : index
      %170 = vector.load %arg31[%c0_78, %c0_79] : memref<1x128xf32, #tpu.memory_space<vmem>>, vector<1x128xf32>
      %171 = vector.broadcast %170 : vector<1x128xf32> to vector<16x128xf32>
      %172 = arith.addf %169, %171 : vector<16x128xf32>
      %173 = vector.shape_cast %172 : vector<16x128xf32> to vector<2x8x128xf32>
      %c0_80 = arith.constant 0 : index
      %c0_81 = arith.constant 0 : index
      %c0_82 = arith.constant 0 : index
      %174 = vector.load %arg32[%c0_80, %c0_81, %c0_82] : memref<2x8x128xf32, #tpu.memory_space<vmem>>, vector<2x8x128xf32>
      tpu.vector_store %arg32[%c0_80, %c0_81, %c0_82], %173 {strides = array<i32>} : memref<2x8x128xf32, #tpu.memory_space<vmem>>, vector<2x8x128xf32>,
    } else {
    }
    return
  }
  func.func @transform_0(%arg0: i32, %arg1: i32) -> (i32, i32, i32) {
    %c0_i32 = arith.constant 0 : i32
    %c0_i32_0 = arith.constant 0 : i32
    %c0_i32_1 = arith.constant 0 : i32
    return %arg0, %c0_i32, %c0_i32_0 : i32, i32, i32
  }
  func.func @transform_1(%arg0: i32, %arg1: i32) -> (i32, i32, i32) {
    %c0_i32 = arith.constant 0 : i32
    %c0_i32_0 = arith.constant 0 : i32
    %c0_i32_1 = arith.constant 0 : i32
    return %arg0, %c0_i32, %c0_i32_0 : i32, i32, i32
  }
  func.func @transform_2(%arg0: i32, %arg1: i32) -> (i32, i32, i32) {
    %c0_i32 = arith.constant 0 : i32
    %c0_i32_0 = arith.constant 0 : i32
    %c0_i32_1 = arith.constant 0 : i32
    return %arg0, %c0_i32, %c0_i32_0 : i32, i32, i32
  }
  func.func @transform_3(%arg0: i32, %arg1: i32) -> (i32, i32) {
    %c0_i32 = arith.constant 0 : i32
    %c0_i32_0 = arith.constant 0 : i32
    %c0_i32_1 = arith.constant 0 : i32
    return %c0_i32, %c0_i32_0 : i32, i32
  }
  func.func @transform_4(%arg0: i32, %arg1: i32) -> (i32, i32) {
    %c0_i32 = arith.constant 0 : i32
    %c0_i32_0 = arith.constant 0 : i32
    %c0_i32_1 = arith.constant 0 : i32
    return %c0_i32, %c0_i32_0 : i32, i32
  }
  func.func @transform_5(%arg0: i32, %arg1: i32) -> (i32, i32) {
    %c0_i32 = arith.constant 0 : i32
    %c0_i32_0 = arith.constant 0 : i32
    %c0_i32_1 = arith.constant 0 : i32
    return %c0_i32, %c0_i32_0 : i32, i32
  }
  func.func @transform_6(%arg0: i32, %arg1: i32) -> (i32, i32) {
    %c0_i32 = arith.constant 0 : i32
    %c0_i32_0 = arith.constant 0 : i32
    %c0_i32_1 = arith.constant 0 : i32
    return %c0_i32, %c0_i32_0 : i32, i32
  }
  func.func @transform_7(%arg0: i32, %arg1: i32) -> (i32, i32) {
    %c0_i32 = arith.constant 0 : i32
    %c0_i32_0 = arith.constant 0 : i32
    %c0_i32_1 = arith.constant 0 : i32
    return %c0_i32, %c0_i32_0 : i32, i32
  }
  func.func @transform_8(%arg0: i32, %arg1: i32) -> (i32, i32) {
    %c0_i32 = arith.constant 0 : i32
    %c0_i32_0 = arith.constant 0 : i32
    %c0_i32_1 = arith.constant 0 : i32
    return %c0_i32, %c0_i32_0 : i32, i32
  }
  func.func @transform_9(%arg0: i32, %arg1: i32) -> (i32, i32) {
    %c0_i32 = arith.constant 0 : i32
    %c0_i32_0 = arith.constant 0 : i32
    %c0_i32_1 = arith.constant 0 : i32
    return %c0_i32, %c0_i32_0 : i32, i32
  }
  func.func @transform_10(%arg0: i32, %arg1: i32) -> (i32, i32) {
    %c0_i32 = arith.constant 0 : i32
    %c0_i32_0 = arith.constant 0 : i32
    %c0_i32_1 = arith.constant 0 : i32
    return %c0_i32, %c0_i32_0 : i32, i32
  }
  func.func @transform_11(%arg0: i32, %arg1: i32) -> (i32, i32) {
    %c0_i32 = arith.constant 0 : i32
    %c0_i32_0 = arith.constant 0 : i32
    %c0_i32_1 = arith.constant 0 : i32
    return %c0_i32, %c0_i32_0 : i32, i32
  }
  func.func @transform_12(%arg0: i32, %arg1: i32) -> (i32, i32) {
    %c0_i32 = arith.constant 0 : i32
    %c0_i32_0 = arith.constant 0 : i32
    %c0_i32_1 = arith.constant 0 : i32
    return %c0_i32, %c0_i32_0 : i32, i32
  }
  func.func @transform_13(%arg0: i32, %arg1: i32) -> (i32, i32, i32) {
    %c0_i32 = arith.constant 0 : i32
    %c0_i32_0 = arith.constant 0 : i32
    %c0_i32_1 = arith.constant 0 : i32
    return %arg1, %c0_i32, %c0_i32_0 : i32, i32, i32
  }
  func.func @transform_14(%arg0: i32, %arg1: i32) -> (i32, i32, i32) {
    %c0_i32 = arith.constant 0 : i32
    %c0_i32_0 = arith.constant 0 : i32
    %c0_i32_1 = arith.constant 0 : i32
    return %arg1, %c0_i32, %c0_i32_0 : i32, i32, i32
  }
  func.func @transform_15(%arg0: i32, %arg1: i32) -> (i32, i32, i32) {
    %c0_i32 = arith.constant 0 : i32
    %c0_i32_0 = arith.constant 0 : i32
    %c0_i32_1 = arith.constant 0 : i32
    return %arg1, %c0_i32, %c0_i32_0 : i32, i32, i32
  }
  func.func @transform_16(%arg0: i32, %arg1: i32) -> (i32, i32, i32) {
    %c0_i32 = arith.constant 0 : i32
    %c0_i32_0 = arith.constant 0 : i32
    %c0_i32_1 = arith.constant 0 : i32
    return %arg1, %c0_i32, %c0_i32_0 : i32, i32, i32
  }
  func.func @transform_17(%arg0: i32, %arg1: i32) -> (i32, i32, i32) {
    %c0_i32 = arith.constant 0 : i32
    %c0_i32_0 = arith.constant 0 : i32
    %c0_i32_1 = arith.constant 0 : i32
    return %arg1, %c0_i32, %c0_i32_0 : i32, i32, i32
  }
  func.func @transform_18(%arg0: i32, %arg1: i32) -> (i32, i32, i32) {
    %c0_i32 = arith.constant 0 : i32
    %c0_i32_0 = arith.constant 0 : i32
    %c0_i32_1 = arith.constant 0 : i32
    return %arg1, %c0_i32, %c0_i32_0 : i32, i32, i32
  }
  func.func @transform_19(%arg0: i32, %arg1: i32) -> (i32, i32, i32) {
    %c0_i32 = arith.constant 0 : i32
    %c0_i32_0 = arith.constant 0 : i32
    %c0_i32_1 = arith.constant 0 : i32
    return %arg1, %c0_i32, %c0_i32_0 : i32, i32, i32
  }
  func.func @transform_20(%arg0: i32, %arg1: i32) -> (i32, i32, i32) {
    %c0_i32 = arith.constant 0 : i32
    %c0_i32_0 = arith.constant 0 : i32
    %c0_i32_1 = arith.constant 0 : i32
    return %arg1, %c0_i32, %c0_i32_0 : i32, i32, i32
  }
  func.func @transform_21(%arg0: i32, %arg1: i32) -> (i32, i32, i32) {
    %c0_i32 = arith.constant 0 : i32
    %c0_i32_0 = arith.constant 0 : i32
    %c0_i32_1 = arith.constant 0 : i32
    return %arg1, %c0_i32, %c0_i32_0 : i32, i32, i32
  }
  func.func @transform_22(%arg0: i32, %arg1: i32) -> (i32, i32, i32) {
    %c0_i32 = arith.constant 0 : i32
    %c0_i32_0 = arith.constant 0 : i32
    %c0_i32_1 = arith.constant 0 : i32
    return %arg1, %c0_i32, %c0_i32_0 : i32, i32, i32
  }
  func.func @transform_23(%arg0: i32, %arg1: i32) -> (i32, i32, i32) {
    %c0_i32 = arith.constant 0 : i32
    %c0_i32_0 = arith.constant 0 : i32
    %c0_i32_1 = arith.constant 0 : i32
    return %arg1, %c0_i32, %c0_i32_0 : i32, i32, i32
  }
  func.func @transform_24(%arg0: i32, %arg1: i32) -> (i32, i32, i32) {
    %c0_i32 = arith.constant 0 : i32
    %c0_i32_0 = arith.constant 0 : i32
    %c0_i32_1 = arith.constant 0 : i32
    return %arg1, %c0_i32, %c0_i32_0 : i32, i32, i32
  }
  func.func @transform_25(%arg0: i32, %arg1: i32) -> (i32, i32, i32) {
    %c0_i32 = arith.constant 0 : i32
    %c0_i32_0 = arith.constant 0 : i32
    %c0_i32_1 = arith.constant 0 : i32
    return %arg1, %c0_i32, %c0_i32_0 : i32, i32, i32
  }
  func.func @transform_26(%arg0: i32, %arg1: i32) -> (i32, i32, i32) {
    %c0_i32 = arith.constant 0 : i32
    %c0_i32_0 = arith.constant 0 : i32
    %c0_i32_1 = arith.constant 0 : i32
    return %arg1, %c0_i32, %c0_i32_0 : i32, i32, i32
  }
  func.func @transform_27(%arg0: i32, %arg1: i32) -> (i32, i32, i32) {
    %c0_i32 = arith.constant 0 : i32
    %c0_i32_0 = arith.constant 0 : i32
    %c0_i32_1 = arith.constant 0 : i32
    return %arg1, %c0_i32, %c0_i32_0 : i32, i32, i32
  }
  func.func @transform_28(%arg0: i32, %arg1: i32) -> (i32, i32) {
    %c0_i32 = arith.constant 0 : i32
    %c0_i32_0 = arith.constant 0 : i32
    %c0_i32_1 = arith.constant 0 : i32
    return %c0_i32, %c0_i32_0 : i32, i32
  }
  func.func @transform_29(%arg0: i32, %arg1: i32) -> (i32, i32) {
    %c0_i32 = arith.constant 0 : i32
    %c0_i32_0 = arith.constant 0 : i32
    %c0_i32_1 = arith.constant 0 : i32
    return %c0_i32, %c0_i32_0 : i32, i32
  }
  func.func @transform_30(%arg0: i32, %arg1: i32) -> (i32, i32, i32) {
    %c0_i32 = arith.constant 0 : i32
    %c0_i32_0 = arith.constant 0 : i32
    %c0_i32_1 = arith.constant 0 : i32
    return %arg0, %c0_i32, %c0_i32_0 : i32, i32, i32
  }
}

</mosaic_0001>

<bundles_post_ra>
// kernel: tpu_custom_call.1
= control target key start
LH: loop header
LB: loop body
LE: loop exit
PB: predicated region body
PF: predicated region fallthrough
CT: control target
= control target key end

     0   :  { %s8896_s6 = smov 1   ;;  %s8897_s10 = smov 2   ;;  %s10430_s0 = inlined_call_operand.smem [shape: u32[31], index: -1, kind: input, shape index: {}] }
   0x1   :  { %s8975_s5 = sld [smem:[%s10430_s0]]   ;;  %s8898_s14 = smov 3  }
   0x2   :  { %s8980_s9 = sld [smem:[%s10430_s0 + %s8896_s6]]   ;;  %s8899_s18 = smov 4  }
   0x3   :  { %s8985_s13 = sld [smem:[%s10430_s0 + %s8897_s10]]   ;;  %s8900_s22 = smov 5  }
   0x4   :  { %s8990_s17 = sld [smem:[%s10430_s0 + %s8898_s14]]   ;;  %s8901_s26 = smov 6  }
   0x5   :  { %s8995_s21 = sld [smem:[%s10430_s0 + %s8899_s18]]   ;;  %s8902_s30 = smov 7  }
   0x6   :  { %s9000_s25 = sld [smem:[%s10430_s0 + %s8900_s22]]   ;;  %s8903_s4 = smov 8  }
   0x7   :  { %10478 = sst [smem:[#allocation31_spill]] %s8975_s5  ;;  %s8904_s10 = smov 9  }
   0x8   :  { %10479 = sst [smem:[#allocation32_spill]] %s8980_s9  ;;  %s8905_s15 = smov 10  }
   0x9   :  { %10480 = sst [smem:[#allocation33_spill]] %s8985_s13  ;;  %s8906_s20 = smov 11  }
   0xa   :  { %10481 = sst [smem:[#allocation34_spill]] %s8990_s17  ;;  %s8908_s1 = smov 13  }
   0xb   :  { %10482 = sst [smem:[#allocation35_spill]] %s8995_s21  ;;  %s8909_s7 = smov 14  }
   0xc   :  { %10483 = sst [smem:[#allocation36_spill]] %s9000_s25  ;;  %s8911_s22 = smov 16  }
   0xd   :  { %s9005_s29 = sld [smem:[%s10430_s0 + %s8901_s26]]   ;;  %s8907_s26 = smov 12  }
   0xe   :  { %s9010_s3 = sld [smem:[%s10430_s0 + %s8902_s30]]   ;;  %s8912_s28 = smov 17  }
   0xf   :  { %s9015_s8 = sld [smem:[%s10430_s0 + %s8903_s4]]  }
  0x10   :  { %s9020_s14 = sld [smem:[%s10430_s0 + %s8904_s10]]  }
  0x11   :  { %s9025_s19 = sld [smem:[%s10430_s0 + %s8905_s15]]   ;;  %s8910_s15 = smov 15  }
  0x12   :  { %s9030_s24 = sld [smem:[%s10430_s0 + %s8906_s20]]  }
  0x13   :  { %10484 = sst [smem:[#allocation37_spill]] %s9005_s29 }
  0x14   :  { %10485 = sst [smem:[#allocation38_spill]] %s9010_s3 }
  0x15   :  { %10486 = sst [smem:[#allocation39_spill]] %s9015_s8 }
  0x16   :  { %10487 = sst [smem:[#allocation40_spill]] %s9020_s14 }
  0x17   :  { %10488 = sst [smem:[#allocation41_spill]] %s9025_s19 }
  0x18   :  { %10489 = sst [smem:[#allocation42_spill]] %s9030_s24 }
  0x19   :  { %s9035_s30 = sld [smem:[%s10430_s0 + %s8907_s26]]  }
  0x1a   :  { %s9040_s6 = sld [smem:[%s10430_s0 + %s8908_s1]]  }
  0x1b   :  { %s9045_s12 = sld [smem:[%s10430_s0 + %s8909_s7]]   ;;  %s8913_s7 = smov 18  }
  0x1c   :  { %s9050_s20 = sld [smem:[%s10430_s0 + %s8910_s15]]   ;;  %s8914_s15 = smov 19  }
  0x1d   :  { %s9055_s27 = sld [smem:[%s10430_s0 + %s8911_s22]]   ;;  %s8915_s22 = smov 20  }
  0x1e   :  { %s9060_s4 = sld [smem:[%s10430_s0 + %s8912_s28]]   ;;  %s8916_s28 = smov 21  }
  0x1f   :  { %10490 = sst [smem:[#allocation43_spill]] %s9035_s30 }
  0x20   :  { %10491 = sst [smem:[#allocation44_spill]] %s9040_s6 }
  0x21   :  { %10492 = sst [smem:[#allocation45_spill]] %s9045_s12 }
  0x22   :  { %10493 = sst [smem:[#allocation46_spill]] %s9050_s20 }
  0x23   :  { %10494 = sst [smem:[#allocation47_spill]] %s9055_s27 }
  0x24   :  { %10495 = sst [smem:[#allocation48_spill]] %s9060_s4 }
  0x25   :  { %s9065_s30 = sld [smem:[%s10430_s0 + %s8913_s7]]   ;;  %s8917_s7 = smov 22  }
  0x26   :  { %s9070_s24 = sld [smem:[%s10430_s0 + %s8914_s15]]   ;;  %s8918_s15 = smov 23  }
  0x27   :  { %s9075_s13 = sld [smem:[%s10430_s0 + %s8915_s22]]   ;;  %s8919_s22 = smov 24  }
  0x28   :  { %s9080_s14 = sld [smem:[%s10430_s0 + %s8916_s28]]   ;;  %s8920_s28 = smov 25  }
  0x29   :  { %s9085_s5 = sld [smem:[%s10430_s0 + %s8917_s7]]   ;;  %s8921_s7 = smov 26  }
  0x2a   :  { %s9100_s4 = sld [smem:[%s10430_s0 + %s8920_s28]]   ;;  %s8924_s28 = smov 29  }
  0x2c   :  { %10496 = sst [smem:[#allocation49_spill]] %s9070_s24 }
  0x2d   :  { %10497 = sst [smem:[#allocation50_spill]] %s9075_s13 }
  0x2e   :  { %10498 = sst [smem:[#allocation51_spill]] %s9080_s14 }
  0x2f   :  { %10499 = sst [smem:[#allocation52_spill]] %s9085_s5 }
  0x30   :  { %s9090_s24 = sld [smem:[%s10430_s0 + %s8918_s15]]   ;;  %s8922_s15 = smov 27  }
  0x31   :  { %s9095_s13 = sld [smem:[%s10430_s0 + %s8919_s22]]   ;;  %s8923_s22 = smov 28  }
  0x32   :  { %10502 = sst [smem:[#allocation55_spill]] %s9100_s4 }
  0x33   :  { %s9105_s5 = sld [smem:[%s10430_s0 + %s8921_s7]]   ;;  %s8925_s7 = smov 30  }
  0x34   :  { %s9115_s20 = sld [smem:[%s10430_s0 + %s8923_s22]]  }
  0x35   :  { %s9120_s4 = sld [smem:[%s10430_s0 + %s8924_s28]]  }
  0x36   :  { %10500 = sst [smem:[#allocation53_spill]] %s9090_s24 }
  0x37   :  { %10501 = sst [smem:[#allocation54_spill]] %s9095_s13 }
  0x38   :  { %s9110_s24 = sld [smem:[%s10430_s0 + %s8922_s15]]  }
  0x39   :  { %10503 = sst [smem:[#allocation56_spill]] %s9105_s5 }
  0x3a   :  { %10505 = sst [smem:[#allocation58_spill]] %s9115_s20 }
  0x3b   :  { %10506 = sst [smem:[#allocation59_spill]] %s9120_s4 }
  0x3c   :  { %s9125_s6 = sld [smem:[%s10430_s0 + %s8925_s7]]  }
  0x3e   :  { %10504 = sst [smem:[#allocation57_spill]] %s9110_s24 }
  0x42   :  { %10507 = sst [smem:[#allocation60_spill]] %s9125_s6 }
  0x43   :  { %66 = vsyncpa [#allocation4], 0 }
  0x44   :  { %67 = vsyncpa [#allocation7], 0 }
  0x45   :  { %68 = vsyncpa [#allocation10], 0 }
  0x46   :  { %69 = vsyncpa [#allocation13], 0 }
  0x47   :  { %70 = vsyncpa [#allocation16], 0 }
  0x48   :  { %71 = vsyncpa [#allocation5], 0  ;;  %s9127_s15 = smov 0   ;;  %s9129_s16 = smov 0  }
  0x49   :  { %s9131_s18 = smov 0   ;;  %s9133_s22 = smov 0  }
  0x4a   :  { %s9135_s23 = smov 0   ;;  %s9137_s26 = smov 0  }
  0x4b LB: > { %s10508_s29 = sld [smem:[#allocation37_spill]]  ;;  %s10509_s27 = sld [smem:[#allocation47_spill]]  ;;  %s8894_s26 = sphi %s9137_s26, %s77_s26   ;;  %s8890_s23 = sphi %s9135_s23, %s10602_s23   ;;  %s8886_s22 = sphi %s9133_s22, %s10601_s22   ;;  %s8882_s18 = sphi %s9131_s18, %s10600_s18   ;;  %s8878_s16 = sphi %s9129_s16, %s10599_s16   ;;  %s8874_s15 = sphi %s9127_s15, %s10596_s15  }
  0x4c   : > { %s10510_s25 = sld [smem:[#allocation36_spill]]  ;;  %s10511_s21 = sld [smem:[#allocation35_spill]] }
  0x4d   : > { %s10512_s17 = sld [smem:[#allocation34_spill]]  ;;  %s10513_s14 = sld [smem:[#allocation51_spill]] }
  0x4e   : > { %s10514_s13 = sld [smem:[#allocation54_spill]]  ;;  %s10515_s12 = sld [smem:[#allocation45_spill]] }
  0x4f   : > { %s10516_s8 = sld [smem:[#allocation39_spill]]  ;;  %s10517_s5 = sld [smem:[#allocation56_spill]] }
  0x50   : > { %s10518_s3 = sld [smem:[#allocation38_spill]]  ;;  %s10519_s9 = sld [smem:[#allocation32_spill]] }
  0x51   : > { %10520 = sst [smem:[#allocation61_spill]] %s8878_s16  ;;  %s9158_s0 = sadd.s32 4294967295, %s8894_s26  }
  0x52   : > { %10521 = sst [smem:[#allocation62_spill]] %s8886_s22  ;;  %p6970_p0 = scmp.ge.s32.totalorder %s8894_s26, 1 }
  0x53   : > { %10522 = sst [smem:[#allocation63_spill]] %s8894_s26  ;;  %p10433_p1 = scmp.eq.s32.totalorder %s9158_s0, 0 }
  0x54   : > { %10523 = sst [smem:[#allocation64_spill]] %s9158_s0  ;;  %p840_p2 = scmp.lt.s32.totalorder %s8894_s26, 3 }
  0x55   : > { %s8926_s1 = smov [#allocation3]  }
  0x56   : > { %p9163_p3 = pnand %p6970_p0, %p840_p2  ;;  %s864_s2 = sshll.u32 %s8926_s1, 4  ;;  %s865_s2 = int_to_ptr.vmem [resolvable:$true] %s864_s2 }
  0x57   : > { %s8390_s10 = scalar_lea.hbm %s10519_s9, 256 }
  0x58   : > { %s10524_s28 = scalar_select %p9163_p3, 1, 0 }
  0x59   : > { %p7819_p4 = pneg %p9163_p3  ;;  %p8391_p6 = scmp.ne.s32.totalorder %s10519_s9, %s8390_s10 }
  0x5a   : > { %10525 = sst [smem:[#allocation65_spill]] %s10524_s28  ;;  %p8397_p10 = scmp.lt.u32.totalorder %s8390_s10, %s10519_s9 }
  0x5b   : > { %p9171_p5 = pnand %p7819_p4, %p10433_p1 }
  0x5d   : > { %s10526_s7 = scalar_select %p9171_p5, 1, 0 }
  0x5e   : > { %p9179_p7 = pneg %p9171_p5 }
  0x60   : > { %s10527_s11 = scalar_select %p9179_p7, 1, 0 }
  0x61   : > { %p8393_p8 = pnand %p9179_p7, %p8391_p6 }
  0x63   : > { %p8394_p9 = pneg %p8393_p8 }
  0x65   : > { %p8399_p11 = pnand %p8397_p10, %p8394_p9 }
  0x67   : > { %8402 = shalt.err (!%p8399_p11)
}
  0x68   : > { %s8403_s1 = scalar_lea.vmem %s865_s2, 256  ;;  %p8411_p2 = scmp.lt.s32.totalorder %s865_s2, %s865_s2 }
  0x69   : > { %p8404_p12 = scmp.ne.s32.totalorder %s865_s2, %s8403_s1  ;;  %p8412_p4 = scmp.lt.s32.totalorder %s8403_s1, %s8403_s1 }
  0x6b   : > { %p8406_p13 = pnand %p8404_p12, %p9179_p7  ;;  %p8413_p1 = por %p8412_p4, %p8411_p2 }
  0x6d   : > { %p8407_p0 = pneg %p8406_p13 }
  0x6f   : > { %p8414_p3 = pnand %p8413_p1, %p8407_p0 }
  0x71   : > { %8417 = shalt.err (!%p8414_p3)
}
  0x72   : > { %s8927_s6 = smov 128   ;;  %s8928_s10 = smov 8  }
  0x73   : > { %7822 = dma.hbm_to_vmem [thread:$0]  (!%p9171_p5), %s10519_s9, 256, %s865_s2, [#allocation4], %s8927_s6, %s8927_s6, %s8928_s10  }
  0x74   : > { %s86_s1 = sadd.s32 1, %s8890_s23  ;;  %s410_s4 = sadd.s32 1, %s8882_s18 }
  0x75   : > { %p87_p1 = scmp.ge.s32.totalorder %s86_s1, 2  ;;  %p417_p3 = scmp.ne.s32.totalorder %s8882_s18, %s8878_s16 }
  0x76   : > { %p418_p6 = scmp.eq.s32.totalorder %s8894_s26, 0  ;;  %p423_p9 = scmp.ne.s32.totalorder %s8878_s16, %s8874_s15 }
  0x77   : > { %s10604_s1 = smov (%p87_p1, %s86_s1), 0  ;;  %p10530_p11 = scmp.eq.s32.totalorder %s9158_s0, 0 }
  0x78   : > { %10528 = sst [smem:[#allocation66_spill]] %s10604_s1  ;;  %p9198_p8 = por %p418_p6, %p417_p3 }
  0x79   : > { %s407_s24 = ssub.s32 %s8890_s23, %s10604_s1  ;;  %p9208_p12 = por %p10530_p11, %p423_p9 }
  0x7a   : > { %p408_p10 = scmp.eq.s32.totalorder %s407_s24, 0  ;;  %p7871_p13 = scmp.lt.s32.totalorder %s8894_s26, 2 }
  0x7b   : > { %s10531_s6 = scalar_select %p9208_p12, 1, 0 }
  0x7c   : > { %s9214_s2 = scalar_select %p408_p10, %s8882_s18, %s410_s4  }
  0x7d   : > { %10532 = sst [smem:[#allocation67_spill]] %s10531_s6  ;;  %s993_s10 = sand.u32 1, %s8894_s26  }
  0x7e   : > { %10533 = sst [smem:[#allocation68_spill]] %s9214_s2  ;;  %s10440_s9 = sand.u32 1, %s8882_s18  }
  0x7f   : > { %s9220_s22 = sshll.u32 %s10440_s9, 6  ;;  %s9223_s28 = sshll.u32 %s8890_s23, 10 }
  0x80   : > { %s9227_s24 = scalar_lea.hbm %s10515_s12, %s9223_s28  ;;  %s997_s4 = scalar_lea.vmem [#allocation17], %s9220_s22 }
  0x81   : > { %s1004_s15 = sshll.u32 %s997_s4, 4  ;;  %p9234_p0 = pnand %p7871_p13, %p9198_p8  ;;  %s9230_s15 = int_to_ptr.vmem [resolvable:$true] %s1004_s15 }
  0x82   : > { %s9240_s1 = scalar_lea.hbm %s10509_s27, %s9223_s28  ;;  %s1024_s2 = scalar_lea.vmem [#allocation18], %s9220_s22 }
  0x83   : > { %s10534_s9 = scalar_select %p9234_p0, 1, 0 }
  0x84   : > { %s9243_s26 = sshll.u32 %s1024_s2, 4  ;;  %s9245_s6 = scalar_lea.sflag [#allocation4], %s993_s10  ;;  %s9275_s26 = int_to_ptr.vmem [resolvable:$true] %s9243_s26 }
  0x85   : > { %s8418_s16 = scalar_lea.hbm %s9227_s24, 1024  ;;  %p9251_p4 = pneg %p9234_p0 }
  0x86   : > { %p8419_p2 = scmp.ne.s32.totalorder %s9227_s24, %s8418_s16  ;;  %s8423_s20 = scalar_lea.hbm %s10515_s12, 2048 }
  0x87   : > { %s10535_s4 = scalar_select %p9251_p4, 1, 0 }
  0x88   : > { %p8421_p1 = pnand %p9251_p4, %p8419_p2  ;;  %p8424_p6 = scmp.lt.u32.totalorder %s9227_s24, %s10515_s12 }
  0x89   : > { %p8425_p8 = scmp.lt.u32.totalorder %s8423_s20, %s8418_s16  ;;  %p8427_p10 = scmp.lt.u32.totalorder %s8418_s16, %s9227_s24 }
  0x8a   : > { %p8422_p3 = pneg %p8421_p1 }
  0x8b   : > { %p8426_p9 = por %p8425_p8, %p8424_p6 }
  0x8d   : > { %p8428_p11 = por %p8427_p10, %p8426_p9 }
  0x8f   : > { %p8429_p13 = pnand %p8428_p11, %p8422_p3 }
  0x91   : > { %8432 = shalt.err (!%p8429_p13)
}
  0x92   : > { %s8433_s2 = scalar_lea.vmem %s9230_s15, 1024  ;;  %s8929_s10 = smov [#allocation17]  }
  0x93   : > { %p8434_p12 = scmp.ne.s32.totalorder %s9230_s15, %s8433_s2  ;;  %s8438_s0 = sshll.u32 %s8929_s10, 4  ;;  %s8439_s0 = int_to_ptr.vmem [resolvable:$false] %s8438_s0 }
  0x94   : > { %s8440_s19 = scalar_lea.vmem %s8439_s0, 2048  ;;  %p8441_p2 = scmp.lt.s32.totalorder %s9230_s15, %s8439_s0 }
  0x95   : > { %p8436_p5 = pnand %p8434_p12, %p9251_p4  ;;  %p8442_p1 = scmp.lt.s32.totalorder %s8440_s19, %s8433_s2 }
  0x97   : > { %p8437_p7 = pneg %p8436_p5  ;;  %p8443_p6 = por %p8442_p1, %p8441_p2 }
  0x99   : > { %p8444_p8 = pnand %p8443_p6, %p8437_p7 }
  0x9b   : > { %8447 = shalt.err (!%p8444_p8)
}
  0x9c   : > { %s10459_s16 = smov 64   ;;  %s10462_s20 = smov 4  }
  0x9d   : > { %7847 = dma.hbm_to_vmem [thread:$0]  (!%p9234_p0), %s9227_s24, 1024, %s9230_s15, %s9245_s6, %s10459_s16, %s10459_s16, %s10462_s20  }
  0x9e   : > { %s8448_s19 = scalar_lea.hbm %s9240_s1, 1024  ;;  %s8453_s0 = scalar_lea.hbm %s10509_s27, 2048 }
  0x9f   : > { %p8449_p5 = scmp.ne.s32.totalorder %s9240_s1, %s8448_s19  ;;  %p8454_p3 = scmp.lt.u32.totalorder %s9240_s1, %s10509_s27 }
  0xa0   : > { %p8455_p9 = scmp.lt.u32.totalorder %s8453_s0, %s8448_s19  ;;  %p8457_p11 = scmp.lt.u32.totalorder %s8448_s19, %s9240_s1 }
  0xa1   : > { %p8451_p7 = pnand %p8449_p5, %p9251_p4 }
  0xa2   : > { %p8456_p10 = por %p8455_p9, %p8454_p3 }
  0xa3   : > { %p8452_p12 = pneg %p8451_p7 }
  0xa4   : > { %p8458_p13 = por %p8457_p11, %p8456_p10 }
  0xa6   : > { %p8459_p2 = pnand %p8458_p13, %p8452_p12 }
  0xa8   : > { %8462 = shalt.err (!%p8459_p2)
}
  0xa9   : > { %s8463_s24 = scalar_lea.vmem %s9275_s26, 1024  ;;  %s8932_s15 = smov [#allocation18]  }
  0xaa   : > { %p8464_p1 = scmp.ne.s32.totalorder %s9275_s26, %s8463_s24  ;;  %s8468_s2 = sshll.u32 %s8932_s15, 4  ;;  %s8469_s2 = int_to_ptr.vmem [resolvable:$false] %s8468_s2 }
  0xab   : > { %s8470_s10 = scalar_lea.vmem %s8469_s2, 2048  ;;  %p8471_p5 = scmp.lt.s32.totalorder %s9275_s26, %s8469_s2 }
  0xac   : > { %p8466_p6 = pnand %p8464_p1, %p9251_p4  ;;  %p8472_p7 = scmp.lt.s32.totalorder %s8470_s10, %s8463_s24 }
  0xae   : > { %p8467_p8 = pneg %p8466_p6  ;;  %p8473_p3 = por %p8472_p7, %p8471_p5 }
  0xb0   : > { %p8474_p9 = pnand %p8473_p3, %p8467_p8 }
  0xb2   : > { %8477 = shalt.err (!%p8474_p9)
}
  0xb3   : > { %7850 = dma.hbm_to_vmem [thread:$0]  (!%p9234_p0), %s9240_s1, 1024, %s9275_s26, %s9245_s6, %s10459_s16, %s10459_s16, %s10462_s20  }
  0xb4   : > { %s9300_s19 = scalar_lea.hbm %s9065_s30, %s9223_s28  ;;  %s1051_s0 = scalar_lea.vmem [#allocation19], %s9220_s22 }
  0xb5   : > { %s1058_s24 = sshll.u32 %s1051_s0, 4  ;;  %s8478_s15 = scalar_lea.hbm %s9300_s19, 1024  ;;  %s9303_s24 = int_to_ptr.vmem [resolvable:$true] %s1058_s24 }
  0xb6   : > { %p8479_p12 = scmp.ne.s32.totalorder %s9300_s19, %s8478_s15  ;;  %s8483_s2 = scalar_lea.hbm %s9065_s30, 2048 }
  0xb7   : > { %p8484_p13 = scmp.lt.u32.totalorder %s9300_s19, %s9065_s30  ;;  %p8485_p2 = scmp.lt.u32.totalorder %s8483_s2, %s8478_s15 }
  0xb8   : > { %p8481_p10 = pnand %p8479_p12, %p9251_p4  ;;  %p8487_p6 = scmp.lt.u32.totalorder %s8478_s15, %s9300_s19 }
  0xb9   : > { %p8486_p1 = por %p8485_p2, %p8484_p13 }
  0xba   : > { %p8482_p11 = pneg %p8481_p10 }
  0xbb   : > { %p8488_p8 = por %p8487_p6, %p8486_p1 }
  0xbd   : > { %p8489_p5 = pnand %p8488_p8, %p8482_p11 }
  0xbf   : > { %8492 = shalt.err (!%p8489_p5)
}
  0xc0   : > { %s8493_s26 = scalar_lea.vmem %s9303_s24, 1024  ;;  %s8933_s1 = smov [#allocation19]  }
  0xc1   : > { %p8494_p7 = scmp.ne.s32.totalorder %s9303_s24, %s8493_s26  ;;  %s8498_s10 = sshll.u32 %s8933_s1, 4  ;;  %s8499_s10 = int_to_ptr.vmem [resolvable:$false] %s8498_s10 }
  0xc2   : > { %s8500_s0 = scalar_lea.vmem %s8499_s10, 2048  ;;  %p8501_p12 = scmp.lt.s32.totalorder %s9303_s24, %s8499_s10 }
  0xc3   : > { %p8496_p3 = pnand %p8494_p7, %p9251_p4  ;;  %p8502_p10 = scmp.lt.s32.totalorder %s8500_s0, %s8493_s26 }
  0xc5   : > { %p8497_p9 = pneg %p8496_p3  ;;  %p8503_p13 = por %p8502_p10, %p8501_p12 }
  0xc7   : > { %p8504_p2 = pnand %p8503_p13, %p8497_p9 }
  0xc9   : > { %8507 = shalt.err (!%p8504_p2)
}
  0xca   : > { %7853 = dma.hbm_to_vmem [thread:$0]  (!%p9234_p0), %s9300_s19, 1024, %s9303_s24, %s9245_s6, %s10459_s16, %s10459_s16, %s10462_s20  }
  0xcb   : > { %s9328_s15 = scalar_lea.hbm %s10513_s14, %s9223_s28  ;;  %s1085_s2 = scalar_lea.vmem [#allocation20], %s9220_s22 }
  0xcc   : > { %s1092_s26 = sshll.u32 %s1085_s2, 4  ;;  %s8508_s1 = scalar_lea.hbm %s9328_s15, 1024  ;;  %s9331_s26 = int_to_ptr.vmem [resolvable:$true] %s1092_s26 }
  0xcd   : > { %p8509_p11 = scmp.ne.s32.totalorder %s9328_s15, %s8508_s1  ;;  %s8513_s10 = scalar_lea.hbm %s10513_s14, 2048 }
  0xce   : > { %p8514_p8 = scmp.lt.u32.totalorder %s9328_s15, %s10513_s14  ;;  %p8515_p5 = scmp.lt.u32.totalorder %s8513_s10, %s8508_s1 }
  0xcf   : > { %p8511_p1 = pnand %p8509_p11, %p9251_p4  ;;  %p8517_p3 = scmp.lt.u32.totalorder %s8508_s1, %s9328_s15 }
  0xd0   : > { %p8516_p7 = por %p8515_p5, %p8514_p8 }
  0xd1   : > { %p8512_p6 = pneg %p8511_p1 }
  0xd2   : > { %p8518_p9 = por %p8517_p3, %p8516_p7 }
  0xd4   : > { %p8519_p12 = pnand %p8518_p9, %p8512_p6 }
  0xd6   : > { %8522 = shalt.err (!%p8519_p12)
}
  0xd7   : > { %s8523_s22 = scalar_lea.vmem %s9331_s26, 1024  ;;  %s8934_s28 = smov [#allocation20]  }
  0xd8   : > { %p8524_p10 = scmp.ne.s32.totalorder %s9331_s26, %s8523_s22  ;;  %s8528_s19 = sshll.u32 %s8934_s28, 4  ;;  %s8529_s19 = int_to_ptr.vmem [resolvable:$false] %s8528_s19 }
  0xd9   : > { %s8530_s24 = scalar_lea.vmem %s8529_s19, 2048  ;;  %p8531_p11 = scmp.lt.s32.totalorder %s9331_s26, %s8529_s19 }
  0xda   : > { %p8526_p13 = pnand %p8524_p10, %p9251_p4  ;;  %p8532_p1 = scmp.lt.s32.totalorder %s8530_s24, %s8523_s22 }
  0xdc   : > { %p8527_p2 = pneg %p8526_p13  ;;  %p8533_p8 = por %p8532_p1, %p8531_p11 }
  0xde   : > { %p8534_p5 = pnand %p8533_p8, %p8527_p2 }
  0xe0   : > { %8537 = shalt.err (!%p8534_p5)
}
  0xe1   : > { %7856 = dma.hbm_to_vmem [thread:$0]  (!%p9234_p0), %s9328_s15, 1024, %s9331_s26, %s9245_s6, %s10459_s16, %s10459_s16, %s10462_s20  }
  0xe2   : > { %s8935_s0 = smov [#allocation6]   ;;  %s8538_s1 = scalar_lea.hbm %s10512_s17, 4096 }
  0xe3   : > { %s886_s2 = sshll.u32 %s8935_s0, 4  ;;  %p8539_p6 = scmp.ne.s32.totalorder %s10512_s17, %s8538_s1  ;;  %s887_s2 = int_to_ptr.vmem [resolvable:$true] %s886_s2 }
  0xe4   : > { %p10536_p7 = scmp.ne.s32.totalorder %s10527_s11, 0  ;;  %p8545_p12 = scmp.lt.u32.totalorder %s8538_s1, %s10512_s17 }
  0xe6   : > { %p8541_p3 = pnand %p8539_p6, %p10536_p7 }
  0xe8   : > { %p8542_p9 = pneg %p8541_p3 }
  0xea   : > { %p8547_p10 = pnand %p8545_p12, %p8542_p9 }
  0xec   : > { %8550 = shalt.err (!%p8547_p10)
}
  0xed   : > { %s8551_s10 = scalar_lea.vmem %s887_s2, 4096  ;;  %p8559_p1 = scmp.lt.s32.totalorder %s887_s2, %s887_s2 }
  0xee   : > { %p8552_p13 = scmp.ne.s32.totalorder %s887_s2, %s8551_s10  ;;  %p8560_p8 = scmp.lt.s32.totalorder %s8551_s10, %s8551_s10 }
  0xf0   : > { %p8554_p2 = pnand %p8552_p13, %p10536_p7  ;;  %p8561_p5 = por %p8560_p8, %p8559_p1 }
  0xf2   : > { %p8555_p11 = pneg %p8554_p2 }
  0xf4   : > { %p8562_p0 = pnand %p8561_p5, %p8555_p11 }
  0xf6   : > { %8565 = shalt.err (!%p8562_p0)
}
  0xf7   : > { %s8936_s15 = smov 256   ;;  %s8937_s26 = smov 16  }
  0xf8   : > { %p10537_p6 = scmp.ne.s32.totalorder %s10526_s7, 0  ;;  %s8938_s22 = smov [#allocation9]  }
  0xf9   : > { %s910_s28 = sshll.u32 %s8938_s22, 4  ;;  %s8939_s19 = smov [#allocation12]   ;;  %s911_s28 = int_to_ptr.vmem [resolvable:$true] %s910_s28 }
  0xfa   : > { %7825 = dma.hbm_to_vmem [thread:$0]  (!%p10537_p6), %s10512_s17, 4096, %s887_s2, [#allocation7], %s8936_s15, %s8936_s15, %s8937_s26  }
  0xfb   : > { %s935_s24 = sshll.u32 %s8939_s19, 4  ;;  %s8566_s0 = scalar_lea.hbm %s10510_s25, 4096  ;;  %s9367_s24 = int_to_ptr.vmem [resolvable:$true] %s935_s24 }
  0xfc   : > { %p8567_p0 = scmp.ne.s32.totalorder %s10510_s25, %s8566_s0  ;;  %p8573_p12 = scmp.lt.u32.totalorder %s8566_s0, %s10510_s25 }
  0xfe   : > { %p8569_p3 = pnand %p8567_p0, %p10536_p7 }
 0x100   : > { %p8570_p9 = pneg %p8569_p3 }
 0x102   : > { %p8575_p10 = pnand %p8573_p12, %p8570_p9 }
 0x104   : > { %8578 = shalt.err (!%p8575_p10)
}
 0x105   : > { %s8579_s1 = scalar_lea.vmem %s911_s28, 4096  ;;  %p8587_p1 = scmp.lt.s32.totalorder %s911_s28, %s911_s28 }
 0x106   : > { %p8580_p13 = scmp.ne.s32.totalorder %s911_s28, %s8579_s1  ;;  %p8588_p8 = scmp.lt.s32.totalorder %s8579_s1, %s8579_s1 }
 0x108   : > { %p8582_p2 = pnand %p8580_p13, %p10536_p7  ;;  %p8589_p5 = por %p8588_p8, %p8587_p1 }
 0x10a   : > { %p8583_p11 = pneg %p8582_p2 }
 0x10c   : > { %p8590_p4 = pnand %p8589_p5, %p8583_p11 }
 0x10e   : > { %8593 = shalt.err (!%p8590_p4)
}
 0x10f   : > { %7831 = dma.hbm_to_vmem [thread:$0]  (!%p10537_p6), %s10510_s25, 4096, %s911_s28, [#allocation10], %s10459_s16, %s10459_s16, %s10462_s20  }
 0x110   : > { %s8594_s2 = scalar_lea.hbm %s10518_s3, 16 }
 0x111   : > { %p8595_p0 = scmp.ne.s32.totalorder %s10518_s3, %s8594_s2  ;;  %p8601_p12 = scmp.lt.u32.totalorder %s8594_s2, %s10518_s3 }
 0x113   : > { %p8597_p3 = pnand %p8595_p0, %p10536_p7 }
 0x115   : > { %p8598_p9 = pneg %p8597_p3 }
 0x117   : > { %p8603_p10 = pnand %p8601_p12, %p8598_p9 }
 0x119   : > { %8606 = shalt.err (!%p8603_p10)
}
 0x11a   : > { %s8607_s10 = scalar_lea.vmem %s9367_s24, 16  ;;  %s8614_s22 = scalar_lea.vmem %s9367_s24, 32 }
 0x11b   : > { %p8608_p4 = scmp.ne.s32.totalorder %s9367_s24, %s8607_s10  ;;  %p8615_p11 = scmp.lt.s32.totalorder %s9367_s24, %s9367_s24 }
 0x11c   : > { %p8616_p1 = scmp.lt.s32.totalorder %s8614_s22, %s8607_s10 }
 0x11d   : > { %p8610_p13 = pnand %p8608_p4, %p10536_p7 }
 0x11e   : > { %p8617_p8 = por %p8616_p1, %p8615_p11 }
 0x11f   : > { %p8611_p2 = pneg %p8610_p13 }
 0x121   : > { %p8618_p5 = pnand %p8617_p8, %p8611_p2 }
 0x123   : > { %8621 = shalt.err (!%p8618_p5)
}
 0x124   : > { %7837 = dma.hbm_to_vmem [thread:$0]  (!%p10537_p6), %s10518_s3, 16, %s9367_s24, [#allocation13]  }
 0x125   : > { %s10538_s28 = sand.u32 1, %s8882_s18   ;;  %s10464_s0 = sshll.u32 %s8890_s23, 12 }
 0x126   : > { %s9400_s19 = sshll.u32 %s10538_s28, 8  ;;  %s9406_s1 = scalar_lea.hbm %s10514_s13, %s10464_s0 }
 0x127   : > { %s1118_s2 = scalar_lea.vmem [#allocation21], %s9400_s19  ;;  %s8940_s22 = smov [#allocation8]  }
 0x128   : > { %s1125_s10 = sshll.u32 %s1118_s2, 4  ;;  %s9411_s16 = sshll.u32 %s8940_s22, 4  ;;  %s9409_s10 = int_to_ptr.vmem [resolvable:$true] %s1125_s10  ;;  %s901_s16 = int_to_ptr.vmem [resolvable:$true] %s9411_s16 }
 0x129   : > { %s8622_s24 = scalar_lea.hbm %s9406_s1, 4096  ;;  %p10539_p3 = scmp.ne.s32.totalorder %s10535_s4, 0 }
 0x12a   : > { %p8623_p0 = scmp.ne.s32.totalorder %s9406_s1, %s8622_s24  ;;  %s8627_s28 = scalar_lea.hbm %s10514_s13, 8192 }
 0x12b   : > { %p8628_p10 = scmp.lt.u32.totalorder %s9406_s1, %s10514_s13  ;;  %p8629_p4 = scmp.lt.u32.totalorder %s8627_s28, %s8622_s24 }
 0x12c   : > { %p8625_p9 = pnand %p8623_p0, %p10539_p3  ;;  %p8631_p2 = scmp.lt.u32.totalorder %s8622_s24, %s9406_s1 }
 0x12d   : > { %p8630_p13 = por %p8629_p4, %p8628_p10 }
 0x12e   : > { %p8626_p12 = pneg %p8625_p9 }
 0x12f   : > { %p8632_p11 = por %p8631_p2, %p8630_p13 }
 0x131   : > { %p8633_p1 = pnand %p8632_p11, %p8626_p12 }
 0x133   : > { %8636 = shalt.err (!%p8633_p1)
}
 0x134   : > { %s8637_s2 = scalar_lea.vmem %s9409_s10, 4096  ;;  %s8941_s22 = smov [#allocation21]  }
 0x135   : > { %p8638_p8 = scmp.ne.s32.totalorder %s9409_s10, %s8637_s2  ;;  %s8642_s20 = sshll.u32 %s8941_s22, 4  ;;  %s8643_s20 = int_to_ptr.vmem [resolvable:$false] %s8642_s20 }
 0x136   : > { %s8644_s0 = scalar_lea.vmem %s8643_s20, 8192  ;;  %p8645_p0 = scmp.lt.s32.totalorder %s9409_s10, %s8643_s20 }
 0x137   : > { %p8640_p5 = pnand %p8638_p8, %p10539_p3  ;;  %p8646_p9 = scmp.lt.s32.totalorder %s8644_s0, %s8637_s2 }
 0x139   : > { %p8641_p6 = pneg %p8640_p5  ;;  %p8647_p10 = por %p8646_p9, %p8645_p0 }
 0x13b   : > { %p8648_p4 = pnand %p8647_p10, %p8641_p6 }
 0x13d   : > { %8651 = shalt.err (!%p8648_p4)
}
 0x13e   : > { %p10540_p12 = scmp.ne.s32.totalorder %s10534_s9, 0  ;;  %s8652_s20 = scalar_lea.hbm %s10511_s21, 64 }
 0x13f   : > { %p8653_p13 = scmp.ne.s32.totalorder %s10511_s21, %s8652_s20  ;;  %p8659_p11 = scmp.lt.u32.totalorder %s8652_s20, %s10511_s21 }
 0x140   : > { %7859 = dma.hbm_to_vmem [thread:$0]  (!%p10540_p12), %s9406_s1, 4096, %s9409_s10, %s9245_s6, %s8936_s15, %s8936_s15, %s8937_s26  }
 0x141   : > { %p8655_p6 = pnand %p8653_p13, %p10536_p7 }
 0x143   : > { %p8656_p2 = pneg %p8655_p6 }
 0x145   : > { %p8661_p1 = pnand %p8659_p11, %p8656_p2 }
 0x147   : > { %8664 = shalt.err (!%p8661_p1)
}
 0x148   : > { %s8665_s0 = scalar_lea.vmem %s901_s16, 64  ;;  %p8673_p9 = scmp.lt.s32.totalorder %s901_s16, %s901_s16 }
 0x149   : > { %p8666_p8 = scmp.ne.s32.totalorder %s901_s16, %s8665_s0  ;;  %p8674_p10 = scmp.lt.s32.totalorder %s8665_s0, %s8665_s0 }
 0x14b   : > { %p8668_p5 = pnand %p8666_p8, %p10536_p7  ;;  %p8675_p4 = por %p8674_p10, %p8673_p9 }
 0x14d   : > { %p8669_p0 = pneg %p8668_p5 }
 0x14f   : > { %p8676_p3 = pnand %p8675_p4, %p8669_p0 }
 0x151   : > { %8679 = shalt.err (!%p8676_p3)
}
 0x152   : > { %p10541_p12 = scmp.ne.s32.totalorder %s10526_s7, 0  ;;  %s8942_s1 = smov [#allocation11]  }
 0x153   : > { %s924_s10 = sshll.u32 %s8942_s1, 4  ;;  %s8943_s24 = smov [#allocation14]   ;;  %s925_s10 = int_to_ptr.vmem [resolvable:$true] %s924_s10 }
 0x154   : > { %7828 = dma.hbm_to_vmem [thread:$0]  (!%p10541_p12), %s10511_s21, 64, %s901_s16, [#allocation7]  }
 0x155   : > { %s945_s28 = sshll.u32 %s8943_s24, 4  ;;  %s8680_s2 = scalar_lea.hbm %s10508_s29, 16  ;;  %s946_s28 = int_to_ptr.vmem [resolvable:$true] %s945_s28 }
 0x156   : > { %p8681_p13 = scmp.ne.s32.totalorder %s10508_s29, %s8680_s2  ;;  %p8687_p11 = scmp.lt.u32.totalorder %s8680_s2, %s10508_s29 }
 0x158   : > { %p8683_p6 = pnand %p8681_p13, %p10536_p7 }
 0x15a   : > { %p8684_p2 = pneg %p8683_p6 }
 0x15c   : > { %p8689_p3 = pnand %p8687_p11, %p8684_p2 }
 0x15e   : > { %8692 = shalt.err (!%p8689_p3)
}
 0x15f   : > { %s8693_s22 = scalar_lea.vmem %s925_s10, 16  ;;  %s8700_s16 = scalar_lea.vmem %s925_s10, 32 }
 0x160   : > { %p8694_p1 = scmp.ne.s32.totalorder %s925_s10, %s8693_s22  ;;  %p8701_p0 = scmp.lt.s32.totalorder %s925_s10, %s925_s10 }
 0x161   : > { %p8702_p9 = scmp.lt.s32.totalorder %s8700_s16, %s8693_s22 }
 0x162   : > { %p8696_p8 = pnand %p8694_p1, %p10536_p7 }
 0x163   : > { %p8703_p10 = por %p8702_p9, %p8701_p0 }
 0x164   : > { %p8697_p5 = pneg %p8696_p8 }
 0x166   : > { %p8704_p4 = pnand %p8703_p10, %p8697_p5 }
 0x168   : > { %8707 = shalt.err (!%p8704_p4)
}
 0x169   : > { %7834 = dma.hbm_to_vmem [thread:$0]  (!%p10541_p12), %s10508_s29, 16, %s925_s10, [#allocation10]  }
 0x16a   : > { %s8708_s20 = scalar_lea.hbm %s10516_s8, 4096 }
 0x16b   : > { %p8709_p13 = scmp.ne.s32.totalorder %s10516_s8, %s8708_s20  ;;  %p8715_p11 = scmp.lt.u32.totalorder %s8708_s20, %s10516_s8 }
 0x16d   : > { %p8711_p6 = pnand %p8709_p13, %p10536_p7 }
 0x16f   : > { %p8712_p2 = pneg %p8711_p6 }
 0x171   : > { %p8717_p3 = pnand %p8715_p11, %p8712_p2 }
 0x173   : > { %8720 = shalt.err (!%p8717_p3)
}
 0x174   : > { %s8721_s0 = scalar_lea.vmem %s946_s28, 4096  ;;  %p8729_p0 = scmp.lt.s32.totalorder %s946_s28, %s946_s28 }
 0x175   : > { %p8722_p1 = scmp.ne.s32.totalorder %s946_s28, %s8721_s0  ;;  %p8730_p9 = scmp.lt.s32.totalorder %s8721_s0, %s8721_s0 }
 0x177   : > { %p8724_p8 = pnand %p8722_p1, %p10536_p7  ;;  %p8731_p10 = por %p8730_p9, %p8729_p0 }
 0x179   : > { %p8725_p5 = pneg %p8724_p8 }
 0x17b   : > { %p8732_p4 = pnand %p8731_p10, %p8725_p5 }
 0x17d   : > { %8735 = shalt.err (!%p8732_p4)
}
 0x17e   : > { %s10542_s1 = sld [smem:[#allocation41_spill]]  ;;  %s8944_s10 = smov [#allocation15]  }
 0x17f   : > { %7840 = dma.hbm_to_vmem [thread:$0]  (!%p10541_p12), %s10516_s8, 4096, %s946_s28, [#allocation13], %s8936_s15, %s8936_s15, %s8937_s26  }
 0x180   : > { %s961_s24 = sshll.u32 %s8944_s10, 4  ;;  %s10543_s2 = sshll.u32 %s8890_s23, 12  ;;  %s962_s24 = int_to_ptr.vmem [resolvable:$true] %s961_s24 }
 0x181   : > { %s9471_s22 = scalar_lea.hbm %s10517_s5, %s10543_s2 }
 0x184   : > { %s8736_s16 = scalar_lea.hbm %s10542_s1, 4096 }
 0x185   : > { %p8737_p13 = scmp.ne.s32.totalorder %s10542_s1, %s8736_s16  ;;  %p8743_p11 = scmp.lt.u32.totalorder %s8736_s16, %s10542_s1 }
 0x187   : > { %p8739_p6 = pnand %p8737_p13, %p10536_p7 }
 0x189   : > { %p8740_p2 = pneg %p8739_p6 }
 0x18b   : > { %p8745_p3 = pnand %p8743_p11, %p8740_p2 }
 0x18d   : > { %8748 = shalt.err (!%p8745_p3)
}
 0x18e   : > { %s8749_s20 = scalar_lea.vmem %s962_s24, 4096  ;;  %p8757_p0 = scmp.lt.s32.totalorder %s962_s24, %s962_s24 }
 0x18f   : > { %p8750_p1 = scmp.ne.s32.totalorder %s962_s24, %s8749_s20  ;;  %p8758_p9 = scmp.lt.s32.totalorder %s8749_s20, %s8749_s20 }
 0x191   : > { %p8752_p8 = pnand %p8750_p1, %p10536_p7  ;;  %p8759_p10 = por %p8758_p9, %p8757_p0 }
 0x193   : > { %p8753_p5 = pneg %p8752_p8 }
 0x195   : > { %p8760_p4 = pnand %p8759_p10, %p8753_p5 }
 0x197   : > { %8763 = shalt.err (!%p8760_p4)
}
 0x198   : > { %s10544_s15 = smov 4   ;;  %s10545_s26 = smov 64  }
 0x199   : > { %7843 = dma.hbm_to_vmem [thread:$0]  (!%p10541_p12), %s10542_s1, 4096, %s962_s24, [#allocation16], %s10545_s26, %s10545_s26, %s10544_s15  }
 0x19a   : > { %s1146_s11 = scalar_lea.vmem [#allocation22], %s9400_s19  ;;  %s8764_s0 = scalar_lea.hbm %s9471_s22, 4096 }
 0x19b   : > { %s1153_s28 = sshll.u32 %s1146_s11, 4  ;;  %p8765_p7 = scmp.ne.s32.totalorder %s9471_s22, %s8764_s0  ;;  %s9487_s28 = int_to_ptr.vmem [resolvable:$true] %s1153_s28 }
 0x19c   : > { %p10546_p13 = scmp.ne.s32.totalorder %s10535_s4, 0  ;;  %s8769_s7 = scalar_lea.hbm %s10517_s5, 8192 }
 0x19d   : > { %p8770_p11 = scmp.lt.u32.totalorder %s9471_s22, %s10517_s5  ;;  %p8771_p3 = scmp.lt.u32.totalorder %s8769_s7, %s8764_s0 }
 0x19e   : > { %p8767_p6 = pnand %p8765_p7, %p10546_p13  ;;  %p8773_p8 = scmp.lt.u32.totalorder %s8764_s0, %s9471_s22 }
 0x19f   : > { %p8772_p1 = por %p8771_p3, %p8770_p11 }
 0x1a0   : > { %p8768_p2 = pneg %p8767_p6 }
 0x1a1   : > { %p8774_p5 = por %p8773_p8, %p8772_p1 }
 0x1a3   : > { %p8775_p0 = pnand %p8774_p5, %p8768_p2 }
 0x1a5   : > { %8778 = shalt.err (!%p8775_p0)
}
 0x1a6   : > { %s8779_s19 = scalar_lea.vmem %s9487_s28, 4096  ;;  %s8945_s10 = smov [#allocation22]  }
 0x1a7   : > { %p8780_p12 = scmp.ne.s32.totalorder %s9487_s28, %s8779_s19  ;;  %s8784_s24 = sshll.u32 %s8945_s10, 4  ;;  %s8785_s24 = int_to_ptr.vmem [resolvable:$false] %s8784_s24 }
 0x1a8   : > { %s8786_s2 = scalar_lea.vmem %s8785_s24, 8192  ;;  %p8787_p4 = scmp.lt.s32.totalorder %s9487_s28, %s8785_s24 }
 0x1a9   : > { %p8782_p9 = pnand %p8780_p12, %p10546_p13  ;;  %p8788_p7 = scmp.lt.s32.totalorder %s8786_s2, %s8779_s19 }
 0x1ab   : > { %p8783_p10 = pneg %p8782_p9  ;;  %p8789_p6 = por %p8788_p7, %p8787_p4 }
 0x1ad   : > { %p8790_p11 = pnand %p8789_p6, %p8783_p10 }
 0x1af   : > { %8793 = shalt.err (!%p8790_p11)
}
 0x1b0   : > { %p10547_p2 = scmp.ne.s32.totalorder %s10534_s9, 0  ;;  %s10548_s4 = sld [smem:[#allocation65_spill]] }
 0x1b2   : > { %7862 = dma.hbm_to_vmem [thread:$0]  (!%p10547_p2), %s9471_s22, 4096, %s9487_s28, %s9245_s6, %s10545_s26, %s10545_s26, %s10544_s15  }
 0x1b6   : > { %p10549_p13 = scmp.ne.s32.totalorder %s10548_s4, 0 }
 0x1b7   : > { %s10550_s16 = sld [smem:[#allocation64_spill]] (!%p10549_p13) }
 0x1b8   : > { %1171 = sbr.rel (%p10549_p13) target bundleno = 4597 (0x11f5), region = 140 }
 0x1bd   : > { %p10551_p3 = scmp.eq.s32.totalorder (!%p10549_p13), %s10550_s16, 0 }
 0x1bf   : > { %8845 = dma.done.wait (%p10551_p3), [#allocation4], 256   ;;  %p10552_p1 = pmov %p10551_p3 }
 0x1c1   : > { %8847 = vsyncadd (%p10552_p1), [#allocation4], 4294967040  ;;  %p10553_p8 = pmov %p10552_p1 }
 0x1c2   : > { %p10554_p5 = pmov %p10552_p1 }
 0x1c3   : > { %8849 = dma.done.wait (%p10553_p8), [#allocation7], 4160  }
 0x1c4   : > { %8851 = vsyncadd (%p10554_p5), [#allocation7], 4294963136  ;;  %p10555_p0 = pmov %p10552_p1 }
 0x1c6   : > { %8853 = dma.done.wait (%p10555_p0), [#allocation10], 4112   ;;  %p10556_p12 = pmov %p10555_p0 }
 0x1c7   : > { %p10557_p9 = pmov %p10555_p0 }
 0x1c8   : > { %8855 = vsyncadd (%p10556_p12), [#allocation10], 4294963184 }
 0x1c9   : > { %8857 = dma.done.wait (%p10557_p9), [#allocation13], 4112   ;;  %p10558_p10 = pmov %p10555_p0 }
 0x1ca   : > { %p10559_p4 = pmov %p10555_p0 }
 0x1cb   : > { %8859 = vsyncadd (%p10558_p10), [#allocation13], 4294963184 }
 0x1cc   : > { %8861 = dma.done.wait (%p10559_p4), [#allocation16], 4096   ;;  %p10560_p7 = pmov %p10555_p0 }
 0x1cd   : > { %s10561_s9 = sld [smem:[#allocation61_spill]]  ;;  %s10562_s6 = sld [smem:[#allocation67_spill]] }
 0x1ce   : > { %8863 = vsyncadd (%p10560_p7), [#allocation16], 4294963200  ;;  %s1205_s22 = sand.u32 1, %s10550_s16  }
 0x1cf   : > { %s1206_s26 = scalar_lea.sflag [#allocation4], %s1205_s22 }
 0x1d3   : > { %s1207_s20 = sand.u32 1, %s10561_s9   ;;  %p10563_p6 = scmp.ne.s32.totalorder %s10562_s6, 0 }
 0x1d4   : > { %s7009_s15 = sshll.u32 %s1207_s20, 6 }
 0x1d5   : > { %s9534_s11 = scalar_lea.vmem [#allocation17], %s7009_s15 }
 0x1d6   : > { %8865 = dma.done.wait (%p10563_p6), %s1206_s26, 12288  }
 0x1d7   : > { %8867 = vsyncadd (%p10563_p6), %s1206_s26, 4294955008  ;;  %s10564_s28 = sld [smem:[#allocation62_spill]]  ;;  %s10565_s0 = sld [smem:[#allocation44_spill]] }
 0x1d8   : > { %s10566_s7 = sld [smem:[#allocation46_spill]]  ;;  %s10567_s19 = sld [smem:[#allocation48_spill]] }
 0x1d9   : > { %s10568_s10 = sld [smem:[#allocation49_spill]]  ;;  %s10569_s24 = sld [smem:[#allocation52_spill]] }
 0x1da   : > { %s10570_s2 = sld [smem:[#allocation50_spill]]  ;;  %s10571_s4 = sld [smem:[#allocation53_spill]] }
 0x1db   : > { %s10572_s16 = sld [smem:[#allocation55_spill]]  ;;  %s10573_s9 = sld [smem:[#allocation57_spill]] }
 0x1dc   : > { %s7013_s1 = sshll.u32 %s1207_s20, 8  ;;  %s9565_s21 = scalar_lea.vmem [#allocation18], %s7009_s15 }
 0x1dd   : > { %p1403_p11 = scmp.lt.s32.totalorder %s10564_s28, 1  ;;  %s9567_s25 = scalar_lea.vmem [#allocation19], %s7009_s15 }
 0x1de   : > { %s9569_s27 = scalar_lea.vmem [#allocation20], %s7009_s15  ;;  %s9571_s29 = scalar_lea.vmem [#allocation21], %s7013_s1 }
 0x1df   : > { %s9542_s22 = scalar_select %p1403_p11, %s10564_s28, 1 }
 0x1e0   : > { %p7017_p2 = scmp.ne.s32.totalorder %s10564_s28, 0 }
 0x1e1   : > { %s1405_s6 = scalar_lea.vmem %s10565_s0, %s9542_s22  ;;  %s1408_s26 = scalar_lea.vmem %s10566_s7, %s9542_s22  ;;  %v7997_v0 = vld [vmem:[#allocation6 + $0x4] ss:$16 sps:$4 sm:$0xff] (!%p7017_p2)   ;;  %v7999_v1 = vld [vmem:[#allocation6 + $0xc] ss:$16 sps:$4 sm:$0xff] (!%p7017_p2)   ;;  %v8946_v2 = vmov (!%p7017_p2), 0  }
 0x1e2   : > { %s1411_s3 = scalar_lea.vmem %s10567_s19, %s9542_s22  ;;  %s1414_s5 = scalar_lea.vmem %s10568_s10, %s9542_s22  ;;  %1757 = vmatprep.mubr.bf16.mxu0 (!%p7017_p2), %v8946_v2  ;;  %1800 = vmatprep.mubr.bf16.mxu1 (!%p7017_p2), %v8946_v2  ;;  %v8001_v3 = vld [vmem:[#allocation6] ss:$16 sps:$4 sm:$0xff] (!%p7017_p2)   ;;  %v8002_v4 = vld [vmem:[#allocation6 + $0x8] ss:$16 sps:$4 sm:$0xff] (!%p7017_p2)   ;;  %v8003_v5 = vld [vmem:[#allocation6 + $0x24] ss:$16 sps:$4 sm:$0xff] (!%p7017_p2)  }
 0x1e3   : > { %s7015_s8 = sshll.u32 %s9542_s22, 2  ;;  %s1421_s12 = scalar_lea.vmem %s10569_s24, %s9542_s22  ;;  %1725 = vmatprep.subr.bf16.mxu0 (!%p7017_p2), %v7997_v0  ;;  %7995 = vset.pattern.permute.xlu0 (!%p7017_p2), %v8946_v2  ;;  %v8005_v6 = vld [vmem:[#allocation6 + $0x2c] ss:$16 sps:$4 sm:$0xff] (!%p7017_p2)   ;;  %v8007_v7 = vld [vmem:[#allocation6 + $0x20] ss:$16 sps:$4 sm:$0xff] (!%p7017_p2)   ;;  %v8045_v36 = vld [vmem:[#allocation9 + $0x40] sm:$0xff] (!%p7017_p2)  }
 0x1e4   : > { %s9556_s13 = scalar_lea.vmem %s10570_s2, %s7015_s8  ;;  %s1424_s20 = scalar_lea.vmem %s10571_s4, %s9542_s22  ;;  %1768 = vmatprep.subr.bf16.mxu1 (!%p7017_p2), %v7999_v1  ;;  %7996 = vset.pattern.permute.xlu1 (!%p7017_p2), %v8946_v2  ;;  %v8008_v8 = vld [vmem:[#allocation6 + $0x28] ss:$16 sps:$4 sm:$0xff] (!%p7017_p2)   ;;  %v8009_v9 = vld [vmem:[#allocation6 + $0x44] ss:$16 sps:$4 sm:$0xff] (!%p7017_p2)   ;;  %v8011_v10 = vld [vmem:[#allocation6 + $0x4c] ss:$16 sps:$4 sm:$0xff] (!%p7017_p2)  }
 0x1e5   : > { %s9561_s14 = scalar_lea.vmem %s10572_s16, %s7015_s8  ;;  %s1431_s17 = scalar_lea.vmem %s10573_s9, %s9542_s22  ;;  %1726 = vmatpush1.bf16.msra.mxu0 (!%p7017_p2), %v8001_v3  ;;  %1769 = vmatpush1.bf16.msra.mxu1 (!%p7017_p2), %v8002_v4  ;;  %v8013_v11 = vld [vmem:[#allocation6 + $0x40] ss:$16 sps:$4 sm:$0xff] (!%p7017_p2)   ;;  %v8014_v12 = vld [vmem:[#allocation6 + $0x48] ss:$16 sps:$4 sm:$0xff] (!%p7017_p2)   ;;  %v8015_v13 = vld [vmem:[#allocation6 + $0x64] ss:$16 sps:$4 sm:$0xff] (!%p7017_p2)  }
 0x1e6   : > { %s9573_s0 = scalar_lea.vmem [#allocation22], %s7013_s1  ;;  %1437 = sbr.rel (%p7017_p2) target bundleno = 1431 (0x597), region = 200  ;;  %1727 = vmatprep.subr.bf16.mxu0 (!%p7017_p2), %v8003_v5  ;;  %1770 = vmatprep.subr.bf16.mxu1 (!%p7017_p2), %v8005_v6  ;;  %v8017_v14 = vld [vmem:[#allocation6 + $0x6c] ss:$16 sps:$4 sm:$0xff] (!%p7017_p2)   ;;  %v8019_v15 = vld [vmem:[#allocation6 + $0x60] ss:$16 sps:$4 sm:$0xff] (!%p7017_p2)  }
 0x1e7   : > { %v8020_v16 = vld [vmem:[#allocation6 + $0x68] ss:$16 sps:$4 sm:$0xff] (!%p7017_p2)   ;;  %v8021_v17 = vld [vmem:[#allocation6 + $0x84] ss:$16 sps:$4 sm:$0xff] (!%p7017_p2)   ;;  %v8023_v18 = vld [vmem:[#allocation6 + $0x8c] ss:$16 sps:$4 sm:$0xff] (!%p7017_p2)  }
 0x1e8   : > { %v8025_v19 = vld [vmem:[#allocation6 + $0x80] ss:$16 sps:$4 sm:$0xff] (!%p7017_p2)   ;;  %v8026_v20 = vld [vmem:[#allocation6 + $0x88] ss:$16 sps:$4 sm:$0xff] (!%p7017_p2)   ;;  %v8027_v21 = vld [vmem:[#allocation6 + $0xa4] ss:$16 sps:$4 sm:$0xff] (!%p7017_p2)  }
 0x1e9   : > { %1728 = vmatpush1.bf16.msra.mxu0 (!%p7017_p2), %v8007_v7  ;;  %1771 = vmatpush1.bf16.msra.mxu1 (!%p7017_p2), %v8008_v8  ;;  %v8029_v22 = vld [vmem:[#allocation6 + $0xac] ss:$16 sps:$4 sm:$0xff] (!%p7017_p2)   ;;  %v8031_v23 = vld [vmem:[#allocation6 + $0xa0] ss:$16 sps:$4 sm:$0xff] (!%p7017_p2)   ;;  %s10574_s8 = sld [smem:[#allocation31_spill]] (!%p7017_p2)  ;;  %v8046_v37 = vld [vmem:[#allocation9 + $0xc0] sm:$0xff] (!%p7017_p2)   ;;  %v1545_v7 = vlaneseq (!%p7017_p2) }
 0x1ea   : > { %1729 = vmatprep.subr.bf16.mxu0 (!%p7017_p2), %v8009_v9  ;;  %1772 = vmatprep.subr.bf16.mxu1 (!%p7017_p2), %v8011_v10  ;;  %v8032_v24 = vld [vmem:[#allocation6 + $0xa8] ss:$16 sps:$4 sm:$0xff] (!%p7017_p2)   ;;  %v8033_v25 = vld [vmem:[#allocation6 + $0xc4] ss:$16 sps:$4 sm:$0xff] (!%p7017_p2)   ;;  %v8035_v26 = vld [vmem:[#allocation6 + $0xcc] ss:$16 sps:$4 sm:$0xff] (!%p7017_p2)  }
 0x1eb   : > { %v8037_v27 = vld [vmem:[#allocation6 + $0xc0] ss:$16 sps:$4 sm:$0xff] (!%p7017_p2)   ;;  %v8038_v28 = vld [vmem:[#allocation6 + $0xc8] ss:$16 sps:$4 sm:$0xff] (!%p7017_p2)   ;;  %v8039_v29 = vld [vmem:[#allocation6 + $0xe4] ss:$16 sps:$4 sm:$0xff] (!%p7017_p2)  }
 0x1ec   : > { %v8041_v30 = vld [vmem:[#allocation6 + $0xec] ss:$16 sps:$4 sm:$0xff] (!%p7017_p2)   ;;  %v8043_v31 = vld [vmem:[#allocation6 + $0xe0] ss:$16 sps:$4 sm:$0xff] (!%p7017_p2)   ;;  %v8044_v32 = vld [vmem:[#allocation6 + $0xe8] ss:$16 sps:$4 sm:$0xff] (!%p7017_p2)  }
 0x1ed   : > { %1730 = vmatpush1.bf16.msra.mxu0 %v8013_v11  ;;  %1773 = vmatpush1.bf16.msra.mxu1 %v8014_v12  ;;  %v8047_v38 = vld [vmem:[#allocation9] sm:$0xff]   ;;  %v8049_v40 = vld [vmem:[#allocation9 + $0x48] sm:$0xff]   ;;  %v8053_v44 = vld [vmem:[#allocation9 + $0x50] sm:$0xff]   ;;  %v9582_v8 = vshrl.u32 %v1545_v7, 7  ;;  %s10575_s1 = sld [smem:[#allocation40_spill]]  ;;  %s10576_s15 = sld [smem:[#allocation33_spill]] }
 0x1ee   : > { %1731 = vmatprep.subr.bf16.mxu0 %v8015_v13  ;;  %1774 = vmatprep.subr.bf16.mxu1 %v8017_v14  ;;  %v8048_v39 = vld [vmem:[#allocation9 + $0x80] sm:$0xff]   ;;  %v8050_v41 = vld [vmem:[#allocation9 + $0xc8] sm:$0xff]   ;;  %v8054_v45 = vld [vmem:[#allocation9 + $0xd0] sm:$0xff]   ;;  %s10578_s7 = sld [smem:[#allocation42_spill]]  ;;  %s10579_s19 = sld [smem:[#allocation43_spill]] }
 0x1ef   : > { %v1438_v33 = vld [vmem:[%s10574_s8] sm:$0xff]  ;;  %v1439_v34 = vld [vmem:[%s10574_s8 + $0x8] sm:$0xff]  ;;  %v8055_v46 = vld [vmem:[#allocation9 + $0x10] sm:$0xff]   ;;  %v1547_v9 = vsub.s32 0, %v9582_v8  ;;  %v1555_v10 = vsub.s32 2, %v9582_v8  ;;  %v1551_v12 = vsub.s32 1, %v9582_v8 }
 0x1f0   : > { %v1543_v35 = vpack.c.bf16 %v1439_v34, %v1438_v33  ;;  %v8051_v42 = vld [vmem:[#allocation9 + $0x8] sm:$0xff]   ;;  %v8056_v47 = vld [vmem:[#allocation9 + $0x90] sm:$0xff]   ;;  %v8057_v48 = vld [vmem:[#allocation9 + $0x58] sm:$0xff]   ;;  %v1559_v13 = vsub.s32 3, %v9582_v8 }
 0x1f1   : > { %1732 = vmatpush1.bf16.msra.mxu0 %v8019_v15  ;;  %1775 = vmatpush1.bf16.msra.mxu1 %v8020_v16  ;;  %v8052_v43 = vld [vmem:[#allocation9 + $0x88] sm:$0xff]   ;;  %v8058_v49 = vld [vmem:[#allocation9 + $0xd8] sm:$0xff]   ;;  %v8061_v52 = vld [vmem:[#allocation9 + $0x60] sm:$0xff]  }
 0x1f2   : > { %1733 = vmatprep.subr.bf16.mxu0 %v8021_v17  ;;  %1776 = vmatprep.subr.bf16.mxu1 %v8023_v18  ;;  %v8059_v50 = vld [vmem:[#allocation9 + $0x18] sm:$0xff]   ;;  %v8062_v53 = vld [vmem:[#allocation9 + $0xe0] sm:$0xff]   ;;  %v8065_v56 = vld [vmem:[#allocation9 + $0x68] sm:$0xff]  }
 0x1f3   : > { %v8060_v51 = vld [vmem:[#allocation9 + $0x98] sm:$0xff]   ;;  %v8063_v54 = vld [vmem:[#allocation9 + $0x20] sm:$0xff]   ;;  %v8066_v57 = vld [vmem:[#allocation9 + $0xe8] sm:$0xff]   ;;  %s10577_s28 = smov %s10576_s15 }
 0x1f4   : > { %v8064_v55 = vld [vmem:[#allocation9 + $0xa0] sm:$0xff]   ;;  %v8067_v58 = vld [vmem:[#allocation9 + $0x28] sm:$0xff]   ;;  %v8069_v60 = vld [vmem:[#allocation9 + $0x70] sm:$0xff]  }
 0x1f5   : > { %1734 = vmatpush1.bf16.msra.mxu0 %v8025_v19  ;;  %1777 = vmatpush1.bf16.msra.mxu1 %v8026_v20  ;;  %v8068_v59 = vld [vmem:[#allocation9 + $0xa8] sm:$0xff]   ;;  %v8070_v61 = vld [vmem:[#allocation9 + $0xf0] sm:$0xff]   ;;  %v8073_v0 = vld [vmem:[#allocation9 + $0x78] sm:$0xff]  }
 0x1f6   : > { %1735 = vmatprep.subr.bf16.mxu0 %v8027_v21  ;;  %1778 = vmatprep.subr.bf16.mxu1 %v8029_v22  ;;  %v8071_v62 = vld [vmem:[#allocation9 + $0x30] sm:$0xff]   ;;  %v8074_v1 = vld [vmem:[#allocation9 + $0xf8] sm:$0xff]  }
 0x1f7   : > { %v8072_v63 = vld [vmem:[#allocation9 + $0xb0] sm:$0xff]   ;;  %v8075_v3 = vld [vmem:[#allocation9 + $0x38] sm:$0xff]  }
 0x1f8   : > { %v8076_v4 = vld [vmem:[#allocation9 + $0xb8] sm:$0xff]   ;;  %v8082_v6 = vld [vmem:[#allocation14 + $0xc] ss:$16 sps:$4 sm:$0xff]  }
 0x1f9   : > { %1736 = vmatpush1.bf16.msra.mxu0 %v8031_v23  ;;  %1779 = vmatpush1.bf16.msra.mxu1 %v8032_v24  ;;  %v8079_v5 = vld [vmem:[#allocation14 + $0x4] ss:$16 sps:$4 sm:$0xff]   ;;  %v1476_v11 = vld [vmem:[#allocation8] sm:$0xf] }
 0x1fa   : > { %1737 = vmatprep.subr.bf16.mxu0 %v8033_v25  ;;  %1780 = vmatprep.subr.bf16.mxu1 %v8035_v26  ;;  %v1548_v14 = vrot.slane %v1476_v11, %v1547_v9  ;;  %v1556_v15 = vrot.slane %v1476_v11, %v1555_v10  ;;  %v1552_v16 = vrot.slane %v1476_v11, %v1551_v12 }
 0x1fb   : > { %v1560_v17 = vrot.slane %v1476_v11, %v1559_v13 }
 0x1fd   : > { %1738 = vmatpush1.bf16.msra.mxu0 %v8037_v27  ;;  %1781 = vmatpush1.bf16.msra.mxu1 %v8038_v28 }
 0x1fe   : > { %1739 = vmatprep.subr.bf16.mxu0 %v8039_v29  ;;  %1782 = vmatprep.subr.bf16.mxu1 %v8041_v30 }
 0x201   : > { %1740 = vmatpush1.bf16.msra.mxu0 %v8043_v31  ;;  %1783 = vmatpush1.bf16.msra.mxu1 %v8044_v32 }
 0x202   : > { %7322 = vmatprep.subr.bf16.mxu0 %v8045_v36  ;;  %7344 = vmatprep.subr.bf16.mxu1 %v8046_v37 }
 0x204   : > { %1758 = vmatmul.mubr.bf16.vlgmr.msra.gmra.mrb[0].mxu0 %v1543_v35  ;;  %1801 = vmatmul.mubr.bf16.vlgmr.msra.gmra.mrb[0].mxu1 %v1543_v35 }
 0x205   : > { %7323 = vmatpush3.bf16.msra.mxu0 %v8047_v38  ;;  %7345 = vmatpush3.bf16.msra.mxu1 %v8048_v39 }
 0x206   : > { %7324 = vmatprep.subr.bf16.mxu0 %v8049_v40  ;;  %7346 = vmatprep.subr.bf16.mxu1 %v8050_v41 }
 0x209   : > { %7325 = vmatpush3.bf16.msra.mxu0 %v8051_v42  ;;  %7347 = vmatpush3.bf16.msra.mxu1 %v8052_v43 }
 0x20a   : > { %7326 = vmatprep.subr.bf16.mxu0 %v8053_v44  ;;  %7348 = vmatprep.subr.bf16.mxu1 %v8054_v45 }
 0x20d   : > { %7327 = vmatpush3.bf16.msra.mxu0 %v8055_v46  ;;  %7349 = vmatpush3.bf16.msra.mxu1 %v8056_v47 }
 0x20e   : > { %7328 = vmatprep.subr.bf16.mxu0 %v8057_v48  ;;  %7350 = vmatprep.subr.bf16.mxu1 %v8058_v49 }
 0x211   : > { %7329 = vmatpush3.bf16.msra.mxu0 %v8059_v50  ;;  %7351 = vmatpush3.bf16.msra.mxu1 %v8060_v51 }
 0x212   : > { %7330 = vmatprep.subr.bf16.mxu0 %v8061_v52  ;;  %7352 = vmatprep.subr.bf16.mxu1 %v8062_v53 }
 0x215   : > { %7331 = vmatpush3.bf16.msra.mxu0 %v8063_v54  ;;  %7353 = vmatpush3.bf16.msra.mxu1 %v8064_v55 }
 0x216   : > { %7332 = vmatprep.subr.bf16.mxu0 %v8065_v56  ;;  %7354 = vmatprep.subr.bf16.mxu1 %v8066_v57 }
 0x219   : > { %7333 = vmatpush3.bf16.msra.mxu0 %v8067_v58  ;;  %7355 = vmatpush3.bf16.msra.mxu1 %v8068_v59 }
 0x21a   : > { %7334 = vmatprep.subr.bf16.mxu0 %v8069_v60  ;;  %7356 = vmatprep.subr.bf16.mxu1 %v8070_v61 }
 0x21d   : > { %7335 = vmatpush3.bf16.msra.mxu0 %v8071_v62  ;;  %7357 = vmatpush3.bf16.msra.mxu1 %v8072_v63 }
 0x21e   : > { %7336 = vmatprep.subr.bf16.mxu0 %v8073_v0  ;;  %7358 = vmatprep.subr.bf16.mxu1 %v8074_v1 }
 0x221   : > { %7337 = vmatpush3.bf16.msra.mxu0 %v8075_v3  ;;  %7359 = vmatpush3.bf16.msra.mxu1 %v8076_v4 }
 0x222   : > { %2471 = vmatprep.subr.bf16.mxu0 %v8079_v5  ;;  %2514 = vmatprep.subr.bf16.mxu1 %v8082_v6 }
 0x2d7   : > { %v1759_v18 = vpop.f32.mrb[0].mxu0  ;;  %v1802_v19 = vpop.f32.mrb[0].mxu1 }
 0x2d8   : > { %v9596_v20 = vadd.f32 %v1759_v18, %v1548_v14  ;;  %v9598_v21 = vadd.f32 %v1802_v19, %v1556_v15  ;;  %v1761_v22 = vpop.f32.mrb[1].mxu0  ;;  %v1804_v23 = vpop.f32.mrb[1].mxu1 }
 0x2d9   : > { %v9600_v24 = vadd.f32 %v1761_v22, %v1552_v16  ;;  %v9602_v25 = vadd.f32 %v1804_v23, %v1560_v17  ;;  %v1763_v26 = vpop.f32.mrb[2].mxu0  ;;  %v1806_v27 = vpop.f32.mrb[2].mxu1 }
 0x2da   : > { %v1819_v28 = vmul.f32 0.044715, %v9596_v20  ;;  %v1821_v29 = vmul.f32 0.044715, %v9598_v21  ;;  %v1764_v30 = vadd.f32 %v1763_v26, %v1548_v14  ;;  %v1807_v31 = vadd.f32 %v1806_v27, %v1556_v15  ;;  %v1765_v32 = vpop.f32.mrb[3].mxu0  ;;  %v1808_v33 = vpop.f32.mrb[3].mxu1 }
 0x2db   : > { %v1820_v34 = vmul.f32 0.044715, %v9600_v24  ;;  %v1822_v35 = vmul.f32 0.044715, %v9602_v25  ;;  %v9608_v36 = vadd.f32 %v1765_v32, %v1552_v16  ;;  %v9610_v37 = vadd.f32 %v1808_v33, %v1560_v17 }
 0x2dc   : > { %v1827_v38 = vmul.f32 %v1819_v28, %v9596_v20  ;;  %v1829_v39 = vmul.f32 %v1821_v29, %v9598_v21  ;;  %v1823_v40 = vmul.f32 0.044715, %v1764_v30  ;;  %v1825_v41 = vmul.f32 0.044715, %v1807_v31 }
 0x2dd   : > { %v1828_v42 = vmul.f32 %v1820_v34, %v9600_v24  ;;  %v1830_v43 = vmul.f32 %v1822_v35, %v9602_v25  ;;  %v1824_v44 = vmul.f32 0.044715, %v9608_v36  ;;  %v1826_v45 = vmul.f32 0.044715, %v9610_v37 }
 0x2de   : > { %v1835_v46 = vmul.f32 %v1827_v38, %v9596_v20  ;;  %v1837_v47 = vmul.f32 %v1829_v39, %v9598_v21  ;;  %v1831_v48 = vmul.f32 %v1823_v40, %v1764_v30  ;;  %v1833_v49 = vmul.f32 %v1825_v41, %v1807_v31 }
 0x2df   : > { %v1836_v50 = vmul.f32 %v1828_v42, %v9600_v24  ;;  %v1838_v51 = vmul.f32 %v1830_v43, %v9602_v25  ;;  %v1832_v52 = vmul.f32 %v1824_v44, %v9608_v36  ;;  %v1834_v53 = vmul.f32 %v1826_v45, %v9610_v37 }
 0x2e0   : > { %v1843_v54 = vadd.f32 %v1835_v46, %v9596_v20  ;;  %v1845_v55 = vadd.f32 %v1837_v47, %v9598_v21  ;;  %v1839_v56 = vmul.f32 %v1831_v48, %v1764_v30  ;;  %v1841_v57 = vmul.f32 %v1833_v49, %v1807_v31 }
 0x2e1   : > { %v1840_v58 = vmul.f32 %v1832_v52, %v9608_v36  ;;  %v1842_v59 = vmul.f32 %v1834_v53, %v9610_v37  ;;  %v1844_v0 = vadd.f32 %v1836_v50, %v9600_v24  ;;  %v1846_v5 = vadd.f32 %v1838_v51, %v9602_v25 }
 0x2e2   : > { %v1851_v60 = vmul.f32 0.7978846, %v1843_v54  ;;  %v1853_v61 = vmul.f32 0.7978846, %v1845_v55  ;;  %v1847_v62 = vadd.f32 %v1839_v56, %v1764_v30  ;;  %v1849_v63 = vadd.f32 %v1841_v57, %v1807_v31  ;;  %v8077_v54 = vld [vmem:[#allocation14] ss:$16 sps:$4 sm:$0xff]  }
 0x2e3   : > { %v1848_v1 = vadd.f32 %v1840_v58, %v9608_v36  ;;  %v1852_v6 = vmul.f32 0.7978846, %v1844_v0  ;;  %v1850_v11 = vadd.f32 %v1842_v59, %v9610_v37  ;;  %v1854_v14 = vmul.f32 0.7978846, %v1846_v5  ;;  %v8085_v55 = vld [vmem:[#allocation14 + $0x24] ss:$16 sps:$4 sm:$0xff]  }
 0x2e4   : > { %8157 = vtanh.f32 %v1851_v60  ;;  %v1855_v3 = vmul.f32 0.7978846, %v1847_v62  ;;  %v1857_v4 = vmul.f32 0.7978846, %v1849_v63  ;;  %v1811_v26 = vmul.f32 0.5, %v9596_v20 }
 0x2e5   : > { %8159 = vtanh.f32 %v1853_v61  ;;  %v1856_v7 = vmul.f32 0.7978846, %v1848_v1  ;;  %v1858_v15 = vmul.f32 0.7978846, %v1850_v11  ;;  %v1815_v27 = vmul.f32 0.5, %v1764_v30 }
 0x2e6   : > { %8161 = vtanh.f32 %v1855_v3  ;;  %v1813_v32 = vmul.f32 0.5, %v9598_v21  ;;  %v1817_v33 = vmul.f32 0.5, %v1807_v31  ;;  %v1812_v38 = vmul.f32 0.5, %v9600_v24  ;;  %v8080_v56 = vld [vmem:[#allocation14 + $0x8] ss:$16 sps:$4 sm:$0xff]  }
 0x2e7   : > { %8163 = vtanh.f32 %v1857_v4  ;;  %v1816_v43 = vmul.f32 0.5, %v9608_v36  ;;  %v1814_v30 = vmul.f32 0.5, %v9602_v25  ;;  %v1818_v47 = vmul.f32 0.5, %v9610_v37  ;;  %v8088_v57 = vld [vmem:[#allocation14 + $0x2c] ss:$16 sps:$4 sm:$0xff]  }
 0x2e8   : > { %8165 = vtanh.f32 %v1852_v6  ;;  %v8083_v25 = vld [vmem:[#allocation14 + $0x20] ss:$16 sps:$4 sm:$0xff]   ;;  %v8091_v37 = vld [vmem:[#allocation14 + $0x44] ss:$16 sps:$4 sm:$0xff]   ;;  %v8086_v58 = vld [vmem:[#allocation14 + $0x28] ss:$16 sps:$4 sm:$0xff]  }
 0x2e9   : > { %8167 = vtanh.f32 %v1856_v7  ;;  %v8094_v59 = vld [vmem:[#allocation14 + $0x4c] ss:$16 sps:$4 sm:$0xff]   ;;  %v8089_v60 = vld [vmem:[#allocation14 + $0x40] ss:$16 sps:$4 sm:$0xff]   ;;  %v8097_v61 = vld [vmem:[#allocation14 + $0x64] ss:$16 sps:$4 sm:$0xff]  }
 0x2ea   : > { %8169 = vtanh.f32 %v1854_v14  ;;  %v8092_v62 = vld [vmem:[#allocation14 + $0x48] ss:$16 sps:$4 sm:$0xff]   ;;  %v8100_v63 = vld [vmem:[#allocation14 + $0x6c] ss:$16 sps:$4 sm:$0xff]   ;;  %v8095_v0 = vld [vmem:[#allocation14 + $0x60] ss:$16 sps:$4 sm:$0xff]  }
 0x2eb   : > { %8171 = vtanh.f32 %v1858_v15  ;;  %v8103_v1 = vld [vmem:[#allocation14 + $0x84] ss:$16 sps:$4 sm:$0xff]   ;;  %v8098_v3 = vld [vmem:[#allocation14 + $0x68] ss:$16 sps:$4 sm:$0xff]   ;;  %v8106_v4 = vld [vmem:[#allocation14 + $0x8c] ss:$16 sps:$4 sm:$0xff]  }
 0x2ec   : > { %v8101_v5 = vld [vmem:[#allocation14 + $0x80] ss:$16 sps:$4 sm:$0xff]   ;;  %v8109_v6 = vld [vmem:[#allocation14 + $0xa4] ss:$16 sps:$4 sm:$0xff]   ;;  %v8104_v7 = vld [vmem:[#allocation14 + $0x88] ss:$16 sps:$4 sm:$0xff]  }
 0x2ed   : > { %v8112_v11 = vld [vmem:[#allocation14 + $0xac] ss:$16 sps:$4 sm:$0xff]   ;;  %v8107_v14 = vld [vmem:[#allocation14 + $0xa0] ss:$16 sps:$4 sm:$0xff]   ;;  %v8115_v15 = vld [vmem:[#allocation14 + $0xc4] ss:$16 sps:$4 sm:$0xff]  }
 0x2ee   : > { %v8158_v16 = vpop.eup %8157 }
 0x2ef   : > { %v8160_v17 = vpop.eup %8159  ;;  %v1867_v18 = vadd.f32 1.0, %v8158_v16  ;;  %v8110_v16 = vld [vmem:[#allocation14 + $0xa8] ss:$16 sps:$4 sm:$0xff]  }
 0x2f0   : > { %v8162_v19 = vpop.eup %8161  ;;  %v1869_v22 = vadd.f32 1.0, %v8160_v17  ;;  %v8118_v17 = vld [vmem:[#allocation14 + $0xcc] ss:$16 sps:$4 sm:$0xff]  }
 0x2f1   : > { %v8164_v23 = vpop.eup %8163  ;;  %v1871_v28 = vadd.f32 1.0, %v8162_v19  ;;  %v1875_v40 = vmul.f32 %v1867_v18, %v1811_v26  ;;  %v8113_v18 = vld [vmem:[#allocation14 + $0xc0] ss:$16 sps:$4 sm:$0xff]   ;;  %v8121_v19 = vld [vmem:[#allocation14 + $0xe4] ss:$16 sps:$4 sm:$0xff]  }
 0x2f2   : > { %v8166_v29 = vpop.eup %8165  ;;  %v1873_v34 = vadd.f32 1.0, %v8164_v23  ;;  %v1877_v45 = vmul.f32 %v1869_v22, %v1813_v32  ;;  %v8116_v22 = vld [vmem:[#allocation14 + $0xc8] ss:$16 sps:$4 sm:$0xff]   ;;  %v8124_v23 = vld [vmem:[#allocation14 + $0xec] ss:$16 sps:$4 sm:$0xff]  }
 0x2f3   : > { %v8168_v35 = vpop.eup %8167  ;;  %v1868_v39 = vadd.f32 1.0, %v8166_v29  ;;  %v1879_v41 = vmul.f32 %v1871_v28, %v1815_v27  ;;  %v8119_v26 = vld [vmem:[#allocation14 + $0xe0] ss:$16 sps:$4 sm:$0xff]   ;;  %v1440_v27 = vld [vmem:[#allocation3] sm:$0xff] }
 0x2f4   : > { %v8170_v42 = vpop.eup %8169  ;;  %v1872_v44 = vadd.f32 1.0, %v8168_v35  ;;  %v1881_v46 = vmul.f32 %v1873_v34, %v1817_v33  ;;  %v1441_v28 = vld [vmem:[#allocation3 + $0x8] sm:$0xff]  ;;  %v8122_v29 = vld [vmem:[#allocation14 + $0xe8] ss:$16 sps:$4 sm:$0xff]   ;;  %v8125_v33 = vld [vmem:[#allocation15 + $0x40] sm:$0xff]  }
 0x2f5   : > { %v8172_v20 = vpop.eup %8171  ;;  %v1870_v21 = vadd.f32 1.0, %v8170_v42  ;;  %v1883_v31 = vpack.c.bf16 %v1879_v41, %v1875_v40  ;;  %v1876_v48 = vmul.f32 %v1868_v39, %v1812_v38  ;;  %v2289_v32 = vpack.c.bf16 %v1441_v28, %v1440_v27  ;;  %v8126_v34 = vld [vmem:[#allocation15 + $0xc0] sm:$0xff]   ;;  %v8129_v39 = vld [vmem:[#allocation15 + $0x48] sm:$0xff]  }
 0x2f6   : > { %v1880_v49 = vmul.f32 %v1872_v44, %v1816_v43  ;;  %v1874_v50 = vadd.f32 1.0, %v8172_v20  ;;  %v1885_v24 = vpack.c.bf16 %v1881_v46, %v1877_v45  ;;  %v8127_v35 = vld [vmem:[#allocation15] sm:$0xff]   ;;  %v8130_v40 = vld [vmem:[#allocation15 + $0xc8] sm:$0xff]   ;;  %v8133_v43 = vld [vmem:[#allocation15 + $0x50] sm:$0xff]  }
 0x2f7   : > { %v1878_v52 = vmul.f32 %v1870_v21, %v1814_v30  ;;  %v8128_v38 = vld [vmem:[#allocation15 + $0x80] sm:$0xff]   ;;  %v8131_v41 = vld [vmem:[#allocation15 + $0x8] sm:$0xff]   ;;  %v8134_v44 = vld [vmem:[#allocation15 + $0xd0] sm:$0xff]  }
 0x2f8   : > { %v1884_v51 = vpack.c.bf16 %v1880_v49, %v1876_v48  ;;  %v1882_v53 = vmul.f32 %v1874_v50, %v1818_v47  ;;  %v8132_v42 = vld [vmem:[#allocation15 + $0x88] sm:$0xff]   ;;  %v8135_v45 = vld [vmem:[#allocation15 + $0x10] sm:$0xff]   ;;  %v8137_v20 = vld [vmem:[#allocation15 + $0x58] sm:$0xff]  }
 0x2f9   : > { %v8136_v46 = vld [vmem:[#allocation15 + $0x90] sm:$0xff]   ;;  %v8138_v30 = vld [vmem:[#allocation15 + $0xd8] sm:$0xff]   ;;  %v8142_v48 = vld [vmem:[#allocation15 + $0xe0] sm:$0xff]  }
 0x2fa   : > { %2117 = vmatprep.mubr.bf16.mxu0 %v1884_v51  ;;  %v1886_v36 = vpack.c.bf16 %v1882_v53, %v1878_v52  ;;  %v8139_v47 = vld [vmem:[#allocation15 + $0x18] sm:$0xff]   ;;  %v8143_v49 = vld [vmem:[#allocation15 + $0x20] sm:$0xff]   ;;  %v8146_v51 = vld [vmem:[#allocation15 + $0xe8] sm:$0xff]  }
 0x2fb   : > { %2118 = vmatmul.mubr.bf16.vlgmr.msra.gmra.mrb[4].mxu0 %v1883_v31  ;;  %v8140_v21 = vld [vmem:[#allocation15 + $0x98] sm:$0xff]   ;;  %v8141_v31 = vld [vmem:[#allocation15 + $0x60] sm:$0xff]   ;;  %v8147_v52 = vld [vmem:[#allocation15 + $0x28] sm:$0xff]  }
 0x2fc   : > { %2158 = vmatprep.mubr.bf16.mxu1 %v1886_v36  ;;  %2472 = vmatpush1.bf16.msra.mxu0 %v8077_v54  ;;  %v8144_v50 = vld [vmem:[#allocation15 + $0xa0] sm:$0xff]   ;;  %v8148_v53 = vld [vmem:[#allocation15 + $0xa8] sm:$0xff]   ;;  %v8149_v54 = vld [vmem:[#allocation15 + $0x70] sm:$0xff]  }
 0x2fd   : > { %2159 = vmatmul.mubr.bf16.vlgmr.msra.gmra.mrb[4].mxu1 %v1885_v24  ;;  %2473 = vmatprep.subr.bf16.mxu0 %v8085_v55  ;;  %v8145_v24 = vld [vmem:[#allocation15 + $0x68] sm:$0xff]   ;;  %v8150_v55 = vld [vmem:[#allocation15 + $0xf0] sm:$0xff]  }
 0x2fe   : > { %2515 = vmatpush1.bf16.msra.mxu1 %v8080_v56  ;;  %2503 = vmatprep.mubr.bf16.mxu0 %v8946_v2  ;;  %v8151_v36 = vld [vmem:[#allocation15 + $0x30] sm:$0xff]  }
 0x2ff   : > { %2516 = vmatprep.subr.bf16.mxu1 %v8088_v57  ;;  %2546 = vmatprep.mubr.bf16.mxu1 %v8946_v2  ;;  %v8152_v56 = vld [vmem:[#allocation15 + $0xb0] sm:$0xff]   ;;  %v8153_v57 = vld [vmem:[#allocation15 + $0x78] sm:$0xff]  }
 0x300   : > { %2474 = vmatpush1.bf16.msra.mxu0 %v8083_v25  ;;  %v8154_v25 = vld [vmem:[#allocation15 + $0xf8] sm:$0xff]  }
 0x301   : > { %2475 = vmatprep.subr.bf16.mxu0 %v8091_v37  ;;  %v8155_v37 = vld [vmem:[#allocation15 + $0x38] sm:$0xff]  }
 0x302   : > { %2517 = vmatpush1.bf16.msra.mxu1 %v8086_v58  ;;  %v8156_v58 = vld [vmem:[#allocation15 + $0xb8] sm:$0xff]  }
 0x303   : > { %2518 = vmatprep.subr.bf16.mxu1 %v8094_v59 }
 0x304   : > { %2476 = vmatpush1.bf16.msra.mxu0 %v8089_v60  ;;  %v7050_v60 = vld [vmem:[#allocation11] ss:$0 sm:$0xff] }
 0x305   : > { %2477 = vmatprep.subr.bf16.mxu0 %v8097_v61 }
 0x306   : > { %2519 = vmatpush1.bf16.msra.mxu1 %v8092_v62 }
 0x307   : > { %2520 = vmatprep.subr.bf16.mxu1 %v8100_v63 }
 0x308   : > { %2478 = vmatpush1.bf16.msra.mxu0 %v8095_v0 }
 0x309   : > { %2479 = vmatprep.subr.bf16.mxu0 %v8103_v1 }
 0x30a   : > { %2521 = vmatpush1.bf16.msra.mxu1 %v8098_v3 }
 0x30b   : > { %2522 = vmatprep.subr.bf16.mxu1 %v8106_v4 }
 0x30c   : > { %2480 = vmatpush1.bf16.msra.mxu0 %v8101_v5 }
 0x30d   : > { %2481 = vmatprep.subr.bf16.mxu0 %v8109_v6 }
 0x30e   : > { %2523 = vmatpush1.bf16.msra.mxu1 %v8104_v7 }
 0x30f   : > { %2524 = vmatprep.subr.bf16.mxu1 %v8112_v11 }
 0x310   : > { %2482 = vmatpush1.bf16.msra.mxu0 %v8107_v14 }
 0x311   : > { %2483 = vmatprep.subr.bf16.mxu0 %v8115_v15 }
 0x312   : > { %2525 = vmatpush1.bf16.msra.mxu1 %v8110_v16 }
 0x313   : > { %2526 = vmatprep.subr.bf16.mxu1 %v8118_v17 }
 0x314   : > { %2484 = vmatpush1.bf16.msra.mxu0 %v8113_v18 }
 0x315   : > { %2485 = vmatprep.subr.bf16.mxu0 %v8121_v19 }
 0x316   : > { %2527 = vmatpush1.bf16.msra.mxu1 %v8116_v22  ;;  %v2222_v22 = vld [vmem:[%s10575_s1] sm:$0xf] }
 0x317   : > { %2528 = vmatprep.subr.bf16.mxu1 %v8124_v23  ;;  %v2294_v23 = vrot.slane %v2222_v22, %v1547_v9  ;;  %v2302_v27 = vrot.slane %v2222_v22, %v1555_v10 }
 0x318   : > { %2486 = vmatpush1.bf16.msra.mxu0 %v8119_v26  ;;  %v2298_v26 = vrot.slane %v2222_v22, %v1551_v12 }
 0x319   : > { %7366 = vmatprep.subr.bf16.mxu0 %v8125_v33 }
 0x31a   : > { %2529 = vmatpush1.bf16.msra.mxu1 %v8122_v29  ;;  %v2306_v29 = vrot.slane %v2222_v22, %v1559_v13 }
 0x31b   : > { %2504 = vmatmul.mubr.bf16.vlgmr.msra.gmra.mrb[8].mxu0 %v2289_v32  ;;  %7388 = vmatprep.subr.bf16.mxu1 %v8126_v34 }
 0x31c   : > { %7367 = vmatpush3.bf16.msra.mxu0 %v8127_v35 }
 0x31d   : > { %2547 = vmatmul.mubr.bf16.vlgmr.msra.gmra.mrb[8].mxu1 %v2289_v32  ;;  %7368 = vmatprep.subr.bf16.mxu0 %v8129_v39 }
 0x31e   : > { %7389 = vmatpush3.bf16.msra.mxu1 %v8128_v38 }
 0x31f   : > { %7390 = vmatprep.subr.bf16.mxu1 %v8130_v40 }
 0x320   : > { %7369 = vmatpush3.bf16.msra.mxu0 %v8131_v41 }
 0x321   : > { %7370 = vmatprep.subr.bf16.mxu0 %v8133_v43 }
 0x322   : > { %7391 = vmatpush3.bf16.msra.mxu1 %v8132_v42 }
 0x323   : > { %7392 = vmatprep.subr.bf16.mxu1 %v8134_v44 }
 0x324   : > { %7371 = vmatpush3.bf16.msra.mxu0 %v8135_v45 }
 0x325   : > { %7372 = vmatprep.subr.bf16.mxu0 %v8137_v20 }
 0x326   : > { %7393 = vmatpush3.bf16.msra.mxu1 %v8136_v46 }
 0x327   : > { %7394 = vmatprep.subr.bf16.mxu1 %v8138_v30 }
 0x328   : > { %7373 = vmatpush3.bf16.msra.mxu0 %v8139_v47 }
 0x329   : > { %7374 = vmatprep.subr.bf16.mxu0 %v8141_v31 }
 0x32a   : > { %7395 = vmatpush3.bf16.msra.mxu1 %v8140_v21 }
 0x32b   : > { %7396 = vmatprep.subr.bf16.mxu1 %v8142_v48 }
 0x32c   : > { %7375 = vmatpush3.bf16.msra.mxu0 %v8143_v49 }
 0x32d   : > { %7376 = vmatprep.subr.bf16.mxu0 %v8145_v24 }
 0x32e   : > { %7397 = vmatpush3.bf16.msra.mxu1 %v8144_v50 }
 0x32f   : > { %7398 = vmatprep.subr.bf16.mxu1 %v8146_v51 }
 0x330   : > { %7377 = vmatpush3.bf16.msra.mxu0 %v8147_v52 }
 0x331   : > { %7378 = vmatprep.subr.bf16.mxu0 %v8149_v54 }
 0x332   : > { %7399 = vmatpush3.bf16.msra.mxu1 %v8148_v53 }
 0x333   : > { %7400 = vmatprep.subr.bf16.mxu1 %v8150_v55 }
 0x334   : > { %7379 = vmatpush3.bf16.msra.mxu0 %v8151_v36 }
 0x335   : > { %7380 = vmatprep.subr.bf16.mxu0 %v8153_v57 }
 0x336   : > { %7401 = vmatpush3.bf16.msra.mxu1 %v8152_v56 }
 0x337   : > { %7402 = vmatprep.subr.bf16.mxu1 %v8154_v25 }
 0x338   : > { %7381 = vmatpush3.bf16.msra.mxu0 %v8155_v37 }
 0x33a   : > { %7403 = vmatpush3.bf16.msra.mxu1 %v8156_v58 }
 0x3ce   : > { %v7338_v59 = vpop.f32.mrb[4].mxu0 }
 0x3cf   : > { %v7339_v61 = vpop.f32.mrb[5].mxu0 }
 0x3d0   : > { %v7360_v62 = vpop.f32.mrb[4].mxu1  ;;  %v7340_v63 = vadd.f32 %v7339_v61, %v7338_v59  ;;  %v7341_v0 = vpop.f32.mrb[6].mxu0 }
 0x3d1   : > { %v7361_v1 = vpop.f32.mrb[5].mxu1  ;;  %v7342_v3 = vpop.f32.mrb[7].mxu0 }
 0x3d2   : > { %v2120_v4 = vadd.f32 %v7340_v63, %v7050_v60  ;;  %v7362_v5 = vadd.f32 %v7361_v1, %v7360_v62  ;;  %v7363_v6 = vpop.f32.mrb[6].mxu1  ;;  %v7343_v7 = vadd.f32 %v7342_v3, %v7341_v0 }
 0x3d3   : > { %v7364_v11 = vpop.f32.mrb[7].mxu1 }
 0x3d4   : > { %v2123_v14 = vadd.f32 %v7343_v7, %v7050_v60  ;;  %v7365_v15 = vadd.f32 %v7364_v11, %v7363_v6  ;;  %v9640_v16 = vadd.f32 %v7362_v5, %v2120_v4 }
 0x3d6   : > { %v9642_v17 = vadd.f32 %v7365_v15, %v2123_v14  ;;  %v2167_v18 = vmul.f32 %v9640_v16, %v9640_v16 }
 0x3d8   : > { %2169 = vadd.xlane.f32.xlu0 %v2167_v18  ;;  %v2168_v19 = vmul.f32 %v9642_v17, %v9642_v17 }
 0x3dc   : > { %2171 = vadd.xlane.f32.xlu0 %v2168_v19 }
 0x3ee   : > { %v2505_v28 = vpop.f32.mrb[8].mxu0 }
 0x3ef   : > { %v9657_v32 = vadd.f32 %v2505_v28, %v2294_v23  ;;  %v2507_v33 = vpop.f32.mrb[9].mxu0 }
 0x3f0   : > { %v2548_v34 = vpop.f32.mrb[8].mxu1  ;;  %v9659_v35 = vadd.f32 %v2507_v33, %v2298_v26  ;;  %v2509_v38 = vpop.f32.mrb[10].mxu0 }
 0x3f1   : > { %v2565_v39 = vmul.f32 0.044715, %v9657_v32  ;;  %v9662_v9 = vadd.f32 %v2548_v34, %v2302_v27  ;;  %v2550_v40 = vpop.f32.mrb[9].mxu1  ;;  %v2510_v12 = vadd.f32 %v2509_v38, %v2294_v23  ;;  %v2511_v41 = vpop.f32.mrb[11].mxu0  ;;  %v2557_v33 = vmul.f32 0.5, %v9657_v32 }
 0x3f2   : > { %v2566_v10 = vmul.f32 0.044715, %v9659_v35  ;;  %v9665_v42 = vadd.f32 %v2550_v40, %v2306_v29  ;;  %v2552_v8 = vpop.f32.mrb[10].mxu1  ;;  %v9667_v13 = vadd.f32 %v2511_v41, %v2298_v26 }
 0x3f3   : > { %v2573_v43 = vmul.f32 %v2565_v39, %v9657_v32  ;;  %v2567_v44 = vmul.f32 0.044715, %v9662_v9  ;;  %v2569_v45 = vmul.f32 0.044715, %v2510_v12  ;;  %v2553_v46 = vadd.f32 %v2552_v8, %v2302_v27  ;;  %v2554_v20 = vpop.f32.mrb[11].mxu1 }
 0x3f4   : > { %v2574_v30 = vmul.f32 %v2566_v10, %v9659_v35  ;;  %v2568_v47 = vmul.f32 0.044715, %v9665_v42  ;;  %v2570_v21 = vmul.f32 0.044715, %v9667_v13  ;;  %v9674_v31 = vadd.f32 %v2554_v20, %v2306_v29 }
 0x3f5   : > { %v2581_v48 = vmul.f32 %v2573_v43, %v9657_v32  ;;  %v2575_v49 = vmul.f32 %v2567_v44, %v9662_v9  ;;  %v2577_v50 = vmul.f32 %v2569_v45, %v2510_v12  ;;  %v2571_v24 = vmul.f32 0.044715, %v2553_v46 }
 0x3f6   : > { %v2582_v51 = vmul.f32 %v2574_v30, %v9659_v35  ;;  %v2576_v52 = vmul.f32 %v2568_v47, %v9665_v42  ;;  %v2578_v53 = vmul.f32 %v2570_v21, %v9667_v13  ;;  %v2572_v54 = vmul.f32 0.044715, %v9674_v31 }
 0x3f7   : > { %v2589_v55 = vadd.f32 %v2581_v48, %v9657_v32  ;;  %v2583_v36 = vmul.f32 %v2575_v49, %v9662_v9  ;;  %v2585_v56 = vmul.f32 %v2577_v50, %v2510_v12  ;;  %v2579_v57 = vmul.f32 %v2571_v24, %v2553_v46 }
 0x3f8   : > { %v2584_v25 = vmul.f32 %v2576_v52, %v9665_v42  ;;  %v2586_v37 = vmul.f32 %v2578_v53, %v9667_v13  ;;  %v2580_v58 = vmul.f32 %v2572_v54, %v9674_v31  ;;  %v2590_v0 = vadd.f32 %v2582_v51, %v9659_v35 }
 0x3f9   : > { %v2597_v59 = vmul.f32 0.7978846, %v2589_v55  ;;  %v2591_v60 = vadd.f32 %v2583_v36, %v9662_v9  ;;  %v2593_v61 = vadd.f32 %v2585_v56, %v2510_v12  ;;  %v2587_v62 = vmul.f32 %v2579_v57, %v2553_v46  ;;  %v1442_v36 = vld [vmem:[%s10576_s15] sm:$0xff] }
 0x3fa   : > { %v2588_v63 = vmul.f32 %v2580_v58, %v9674_v31  ;;  %v2594_v1 = vadd.f32 %v2586_v37, %v9667_v13  ;;  %v2598_v6 = vmul.f32 0.7978846, %v2590_v0  ;;  %v2592_v7 = vadd.f32 %v2584_v25, %v9665_v42  ;;  %v7116_v56 = vld [vmem:[%s10578_s7] ss:$0 sm:$0xff] }
 0x3fb   : > { %8173 = vtanh.f32 %v2597_v59  ;;  %v2599_v3 = vmul.f32 0.7978846, %v2591_v60  ;;  %v2601_v4 = vmul.f32 0.7978846, %v2593_v61  ;;  %v2595_v5 = vadd.f32 %v2587_v62, %v2553_v46 }
 0x3fc   : > { %v2602_v14 = vmul.f32 0.7978846, %v2594_v1  ;;  %v2596_v15 = vadd.f32 %v2588_v63, %v9674_v31  ;;  %v2600_v18 = vmul.f32 0.7978846, %v2592_v7  ;;  %v2561_v34 = vmul.f32 0.5, %v2510_v12 }
 0x3fd   : > { %8175 = vtanh.f32 %v2599_v3  ;;  %v2603_v11 = vmul.f32 0.7978846, %v2595_v5  ;;  %v2559_v40 = vmul.f32 0.5, %v9662_v9  ;;  %v2563_v41 = vmul.f32 0.5, %v2553_v46 }
 0x3fe   : > { %8177 = vtanh.f32 %v2601_v4  ;;  %v2604_v19 = vmul.f32 0.7978846, %v2596_v15  ;;  %v2558_v43 = vmul.f32 0.5, %v9659_v35  ;;  %v2562_v47 = vmul.f32 0.5, %v9667_v13 }
 0x3ff   : > { %8179 = vtanh.f32 %v2603_v11  ;;  %v2560_v12 = vmul.f32 0.5, %v9665_v42  ;;  %v2564_v9 = vmul.f32 0.5, %v9674_v31  ;;  %vm2935_vm0 = vcmp.ne.f32.partialorder %v1442_v36, 0.0 }
 0x400   : > { %8181 = vtanh.f32 %v2598_v6  ;;  %v2937_v42 = vsel %vm2935_vm0, 1, %v8946_v2 }
 0x401   : > { %8183 = vtanh.f32 %v2602_v14  ;;  %2940 = vperm.xlu0 %7995, %v2937_v42   ;;  %v1443_v14 = vld [vmem:[%s10577_s28 + $0x8] sm:$0xff] }
 0x402   : > { %8185 = vtanh.f32 %v2600_v18  ;;  %vm2936_vm1 = vcmp.ne.f32.partialorder %v1443_v14, 0.0 }
 0x403   : > { %8187 = vtanh.f32 %v2604_v19  ;;  %v2938_v15 = vsel %vm2936_vm1, 1, %v8946_v2 }
 0x405   : > { %v8174_v22 = vpop.eup %8173 }
 0x406   : > { %v2613_v26 = vadd.f32 1.0, %v8174_v22 }
 0x407   : > { %v8176_v23 = vpop.eup %8175 }
 0x408   : > { %v8178_v27 = vpop.eup %8177  ;;  %v2615_v28 = vadd.f32 1.0, %v8176_v23  ;;  %v2621_v45 = vmul.f32 %v2613_v26, %v2557_v33 }
 0x409   : > { %v8180_v29 = vpop.eup %8179  ;;  %v2617_v38 = vadd.f32 1.0, %v8178_v27 }
 0x40a   : > { %v8182_v39 = vpop.eup %8181  ;;  %v2619_v10 = vadd.f32 1.0, %v8180_v29  ;;  %v2623_v48 = vmul.f32 %v2615_v28, %v2559_v40 }
 0x40b   : > { %v8184_v8 = vpop.eup %8183  ;;  %v2614_v44 = vadd.f32 1.0, %v8182_v39  ;;  %v2625_v20 = vmul.f32 %v2617_v38, %v2561_v34 }
 0x40c   : > { %v8186_v30 = vpop.eup %8185  ;;  %v2618_v21 = vadd.f32 1.0, %v8184_v8  ;;  %v2627_v49 = vmul.f32 %v2619_v10, %v2563_v41 }
 0x40d   : > { %v8188_v32 = vpop.eup %8187  ;;  %v2616_v46 = vadd.f32 1.0, %v8186_v30  ;;  %v2629_v50 = vpack.c.bf16 %v2625_v20, %v2621_v45  ;;  %v2622_v24 = vmul.f32 %v2614_v44, %v2558_v43  ;;  %v7083_v43 = vld [vmem:[#allocation12] ss:$0 sm:$0xff]  ;;  %v7149_v44 = vld [vmem:[%s10579_s19] ss:$0 sm:$0xff] }
 0x40e   : > { %v2626_v51 = vmul.f32 %v2618_v21, %v2562_v47  ;;  %v2620_v35 = vadd.f32 1.0, %v8188_v32  ;;  %v2631_v52 = vpack.c.bf16 %v2627_v49, %v2623_v48 }
 0x40f   : > { %v2624_v54 = vmul.f32 %v2616_v46, %v2560_v12 }
 0x410   : > { %v2630_v53 = vpack.c.bf16 %v2626_v51, %v2622_v24  ;;  %v2628_v55 = vmul.f32 %v2620_v35, %v2564_v9 }
 0x412   : > { %2863 = vmatprep.mubr.bf16.mxu0 %v2630_v53  ;;  %v2632_v13 = vpack.c.bf16 %v2628_v55, %v2624_v54 }
 0x413   : > { %2864 = vmatmul.mubr.bf16.vlgmr.msra.gmra.mrb[12].mxu0 %v2629_v50 }
 0x414   : > { %2904 = vmatprep.mubr.bf16.mxu1 %v2632_v13 }
 0x415   : > { %2905 = vmatmul.mubr.bf16.vlgmr.msra.gmra.mrb[12].mxu1 %v2631_v52 }
 0x465   : > { %v2170_v18 = vpop.xlane.xlu0 %2169 }
 0x466   : > { %v2174_v19 = vmul.f32 0.0078125, %v2170_v18 }
 0x468   : > { %v2176_v26 = vadd.f32 1e-08, %v2174_v19 }
 0x469   : > { %v2172_v22 = vpop.xlane.xlu0 %2171 }
 0x46a   : > { %v2175_v23 = vmul.f32 0.0078125, %v2172_v22  ;;  %8189 = vrsqrt.f32 %v2176_v26 }
 0x46c   : > { %v2177_v27 = vadd.f32 1e-08, %v2175_v23 }
 0x46e   : > { %8191 = vrsqrt.f32 %v2177_v27 }
 0x474   : > { %v8190_v40 = vpop.eup %8189 }
 0x475   : > { %v2180_v41 = vmul.f32 %v8190_v40, %v9640_v16 }
 0x477   : > { %v2188_v20 = vmul.f32 %v7083_v43, %v2180_v41 }
 0x478   : > { %v8192_v2 = vpop.eup %8191 }
 0x479   : > { %v2181_v21 = vmul.f32 %v8192_v2, %v9642_v17 }
 0x47b   : > { %v2189_v9 = vmul.f32 %v7083_v43, %v2181_v21 }
 0x480   : > { %v2941_v10 = vpop.permute.xlu0 %2940 }
 0x481   : > { %vm2945_vm2 = vcmp.eq.s32.totalorder %v2941_v10, 1 }
 0x4e6   : > { %v7382_v31 = vpop.f32.mrb[12].mxu0 }
 0x4e7   : > { %v7383_v57 = vpop.f32.mrb[13].mxu0 }
 0x4e8   : > { %v7404_v25 = vpop.f32.mrb[12].mxu1  ;;  %v7384_v37 = vadd.f32 %v7383_v57, %v7382_v31  ;;  %v7385_v58 = vpop.f32.mrb[14].mxu0 }
 0x4e9   : > { %v7405_v59 = vpop.f32.mrb[13].mxu1  ;;  %v7386_v60 = vpop.f32.mrb[15].mxu0 }
 0x4ea   : > { %v2866_v61 = vadd.f32 %v7384_v37, %v7116_v56  ;;  %v7406_v62 = vadd.f32 %v7405_v59, %v7404_v25  ;;  %v7407_v63 = vpop.f32.mrb[14].mxu1  ;;  %v7387_v0 = vadd.f32 %v7386_v60, %v7385_v58 }
 0x4eb   : > { %v7408_v1 = vpop.f32.mrb[15].mxu1 }
 0x4ec   : > { %v2869_v3 = vadd.f32 %v7387_v0, %v7116_v56  ;;  %v7409_v4 = vadd.f32 %v7408_v1, %v7407_v63  ;;  %v2907_v5 = vadd.f32 %v7406_v62, %v2866_v61 }
 0x4ee   : > { %v2910_v6 = vadd.f32 %v7409_v4, %v2869_v3  ;;  %v2913_v7 = vmul.f32 %v2907_v5, %v2907_v5 }
 0x4f0   : > { %2915 = vadd.xlane.f32.xlu1 %v2913_v7  ;;  %v2914_v11 = vmul.f32 %v2910_v6, %v2910_v6 }
 0x4f4   : > { %2917 = vadd.xlane.f32.xlu1 %v2914_v11 }
 0x505   : > { %2943 = vperm.xlu1 %7996, %v2938_v15  }
 0x57d   : > { %v2916_v28 = vpop.xlane.xlu1 %2915 }
 0x57e   : > { %v2919_v29 = vmul.f32 0.0078125, %v2916_v28 }
 0x580   : > { %v2921_v33 = vadd.f32 1e-08, %v2919_v29 }
 0x581   : > { %v2918_v34 = vpop.xlane.xlu1 %2917 }
 0x582   : > { %8193 = vrsqrt.f32 %v2921_v33  ;;  %v2920_v38 = vmul.f32 0.0078125, %v2918_v34 }
 0x584   : > { %v2922_v39 = vadd.f32 1e-08, %v2920_v38 }
 0x585   : > { %v2944_v47 = vpop.permute.xlu1 %2943 }
 0x586   : > { %8195 = vrsqrt.f32 %v2922_v39  ;;  %vm2946_vm3 = vcmp.eq.s32.totalorder %v2944_v47, 1 }
 0x58c   : > { %v8194_v8 = vpop.eup %8193 }
 0x58d   : > { %v2925_v45 = vmul.f32 %v8194_v8, %v2907_v5 }
 0x58f   : > { %v2933_v30 = vmul.f32 %v7149_v44, %v2925_v45 }
 0x590   : > { %v8196_v48 = vpop.eup %8195 }
 0x591   : > { %v2947_v49 = vsel %vm2945_vm2, %v2188_v20, %v2933_v30  ;;  %v2926_v32 = vmul.f32 %v8196_v48, %v2910_v6 }
 0x592   : > { %2949 = vst [vmem:[#allocation2] sm:$0xff] %v2947_v49 }
 0x593   : > { %v2934_v12 = vmul.f32 %v7149_v44, %v2926_v32 }
 0x595   : > { %v2948_v46 = vsel %vm2946_vm3, %v2189_v9, %v2934_v12 }
 0x596   : > { %2950 = vst [vmem:[#allocation2 + $0x8] sm:$0xff] %v2948_v46 }
 0x597 PF: > { %v2953_v24 = vlaneseq  ;;  %v8212_v51 = vld [vmem:[%s9534_s11] sm:$0xff]   ;;  %v8947_v35 = vmov 0.0|0.0   ;;  %v8948_v52 = vmov 0.0   ;;  %vm8949_vm4 = vmmov 0   ;;  %v8214_v56 = vld [vmem:[%s9534_s11 + $0x8] sm:$0xff]   ;;  %v8216_v14 = vld [vmem:[%s9534_s11 + $0x10] sm:$0xff]  }
 0x598   : > { %7755 = vmatprep.subr.bf16.mxu0 %v8947_v35  ;;  %7559 = vmatprep.subr.bf16.mxu1 %v8948_v52  ;;  %vm2998_vm5 = vcmask 121856   ;;  %v8218_v19 = vld [vmem:[%s9534_s11 + $0x18] sm:$0xff]   ;;  %v8220_v27 = vld [vmem:[%s9534_s11 + $0x20] sm:$0xff]   ;;  %v8222_v28 = vld [vmem:[%s9534_s11 + $0x28] sm:$0xff]   ;;  %s8951_s10 = smov 96   ;;  %s8953_s2 = smov 80  }
 0x599   : > { %v9707_v16 = vld [vmem:[#allocation2] sm:$0xff]  ;;  %v9716_v53 = vshrl.u32 %v2953_v24, 7  ;;  %7560 = vmatpush3.bf16.msra.mxu1 %v8212_v51  ;;  %v2956_v55 = vand.u32 127, %v2953_v24  ;;  %7556 = vmatprep.mubr.msk.f32.mxu0 %vm8949_vm4, %v8948_v52  ;;  %vm9744_vm8 = vmpackc.low %vm2998_vm5, %vm2998_vm5  ;;  %v8224_v34 = vld [vmem:[%s9534_s11 + $0x30] sm:$0xff]   ;;  %s8954_s4 = smov 120   ;;  %s8955_s16 = smov 112  }
 0x59a   : > { %v3187_v17 = vmul.f32 %v9707_v16, %v9707_v16  ;;  %7561 = vmatprep.subr.bf16.mxu1 %v8948_v52  ;;  %7575 = vmatprep.mubr.msk.bf16.mxu1 %vm8949_vm4, %v8948_v52  ;;  %v8226_v39 = vld [vmem:[%s9534_s11 + $0x38] sm:$0xff]   ;;  %v8213_v2 = vld [vmem:[%s9565_s21] sm:$0xff]   ;;  %v8215_v41 = vld [vmem:[%s9565_s21 + $0x8] sm:$0xff]   ;;  %s8956_s9 = smov 104   ;;  %vm4233_vm15 = vcmask 261120   ;;  %vm4418_vm0 = vcmask 64512  }
 0x59b   : > { %v2957_v13 = vsub.s32 0, %v9716_v53  ;;  %v2958_v36 = vsub.s32 1, %v9716_v53  ;;  %v2959_v42 = vsub.s32 2, %v9716_v53  ;;  %v2960_v31 = vsub.s32 3, %v9716_v53  ;;  %v2997_v40 = vld [vmem:[%s9556_s13] sm:$0xf] }
 0x59c   : > { %3189 = vadd.xlane.f32.xlu0 %v3187_v17  ;;  %v2961_v59 = vsub.s32 4, %v9716_v53  ;;  %v2962_v0 = vsub.s32 5, %v9716_v53  ;;  %v2963_v3 = vsub.s32 6, %v9716_v53  ;;  %v2964_v11 = vsub.s32 7, %v9716_v53  ;;  %v8217_v10 = vld [vmem:[%s9565_s21 + $0x10] sm:$0xff]   ;;  %v8219_v8 = vld [vmem:[%s9565_s21 + $0x18] sm:$0xff]  }
 0x59d   : > { %v9709_v50 = vld [vmem:[#allocation2 + $0x8] sm:$0xff]  ;;  %v2965_v57 = vadd.s32 7, %v2957_v13  ;;  %v2966_v25 = vadd.s32 7, %v2958_v36  ;;  %v2967_v37 = vadd.s32 7, %v2959_v42  ;;  %v2968_v58 = vadd.s32 7, %v2960_v31  ;;  %7562 = vmatpush3.bf16.msra.mxu1 %v8214_v56  ;;  %v8223_v44 = vld [vmem:[%s9565_s21 + $0x28] sm:$0xff]  }
 0x59e   : > { %v3188_v54 = vmul.f32 %v9709_v50, %v9709_v50  ;;  %7563 = vmatprep.subr.bf16.mxu1 %v8948_v52  ;;  %v2969_v1 = vadd.s32 7, %v2961_v59  ;;  %v2970_v6 = vadd.s32 7, %v2962_v0  ;;  %v2971_v15 = vadd.s32 7, %v2963_v3  ;;  %v8221_v43 = vld [vmem:[%s9565_s21 + $0x20] sm:$0xff]   ;;  %v8225_v45 = vld [vmem:[%s9565_s21 + $0x30] sm:$0xff]   ;;  %v8227_v20 = vld [vmem:[%s9565_s21 + $0x38] sm:$0xff]  }
 0x59f   : > { %vm2973_vm6 = vcmp.eq.s32.totalorder %v2965_v57, %v2956_v55  ;;  %vm2974_vm7 = vcmp.eq.s32.totalorder %v2966_v25, %v2956_v55  ;;  %vm2975_vm9 = vcmp.eq.s32.totalorder %v2967_v37, %v2956_v55  ;;  %vm2976_vm10 = vcmp.eq.s32.totalorder %v2968_v58, %v2956_v55  ;;  %v7167_v24 = vld [vmem:[%s1405_s6] ss:$0 sm:$0xff]  ;;  %v8229_v56 = vld [vmem:[%s9567_s25 + $0x8] sm:$0xff]   ;;  %v8232_v57 = vld [vmem:[%s9567_s25 + $0x20] sm:$0xff]   ;;  %s8957_s6 = smov 88  }
 0x5a0   : > { %3191 = vadd.xlane.f32.xlu0 %v3188_v54  ;;  %v7150_v60 = vsel %vm2973_vm6, 1.0, %v8948_v52  ;;  %v7151_v61 = vsel %vm2974_vm7, 1.0, %v8948_v52  ;;  %v7152_v4 = vsel %vm2975_vm9, 1.0, %v8948_v52  ;;  %v7153_v5 = vsel %vm2976_vm10, 1.0, %v8948_v52  ;;  %v8228_v54 = vld [vmem:[%s9567_s25] sm:$0xff]   ;;  %v8233_v25 = vld [vmem:[%s9567_s25 + $0x28] sm:$0xff]  }
 0x5a1   : > { %v7756_v63 = vpack.c.bf16 %v7151_v61, %v7150_v60  ;;  %v7760_v7 = vpack.c.bf16 %v7153_v5, %v7152_v4  ;;  %vm2977_vm11 = vcmp.eq.s32.totalorder %v2969_v1, %v2956_v55  ;;  %vm2978_vm12 = vcmp.eq.s32.totalorder %v2970_v6, %v2956_v55  ;;  %7564 = vmatpush3.bf16.msra.mxu1 %v8216_v14  ;;  %v8234_v37 = vld [vmem:[%s9567_s25 + $0x30] sm:$0xff]   ;;  %v8235_v58 = vld [vmem:[%s9567_s25 + $0x38] sm:$0xff]  }
 0x5a2   : > { %7565 = vmatprep.subr.bf16.mxu1 %v8948_v52  ;;  %v2972_v18 = vadd.s32 7, %v2964_v11  ;;  %v7154_v22 = vsel %vm2977_vm11, 1.0, %v8948_v52  ;;  %v7155_v23 = vsel %vm2978_vm12, 1.0, %v8948_v52  ;;  %vm2979_vm13 = vcmp.eq.s32.totalorder %v2971_v15, %v2956_v55  ;;  %v7177_v61 = vld [vmem:[%s1411_s3] ss:$0 sm:$0xff]  ;;  %s8952_s3 = smov 64  }
 0x5a3   : > { %7758 = vmatpush3.bf16.xpose.msk.msra.mxu0 %vm9744_vm8, %v7756_v63  ;;  %v7764_v26 = vpack.c.bf16 %v7155_v23, %v7154_v22  ;;  %v7156_v29 = vsel %vm2979_vm13, 1.0, %v8948_v52  ;;  %v7168_v4 = vld [vmem:[%s1408_s26] ss:$0 sm:$0xff]  ;;  %s8958_s26 = smov 72   ;;  %vm4470_vm1 = vcmask 1043456   ;;  %vm4801_vm2 = vcmask 523264  }
 0x5a4   : > { %7759 = vmatprep.subr.bf16.mxu0 %v8947_v35  ;;  %vm2980_vm14 = vcmp.eq.s32.totalorder %v2972_v18, %v2956_v55  ;;  %vm4803_vm3 = vcmask 785408  }
 0x5a5   : > { %7566 = vmatpush3.bf16.msra.mxu1 %v8218_v19  ;;  %v7157_v33 = vsel %vm2980_vm14, 1.0, %v8948_v52 }
 0x5a6   : > { %7567 = vmatprep.subr.bf16.mxu1 %v8948_v52  ;;  %v7768_v38 = vpack.c.bf16 %v7157_v33, %v7156_v29  ;;  %v8959_v33 = vmov 1983009808  }
 0x5a9   : > { %7568 = vmatpush3.bf16.msra.mxu1 %v8220_v27 }
 0x5aa   : > { %7569 = vmatprep.subr.bf16.mxu1 %v8948_v52 }
 0x5ab   : > { %7762 = vmatpush3.bf16.xpose.msk.msra.mxu0 %vm9744_vm8, %v7760_v7 }
 0x5ac   : > { %7763 = vmatprep.subr.bf16.mxu0 %v8947_v35 }
 0x5ad   : > { %7570 = vmatpush3.bf16.msra.mxu1 %v8222_v28 }
 0x5ae   : > { %7571 = vmatprep.subr.bf16.mxu1 %v8948_v52 }
 0x5b1   : > { %7572 = vmatpush3.bf16.msra.mxu1 %v8224_v34  ;;  %v3120_v34 = vunpack.c.l.s4 %v8959_v33 }
 0x5b2   : > { %7573 = vmatprep.subr.bf16.mxu1 %v8948_v52 }
 0x5b3   : > { %7766 = vmatpush3.bf16.xpose.msk.msra.mxu0 %vm9744_vm8, %v7764_v26  ;;  %v9862_v26 = vld [vmem:[%s1414_s5] ss:$0 sm:$0xff] }
 0x5b4   : > { %7767 = vmatprep.subr.bf16.mxu0 %v8947_v35 }
 0x5b5   : > { %7574 = vmatpush3.bf16.msra.mxu1 %v8226_v39 }
 0x5b6   : > { %7599 = vmatprep.subr.bf16.mxu1 %v8948_v52 }
 0x5bb   : > { %7770 = vmatpush3.bf16.xpose.msk.msra.mxu0 %vm9744_vm8, %v7768_v38  ;;  %v8960_v38 = vmov 1934713408  }
 0x5bc   : > { %7579 = vmatprep.subr.bf16.mxu0 %v8948_v52  ;;  %v3153_v39 = vunpack.c.l.s4 %v8960_v38 }
 0x5c2   : > { %7557 = vmatmul.mubr.msk.f32.vlgmr.msra.gmra.mrb[0].mxu0 %vm2998_vm5, %v2997_v40  ;;  %v3121_v40 = vunpack.c.0.s8 %v3120_v34 }
 0x5c3   : > { %7580 = vmatpush3.bf16.msra.mxu0 %v8213_v2  ;;  %7595 = vmatprep.mubr.msk.bf16.mxu0 %vm8949_vm4, %v8948_v52 }
 0x5c4   : > { %7581 = vmatprep.subr.bf16.mxu0 %v8948_v52 }
 0x5c7   : > { %7582 = vmatpush3.bf16.msra.mxu0 %v8215_v41 }
 0x5c8   : > { %7583 = vmatprep.subr.bf16.mxu0 %v8948_v52 }
 0x5cb   : > { %7584 = vmatpush3.bf16.msra.mxu0 %v8217_v10  ;;  %v3154_v10 = vunpack.c.0.s8 %v3153_v39 }
 0x5cc   : > { %7585 = vmatprep.subr.bf16.mxu0 %v8948_v52 }
 0x5cf   : > { %7586 = vmatpush3.bf16.msra.mxu0 %v8219_v8  ;;  %v9870_v8 = vsub.s32 %v3121_v40, %v9716_v53 }
 0x5d0   : > { %7587 = vmatprep.subr.bf16.mxu0 %v8948_v52 }
 0x5d3   : > { %7588 = vmatpush3.bf16.msra.mxu0 %v8221_v43 }
 0x5d4   : > { %7589 = vmatprep.subr.bf16.mxu0 %v8948_v52 }
 0x5d7   : > { %7590 = vmatpush3.bf16.msra.mxu0 %v8223_v44 }
 0x5d8   : > { %7591 = vmatprep.subr.bf16.mxu0 %v8948_v52 }
 0x5db   : > { %7592 = vmatpush3.bf16.msra.mxu0 %v8225_v45 }
 0x5dc   : > { %7593 = vmatprep.subr.bf16.mxu0 %v8948_v52 }
 0x5df   : > { %7594 = vmatpush3.bf16.msra.mxu0 %v8227_v20 }
 0x5e0   : > { %7643 = vmatprep.subr.bf16.mxu0 %v8948_v52 }
 0x629   : > { %v3190_v30 = vpop.xlane.xlu0 %3189 }
 0x62a   : > { %v3194_v47 = vmul.f32 0.0078125, %v3190_v30 }
 0x62c   : > { %v3196_v21 = vadd.f32 1e-08, %v3194_v47  ;;  %v9873_v47 = vsub.s32 %v3154_v10, %v9716_v53 }
 0x62d   : > { %v3192_v48 = vpop.xlane.xlu0 %3191 }
 0x62e   : > { %8324 = vrsqrt.f32 %v3196_v21  ;;  %v3195_v49 = vmul.f32 0.0078125, %v3192_v48 }
 0x630   : > { %v3197_v32 = vadd.f32 1e-08, %v3195_v49 }
 0x632   : > { %8326 = vrsqrt.f32 %v3197_v32 }
 0x638   : > { %v8325_v12 = vpop.eup %8324 }
 0x639   : > { %v3200_v9 = vmul.f32 %v8325_v12, %v9707_v16  ;;  %v8230_v16 = vld [vmem:[%s9567_s25 + $0x10] sm:$0xff]  }
 0x63b   : > { %v3208_v17 = vmul.f32 %v7167_v24, %v3200_v9 }
 0x63c   : > { %v8327_v46 = vpop.eup %8326 }
 0x63d   : > { %v3201_v51 = vmul.f32 %v8327_v46, %v9709_v50  ;;  %v8231_v50 = vld [vmem:[%s9567_s25 + $0x18] sm:$0xff]   ;;  %s8950_s25 = smov 32  }
 0x63f   : > { %v3209_v35 = vmul.f32 %v7167_v24, %v3201_v51 }
 0x641   : > { %v3210_v55 = vpack.c.bf16 %v3209_v35, %v3208_v17 }
 0x643   : > { %7576 = vmatmul.mubr.bf16.vlgmr.msra.gmra.mrb[0].mxu1 %v3210_v55  ;;  %7596 = vmatmul.mubr.bf16.vlgmr.msra.gmra.mrb[4].mxu0 %v3210_v55 }
 0x644   : > { %7600 = vmatpush3.bf16.msra.mxu1 %v8228_v54  ;;  %7615 = vmatprep.mubr.msk.bf16.mxu1 %vm8949_vm4, %v8948_v52 }
 0x645   : > { %7601 = vmatprep.subr.bf16.mxu1 %v8948_v52  ;;  %7645 = vmatprep.mubr.msk.bf16.mxu0 %vm8949_vm4, %v8948_v52 }
 0x648   : > { %7602 = vmatpush3.bf16.msra.mxu1 %v8229_v56 }
 0x649   : > { %7603 = vmatprep.subr.bf16.mxu1 %v8948_v52 }
 0x64c   : > { %7604 = vmatpush3.bf16.msra.mxu1 %v8230_v16 }
 0x64d   : > { %7605 = vmatprep.subr.bf16.mxu1 %v8948_v52 }
 0x650   : > { %7606 = vmatpush3.bf16.msra.mxu1 %v8231_v50 }
 0x651   : > { %7607 = vmatprep.subr.bf16.mxu1 %v8948_v52 }
 0x654   : > { %7608 = vmatpush3.bf16.msra.mxu1 %v8232_v57 }
 0x655   : > { %7609 = vmatprep.subr.bf16.mxu1 %v8948_v52 }
 0x658   : > { %7610 = vmatpush3.bf16.msra.mxu1 %v8233_v25 }
 0x659   : > { %7611 = vmatprep.subr.bf16.mxu1 %v8948_v52 }
 0x65c   : > { %7612 = vmatpush3.bf16.msra.mxu1 %v8234_v37 }
 0x65d   : > { %7613 = vmatprep.subr.bf16.mxu1 %v8948_v52 }
 0x660   : > { %7614 = vmatpush3.bf16.msra.mxu1 %v8235_v58 }
 0x661   : > { %7619 = vmatprep.subr.bf16.mxu1 %v8948_v52 }
 0x663   : > { %7616 = vmatmul.mubr.bf16.vlgmr.msra.gmra.mrb[4].mxu1 %v3210_v55 }
 0x664   : > { %7621 = vmatprep.mubr.msk.bf16.mxu1 %vm8949_vm4, %v8948_v52 }
 0x695   : > { %v9828_v59 = vpop.f32.mrb[0].mxu0 }
 0x696   : > { %v7558_v60 = vpop.f32.mrb[1].mxu0 }
 0x716   : > { %v3316_v62 = vpop.f32.mrb[0].mxu1  ;;  %v3428_v63 = vpop.f32.mrb[4].mxu0 }
 0x717   : > { %v3429_v0 = vadd.f32 %v7177_v61, %v3428_v63  ;;  %v7577_v1 = vpop.f32.mrb[1].mxu1  ;;  %v7597_v3 = vpop.f32.mrb[5].mxu0  ;;  %v3317_v18 = vadd.f32 %v7168_v4, %v3316_v62 }
 0x718   : > { %v3319_v5 = vpop.f32.mrb[2].mxu1  ;;  %v3431_v6 = vpop.f32.mrb[6].mxu0 }
 0x719   : > { %v9836_v7 = vadd.f32 %v7168_v4, %v3319_v5  ;;  %v9838_v11 = vadd.f32 %v7177_v61, %v3431_v6  ;;  %3719 = vrot.lane.b32.xlu0 %v3429_v0, %s8950_s25  ;;  %3707 = vrot.lane.b32.xlu1 %v3429_v0, %s8951_s10  ;;  %v7578_v14 = vpop.f32.mrb[3].mxu1  ;;  %v7598_v15 = vpop.f32.mrb[7].mxu0  ;;  %v9845_v19 = vmul.f32 0.17677669, %v3317_v18 }
 0x71d   : > { %3106 = vrot.lane.b32.xlu0 %v9828_v59, %s8951_s10  ;;  %3713 = vrot.lane.b32.xlu1 %v3429_v0, %s8952_s3 }
 0x721   : > { %3112 = vrot.lane.b32.xlu0 %v9828_v59, %s8953_s2  ;;  %3551 = vrot.lane.b32.xlu1 %v9845_v19, %s8951_s10 }
 0x725   : > { %3557 = vrot.lane.b32.xlu1 %v9845_v19, %s8952_s3 }
 0x729   : > { %3563 = vrot.lane.b32.xlu1 %v9845_v19, %s8950_s25 }
 0x72d   : > { %3097 = vrot.lane.b32.xlu1 %v9828_v59, %s8954_s4 }
 0x731   : > { %3100 = vrot.lane.b32.xlu1 %v9828_v59, %s8955_s16 }
 0x735   : > { %3103 = vrot.lane.b32.xlu1 %v9828_v59, %s8956_s9 }
 0x736   : > { %v9857_v22 = vpop.f32.mrb[4].mxu1 }
 0x737   : > { %v7617_v23 = vpop.f32.mrb[5].mxu1 }
 0x738   : > { %v3543_v27 = vpop.f32.mrb[6].mxu1 }
 0x739   : > { %v9865_v28 = vadd.f32 %v9862_v26, %v3543_v27  ;;  %v7618_v29 = vpop.f32.mrb[7].mxu1  ;;  %3109 = vrot.lane.b32.xlu1 %v9828_v59, %s8957_s6 }
 0x73d   : > { %3115 = vrot.lane.b32.xlu1 %v9828_v59, %s8958_s26 }
 0x78b   : > { %v3720_v2 = vpop.permute.xlu0 %3719  ;;  %v3708_v41 = vpop.permute.xlu1 %3707 }
 0x78c   : > { %v3741_v43 = vcombine.low %v3708_v41, %v3720_v2  ;;  %v3742_v44 = vcombine.high %v3708_v41, %v3720_v2 }
 0x78e   : > { %v3749_v21 = vrot.slane %v3741_v43, %v9870_v8  ;;  %v3756_v48 = vrot.slane %v3742_v44, %v9870_v8 }
 0x78f   : > { %v3714_v45 = vpop.permute.xlu1 %3713 }
 0x790   : > { %v3725_v20 = vcombine.low %v3429_v0, %v3714_v45  ;;  %v3726_v30 = vcombine.high %v3429_v0, %v3714_v45 }
 0x792   : > { %v3733_v49 = vrot.slane %v3725_v20, %v9870_v8  ;;  %v3740_v32 = vrot.slane %v3726_v30, %v9870_v8 }
 0x793   : > { %v3552_v12 = vpop.permute.xlu1 %3551 }
 0x794   : > { %v3757_v9 = vcombine.low %v3733_v49, %v3749_v21  ;;  %v3758_v46 = vcombine.high %v3733_v49, %v3749_v21  ;;  %v3773_v24 = vcombine.low %v3740_v32, %v3756_v48  ;;  %v3774_v51 = vcombine.high %v3740_v32, %v3756_v48 }
 0x796   : > { %v3765_v17 = vrot.slane %v3757_v9, %v9873_v47  ;;  %v3772_v35 = vrot.slane %v3758_v46, %v9873_v47  ;;  %v3781_v54 = vrot.slane %v3773_v24, %v9873_v47  ;;  %v3788_v55 = vrot.slane %v3774_v51, %v9873_v47 }
 0x797   : > { %v3558_v56 = vpop.permute.xlu1 %3557 }
 0x798   : > { %v4089_v16 = vcombine.low %v3765_v17, %v3772_v35  ;;  %v7197_v50 = vcombine.high %v3765_v17, %v3772_v35  ;;  %v4105_v57 = vcombine.low %v3781_v54, %v3788_v55  ;;  %v7198_v25 = vcombine.high %v3781_v54, %v3788_v55 }
 0x799   : > { %v3569_v37 = vcombine.low %v9845_v19, %v3558_v56  ;;  %v3570_v58 = vcombine.high %v9845_v19, %v3558_v56 }
 0x79a   : > { %v4096_v60 = vrot.slane %v4089_v16, %v9870_v8  ;;  %v4104_v61 = vrot.slane %v7197_v50, %v9870_v8  ;;  %v4112_v62 = vrot.slane %v4105_v57, %v9870_v8  ;;  %v4120_v63 = vrot.slane %v7198_v25, %v9870_v8 }
 0x79b   : > { %v3564_v0 = vpop.permute.xlu1 %3563  ;;  %v3577_v6 = vrot.slane %v3569_v37, %v9870_v8  ;;  %v3584_v14 = vrot.slane %v3570_v58, %v9870_v8 }
 0x79c   : > { %v3585_v1 = vcombine.low %v3552_v12, %v3564_v0  ;;  %v3586_v3 = vcombine.high %v3552_v12, %v3564_v0  ;;  %v4121_v4 = vcombine.low %v4096_v60, %v4104_v61  ;;  %v4137_v5 = vcombine.low %v4112_v62, %v4120_v63 }
 0x79d   : > { %v4122_v12 = vcombine.high %v4096_v60, %v4104_v61  ;;  %v4138_v51 = vcombine.high %v4112_v62, %v4120_v63 }
 0x79e   : > { %v3593_v15 = vrot.slane %v3585_v1, %v9870_v8  ;;  %v3600_v18 = vrot.slane %v3586_v3, %v9870_v8  ;;  %v4129_v19 = vrot.slane %v4121_v4, %v9873_v47  ;;  %v4145_v23 = vrot.slane %v4137_v5, %v9873_v47 }
 0x79f   : > { %v4136_v56 = vrot.slane %v4122_v12, %v9873_v47  ;;  %v4152_v16 = vrot.slane %v4138_v51, %v9873_v47 }
 0x7a0   : > { %v3601_v27 = vcombine.low %v3577_v6, %v3593_v15  ;;  %v3602_v29 = vcombine.high %v3577_v6, %v3593_v15  ;;  %v3617_v33 = vcombine.low %v3584_v14, %v3600_v18  ;;  %v3618_v34 = vcombine.high %v3584_v14, %v3600_v18 }
 0x7a1   : > { %v4153_v38 = vcombine.low %v4129_v19, %v4145_v23  ;;  %v4154_v24 = vcombine.high %v4129_v19, %v4145_v23  ;;  %v4155_v25 = vcombine.low %v4136_v56, %v4152_v16  ;;  %v4156_v3 = vcombine.high %v4136_v56, %v4152_v16  ;;  %v3098_v19 = vpop.permute.xlu1 %3097 }
 0x7a2   : > { %v3609_v39 = vrot.slane %v3601_v27, %v9873_v47  ;;  %v3616_v40 = vrot.slane %v3602_v29, %v9873_v47  ;;  %v3625_v2 = vrot.slane %v3617_v33, %v9873_v47  ;;  %v3632_v41 = vrot.slane %v3618_v34, %v9873_v47  ;;  %v3107_v33 = vpop.permute.xlu0 %3106 }
 0x7a3   : > { %v4157_v10 = vpack.c.bf16 %v4153_v38, %v4153_v38  ;;  %v4158_v55 = vpack.c.bf16 %v4154_v24, %v4154_v24  ;;  %v4159_v61 = vpack.c.bf16 %v4155_v25, %v4155_v25  ;;  %v4160_v5 = vpack.c.bf16 %v4156_v3, %v4156_v3 }
 0x7a4   : > { %v4017_v43 = vcombine.low %v3609_v39, %v3616_v40  ;;  %v7195_v44 = vcombine.high %v3609_v39, %v3616_v40  ;;  %v4033_v45 = vcombine.low %v3625_v2, %v3632_v41  ;;  %v7196_v20 = vcombine.high %v3625_v2, %v3632_v41 }
 0x7a5   : > { %v4238_v30 = vsel %vm4233_vm15, %v4157_v10, 0  ;;  %v4284_v57 = vsel %vm4233_vm15, %v4158_v55, 0  ;;  %v4330_v1 = vsel %vm4233_vm15, %v4159_v61, 0  ;;  %v4376_v14 = vsel %vm4233_vm15, %v4160_v5, 0  ;;  %v3101_v23 = vpop.permute.xlu1 %3100 }
 0x7a6   : > { %v4024_v21 = vrot.slane %v4017_v43, %v9870_v8  ;;  %v4032_v48 = vrot.slane %v7195_v44, %v9870_v8  ;;  %v4040_v49 = vrot.slane %v4033_v45, %v9870_v8  ;;  %v4048_v32 = vrot.slane %v7196_v20, %v9870_v8  ;;  %7620 = vmatpush3.bf16.xpose.msra.mxu1 %v4238_v30  ;;  %v3113_v38 = vpop.permute.xlu0 %3112 }
 0x7a7   : > { %7625 = vmatprep.subr.bf16.mxu1 %v8948_v52  ;;  %v3134_v40 = vcombine.low %v3107_v33, %v3113_v38  ;;  %v3118_v41 = vcombine.low %v9828_v59, %v3101_v23 }
 0x7a8   : > { %v4049_v9 = vcombine.low %v4024_v21, %v4032_v48  ;;  %v4065_v46 = vcombine.low %v4040_v49, %v4048_v32  ;;  %v4050_v37 = vcombine.high %v4024_v21, %v4032_v48  ;;  %v4066_v58 = vcombine.high %v4040_v49, %v4048_v32 }
 0x7a9   : > { %v3104_v27 = vpop.permute.xlu1 %3103  ;;  %v3141_v43 = vrot.slane %v3134_v40, %v9870_v8  ;;  %v3125_v45 = vrot.slane %v3118_v41, %v9870_v8 }
 0x7aa   : > { %v4057_v17 = vrot.slane %v4049_v9, %v9873_v47  ;;  %v4073_v35 = vrot.slane %v4065_v46, %v9873_v47  ;;  %v4064_v63 = vrot.slane %v4050_v37, %v9873_v47  ;;  %v4080_v0 = vrot.slane %v4066_v58, %v9873_v47 }
 0x7ab   : > { %v3126_v2 = vcombine.low %v3098_v19, %v3104_v27 }
 0x7ac   : > { %v4081_v54 = vcombine.low %v4057_v17, %v4073_v35  ;;  %v4082_v60 = vcombine.high %v4057_v17, %v4073_v35  ;;  %v4083_v4 = vcombine.low %v4064_v63, %v4080_v0  ;;  %v4084_v15 = vcombine.high %v4064_v63, %v4080_v0 }
 0x7ad   : > { %v3110_v29 = vpop.permute.xlu1 %3109  ;;  %v3133_v44 = vrot.slane %v3126_v2, %v9870_v8 }
 0x7ae   : > { %v4085_v50 = vpack.c.bf16 %v4081_v54, %v4081_v54  ;;  %v4086_v62 = vpack.c.bf16 %v4082_v60, %v4082_v60  ;;  %v4087_v6 = vpack.c.bf16 %v4083_v4, %v4083_v4  ;;  %v4088_v18 = vpack.c.bf16 %v4084_v15, %v4084_v15 }
 0x7af   : > { %v3150_v30 = vcombine.low %v3125_v45, %v3133_v44  ;;  %v3151_v54 = vcombine.high %v3125_v45, %v3133_v44  ;;  %v3541_v15 = vadd.f32 %v9862_v26, %v9857_v22  ;;  %v9966_v22 = vmul.f32 0.17677669, %v9836_v7 }
 0x7b0   : > { %7622 = vmatmul.mubr.msk.bf16.vlgmr.msra.gmra.mrb[8].mxu1 %vm4233_vm15, %v4085_v50 }
 0x7b1   : > { %7626 = vmatpush3.bf16.xpose.msra.mxu1 %v4284_v57  ;;  %7627 = vmatprep.mubr.msk.bf16.mxu1 %vm8949_vm4, %v8948_v52  ;;  %v3116_v34 = vpop.permute.xlu1 %3115  ;;  %v3158_v48 = vrot.slane %v3150_v30, %v9873_v47  ;;  %v3165_v37 = vrot.slane %v3151_v54, %v9873_v47 }
 0x7b2   : > { %7631 = vmatprep.subr.bf16.mxu1 %v8948_v52  ;;  %v3142_v39 = vcombine.low %v3110_v29, %v3116_v34 }
 0x7b4   : > { %v3149_v10 = vrot.slane %v3142_v39, %v9870_v8 }
 0x7b6   : > { %v3166_v20 = vcombine.low %v3141_v43, %v3149_v10  ;;  %v3167_v51 = vcombine.high %v3141_v43, %v3149_v10 }
 0x7b8   : > { %7628 = vmatmul.mubr.msk.bf16.vlgmr.msra.gmra.mrb[12].mxu1 %vm4233_vm15, %v4086_v62  ;;  %v3174_v21 = vrot.slane %v3166_v20, %v9873_v47  ;;  %v3181_v25 = vrot.slane %v3167_v51, %v9873_v47 }
 0x7b9   : > { %7632 = vmatpush3.bf16.xpose.msra.mxu1 %v4330_v1  ;;  %7633 = vmatprep.mubr.msk.bf16.mxu1 %vm8949_vm4, %v8948_v52 }
 0x7ba   : > { %7637 = vmatprep.subr.bf16.mxu1 %v8948_v52  ;;  %v9936_v49 = vcombine.low %v3158_v48, %v3174_v21  ;;  %v9940_v17 = vcombine.high %v3158_v48, %v3174_v21  ;;  %v9946_v58 = vcombine.low %v3165_v37, %v3181_v25  ;;  %v9950_v3 = vcombine.high %v3165_v37, %v3181_v25 }
 0x7c0   : > { %7634 = vmatmul.mubr.msk.bf16.vlgmr.msra.gmra.mrb[16].mxu1 %vm4233_vm15, %v4087_v6 }
 0x7c1   : > { %7638 = vmatpush3.bf16.xpose.msra.mxu1 %v4376_v14  ;;  %7639 = vmatprep.mubr.msk.bf16.mxu1 %vm8949_vm4, %v8948_v52 }
 0x7c2   : > { %7649 = vmatprep.subr.bf16.mxu1 %v8948_v52 }
 0x7c8   : > { %7640 = vmatmul.mubr.msk.bf16.vlgmr.msra.gmra.mrb[20].mxu1 %vm4233_vm15, %v4088_v18 }
 0x7c9   : > { %7651 = vmatprep.mubr.msk.bf16.mxu1 %vm8949_vm4, %v8948_v52 }
 0x883   : > { %v4274_v32 = vpop.f32.mrb[8].mxu1 }
 0x884   : > { %v4275_v59 = vadd.f32 %v4274_v32, %v9936_v49  ;;  %v7623_v12 = vpop.f32.mrb[9].mxu1 }
 0x885   : > { %v4277_v9 = vpop.f32.mrb[10].mxu1 }
 0x886   : > { %v7624_v46 = vpop.f32.mrb[11].mxu1  ;;  %v4419_v24 = vsel %vm4418_vm0, %v4275_v59, -inf }
 0x887   : > { %4420 = vmax.xlane.f32.xlu0 %v4419_v24 }
 0x88b   : > { %v4320_v35 = vpop.f32.mrb[12].mxu1 }
 0x88c   : > { %v4321_v55 = vadd.f32 %v4320_v35, %v9940_v17  ;;  %v7629_v56 = vpop.f32.mrb[13].mxu1 }
 0x88d   : > { %v4323_v16 = vpop.f32.mrb[14].mxu1 }
 0x88e   : > { %v7630_v50 = vpop.f32.mrb[15].mxu1  ;;  %v4422_v57 = vsel %vm4418_vm0, %v4321_v55, -inf }
 0x88f   : > { %4423 = vmax.xlane.f32.xlu1 %v4422_v57 }
 0x893   : > { %v4366_v60 = vpop.f32.mrb[16].mxu1 }
 0x894   : > { %v4367_v61 = vadd.f32 %v4366_v60, %v9946_v58  ;;  %v7635_v62 = vpop.f32.mrb[17].mxu1 }
 0x895   : > { %v4369_v63 = vpop.f32.mrb[18].mxu1 }
 0x896   : > { %v7636_v0 = vpop.f32.mrb[19].mxu1  ;;  %v4425_v1 = vsel %vm4418_vm0, %v4367_v61, -inf }
 0x897   : > { %4426 = vmax.xlane.f32.xlu0 %v4425_v1 }
 0x89b   : > { %v4412_v4 = vpop.f32.mrb[20].mxu1 }
 0x89c   : > { %v4413_v5 = vadd.f32 %v4412_v4, %v9950_v3  ;;  %v7641_v6 = vpop.f32.mrb[21].mxu1 }
 0x89d   : > { %v4415_v14 = vpop.f32.mrb[22].mxu1 }
 0x89e   : > { %v7642_v18 = vpop.f32.mrb[23].mxu1  ;;  %v4428_v19 = vsel %vm4418_vm0, %v4413_v5, -inf }
 0x89f   : > { %4429 = vmax.xlane.f32.xlu0 %v4428_v19 }
 0x8a0   : > { %3863 = vrot.lane.b32.xlu1 %v3541_v15, %s8951_s10 }
 0x8a4   : > { %3875 = vrot.lane.b32.xlu1 %v3541_v15, %s8950_s25 }
 0x8a8   : > { %3715 = vrot.lane.b32.xlu1 %v9838_v11, %s8952_s3 }
 0x8ac   : > { %3721 = vrot.lane.b32.xlu1 %v9838_v11, %s8950_s25 }
 0x8b5   : > { %3869 = vrot.lane.b32.xlu0 %v3541_v15, %s8952_s3 }
 0x8b9   : > { %3709 = vrot.lane.b32.xlu0 %v9838_v11, %s8951_s10 }
 0x8bd   : > { %3553 = vrot.lane.b32.xlu0 %v9966_v22, %s8951_s10 }
 0x914   : > { %v4421_v26 = vpop.xlane.xlu0 %4420 }
 0x915   : > { %v4431_v23 = vsub.f32 %v4275_v59, %v4421_v26 }
 0x917   : > { %v4435_v27 = vmul.f32 1.442695, %v4431_v23 }
 0x919   : > { %8328 = vpow2.f32 %v4435_v27 }
 0x91c   : > { %v4424_v29 = vpop.xlane.xlu1 %4423 }
 0x91d   : > { %v4432_v33 = vsub.f32 %v4321_v55, %v4424_v29 }
 0x91f   : > { %v4437_v34 = vmul.f32 1.442695, %v4432_v33 }
 0x920   : > { %v3864_v7 = vpop.permute.xlu1 %3863 }
 0x921   : > { %8330 = vpow2.f32 %v4437_v34 }
 0x923   : > { %v9970_v38 = vpop.eup %8328 }
 0x924   : > { %v4427_v39 = vpop.xlane.xlu0 %4426  ;;  %v4443_v40 = vsel %vm4418_vm0, %v9970_v38, 0.0  ;;  %v3876_v43 = vpop.permute.xlu1 %3875 }
 0x925   : > { %v4433_v2 = vsub.f32 %v4367_v61, %v4427_v39  ;;  %4444 = vadd.xlane.f32.xlu1 %v4443_v40  ;;  %v3897_v30 = vcombine.low %v3864_v7, %v3876_v43  ;;  %v3898_v21 = vcombine.high %v3864_v7, %v3876_v43 }
 0x927   : > { %v4439_v41 = vmul.f32 1.442695, %v4433_v2  ;;  %v3905_v46 = vrot.slane %v3897_v30, %v9870_v8  ;;  %v3912_v24 = vrot.slane %v3898_v21, %v9870_v8 }
 0x929   : > { %8332 = vpow2.f32 %v4439_v41 }
 0x92b   : > { %v9974_v10 = vpop.eup %8330 }
 0x92c   : > { %v4430_v44 = vpop.xlane.xlu0 %4429  ;;  %v4446_v45 = vsel %vm4418_vm0, %v9974_v10, 0.0 }
 0x92d   : > { %v4434_v20 = vsub.f32 %v4413_v5, %v4430_v44  ;;  %4447 = vadd.xlane.f32.xlu0 %v4446_v45 }
 0x92f   : > { %v4441_v48 = vmul.f32 1.442695, %v4434_v20  ;;  %v3716_v20 = vpop.permute.xlu1 %3715 }
 0x930   : > { %v3870_v32 = vpop.permute.xlu0 %3869 }
 0x931   : > { %8334 = vpow2.f32 %v4441_v48  ;;  %v3881_v59 = vcombine.low %v3541_v15, %v3870_v32  ;;  %v3882_v12 = vcombine.high %v3541_v15, %v3870_v32 }
 0x933   : > { %v9978_v9 = vpop.eup %8332  ;;  %v3889_v51 = vrot.slane %v3881_v59, %v9870_v8  ;;  %v3896_v35 = vrot.slane %v3882_v12, %v9870_v8  ;;  %v3722_v21 = vpop.permute.xlu1 %3721  ;;  %v3793_v59 = vcombine.low %v9838_v11, %v3716_v20  ;;  %v3794_v12 = vcombine.high %v9838_v11, %v3716_v20 }
 0x934   : > { %v4449_v54 = vsel %vm4418_vm0, %v9978_v9, 0.0  ;;  %v3710_v30 = vpop.permute.xlu0 %3709 }
 0x935   : > { %v3913_v55 = vcombine.low %v3889_v51, %v3905_v46  ;;  %v3914_v56 = vcombine.high %v3889_v51, %v3905_v46  ;;  %v3929_v16 = vcombine.low %v3896_v35, %v3912_v24  ;;  %v3930_v50 = vcombine.high %v3896_v35, %v3912_v24  ;;  %4450 = vadd.xlane.f32.xlu1 %v4449_v54 }
 0x936   : > { %v3809_v48 = vcombine.low %v3710_v30, %v3722_v21  ;;  %v3810_v32 = vcombine.high %v3710_v30, %v3722_v21  ;;  %v3801_v51 = vrot.slane %v3793_v59, %v9870_v8  ;;  %v3808_v35 = vrot.slane %v3794_v12, %v9870_v8 }
 0x937   : > { %v3921_v57 = vrot.slane %v3913_v55, %v9873_v47  ;;  %v3928_v25 = vrot.slane %v3914_v56, %v9873_v47  ;;  %v3937_v37 = vrot.slane %v3929_v16, %v9873_v47  ;;  %v3944_v60 = vrot.slane %v3930_v50, %v9873_v47 }
 0x938   : > { %v3817_v46 = vrot.slane %v3809_v48, %v9870_v8  ;;  %v3824_v24 = vrot.slane %v3810_v32, %v9870_v8 }
 0x939   : > { %v4161_v61 = vcombine.low %v3921_v57, %v3928_v25  ;;  %v7199_v62 = vcombine.high %v3921_v57, %v3928_v25  ;;  %v4177_v63 = vcombine.low %v3937_v37, %v3944_v60  ;;  %v7200_v0 = vcombine.high %v3937_v37, %v3944_v60  ;;  %v3554_v60 = vpop.permute.xlu0 %3553 }
 0x93a   : > { %v3825_v54 = vcombine.low %v3801_v51, %v3817_v46  ;;  %v3826_v55 = vcombine.high %v3801_v51, %v3817_v46  ;;  %v3841_v56 = vcombine.low %v3808_v35, %v3824_v24  ;;  %v3842_v16 = vcombine.high %v3808_v35, %v3824_v24 }
 0x93b   : > { %v9990_v1 = vpop.eup %8334  ;;  %v4168_v4 = vrot.slane %v4161_v61, %v9870_v8  ;;  %v4176_v5 = vrot.slane %v7199_v62, %v9870_v8  ;;  %v4184_v6 = vrot.slane %v4177_v63, %v9870_v8  ;;  %v4192_v14 = vrot.slane %v7200_v0, %v9870_v8 }
 0x93c   : > { %v4452_v15 = vsel %vm4418_vm0, %v9990_v1, 0.0  ;;  %v3833_v57 = vrot.slane %v3825_v54, %v9873_v47  ;;  %v3840_v25 = vrot.slane %v3826_v55, %v9873_v47  ;;  %v3849_v11 = vrot.slane %v3841_v56, %v9873_v47 }
 0x93d   : > { %v4193_v18 = vcombine.low %v4168_v4, %v4176_v5  ;;  %v4209_v19 = vcombine.low %v4184_v6, %v4192_v14  ;;  %v4194_v26 = vcombine.high %v4168_v4, %v4176_v5  ;;  %4453 = vadd.xlane.f32.xlu0 %v4452_v15  ;;  %v4210_v33 = vcombine.high %v4184_v6, %v4192_v14 }
 0x93e   : > { %v3856_v37 = vrot.slane %v3842_v16, %v9873_v47  ;;  %v4877_v61 = vcombine.low %v3833_v57, %v3840_v25  ;;  %v7213_v62 = vcombine.high %v3833_v57, %v3840_v25 }
 0x93f   : > { %v4201_v23 = vrot.slane %v4193_v18, %v9873_v47  ;;  %v4217_v27 = vrot.slane %v4209_v19, %v9873_v47  ;;  %v4208_v29 = vrot.slane %v4194_v26, %v9873_v47  ;;  %v4224_v40 = vrot.slane %v4210_v33, %v9873_v47 }
 0x940   : > { %v4893_v63 = vcombine.low %v3849_v11, %v3856_v37  ;;  %v7214_v0 = vcombine.high %v3849_v11, %v3856_v37  ;;  %v10023_v6 = vrot.slane %v4877_v61, %v9870_v8  ;;  %v10026_v14 = vrot.slane %v7213_v62, %v9870_v8 }
 0x941   : > { %v4225_v34 = vcombine.low %v4201_v23, %v4217_v27  ;;  %v4226_v39 = vcombine.high %v4201_v23, %v4217_v27  ;;  %v4227_v41 = vcombine.low %v4208_v29, %v4224_v40  ;;  %v10002_v43 = vcombine.high %v4208_v29, %v4224_v40 }
 0x942   : > { %v10029_v15 = vrot.slane %v4893_v63, %v9870_v8  ;;  %v4908_v18 = vrot.slane %v7214_v0, %v9870_v8  ;;  %v4909_v27 = vcombine.low %v10023_v6, %v10026_v14 }
 0x943   : > { %v4229_v2 = vpack.c.bf16 %v4225_v34, %v4225_v34  ;;  %v4230_v7 = vpack.c.bf16 %v4226_v39, %v4226_v39  ;;  %v4231_v26 = vpack.c.bf16 %v4227_v41, %v4227_v41 }
 0x944   : > { %v4925_v29 = vcombine.low %v10029_v15, %v4908_v18  ;;  %v4917_v39 = vrot.slane %v4909_v27, %v9873_v47  ;;  %v4926_v16 = vcombine.high %v10029_v15, %v4908_v18 }
 0x945   : > { %v4472_v44 = vsel %vm4470_vm1, %v4229_v2, 0  ;;  %v4518_v45 = vsel %vm4470_vm1, %v4230_v7, 0  ;;  %v4564_v34 = vsel %vm4470_vm1, %v4231_v26, 0  ;;  %v4232_v7 = vpack.c.bf16 %v10002_v43, %v10002_v43 }
 0x946   : > { %3559 = vrot.lane.b32.xlu1 %v9966_v22, %s8952_s3  ;;  %7644 = vmatpush3.bf16.msra.mxu0 %v4472_v44  ;;  %v4933_v40 = vrot.slane %v4925_v29, %v9873_v47 }
 0x947   : > { %7650 = vmatpush3.bf16.msra.mxu1 %v4518_v45  ;;  %7655 = vmatprep.subr.bf16.mxu0 %v8948_v52  ;;  %v4610_v45 = vsel %vm4470_vm1, %v4232_v7, 0 }
 0x948   : > { %7661 = vmatprep.subr.bf16.mxu1 %v8948_v52  ;;  %v4941_v44 = vcombine.low %v4917_v39, %v4933_v40 }
 0x953   : > { %3565 = vrot.lane.b32.xlu0 %v9966_v22, %s8950_s25 }
 0x9b2   : > { %v4445_v50 = vpop.xlane.xlu1 %4444 }
 0x9b3   : > { %8336 = vrcp.f32 %v4445_v50 }
 0x9ba   : > { %v4448_v4 = vpop.xlane.xlu0 %4447 }
 0x9bb   : > { %8338 = vrcp.f32 %v4448_v4 }
 0x9bd   : > { %v8337_v5 = vpop.eup %8336 }
 0x9be   : > { %v4459_v19 = vmul.f32 %v8337_v5, %v9970_v38 }
 0x9c0   : > { %v4463_v23 = vpack.c.bf16 %v4459_v19, %v4459_v19 }
 0x9c2   : > { %v4451_v33 = vpop.xlane.xlu1 %4450  ;;  %7646 = vmatmul.mubr.msk.bf16.vlgmr.msra.gmra.mrb[8].mxu0 %vm4418_vm0, %v4463_v23 }
 0x9c3   : > { %8340 = vrcp.f32 %v4451_v33  ;;  %7656 = vmatpush3.bf16.msra.mxu0 %v4564_v34  ;;  %7657 = vmatprep.mubr.msk.bf16.mxu0 %vm8949_vm4, %v8948_v52 }
 0x9c4   : > { %7667 = vmatprep.subr.bf16.mxu0 %v8948_v52 }
 0x9c5   : > { %v8339_v38 = vpop.eup %8338 }
 0x9c6   : > { %v4460_v2 = vmul.f32 %v8339_v38, %v9974_v10  ;;  %v3560_v20 = vpop.permute.xlu1 %3559  ;;  %v4945_v10 = vpack.c.bf16 %v4941_v44, %v4941_v44 }
 0x9c7   : > { %v3637_v43 = vcombine.low %v9966_v22, %v3560_v20  ;;  %v3638_v32 = vcombine.high %v9966_v22, %v3560_v20  ;;  %v4910_v22 = vcombine.high %v10023_v6, %v10026_v14  ;;  %v4940_v6 = vrot.slane %v4926_v16, %v9873_v47 }
 0x9c8   : > { %v4464_v41 = vpack.c.bf16 %v4460_v2, %v4460_v2  ;;  %v5025_v51 = vsel %vm4233_vm15, %v4945_v10, 0 }
 0x9c9   : > { %v3645_v35 = vrot.slane %v3637_v43, %v9870_v8  ;;  %v3652_v54 = vrot.slane %v3638_v32, %v9870_v8  ;;  %v4924_v5 = vrot.slane %v4910_v22, %v9873_v47 }
 0x9ca   : > { %7652 = vmatmul.mubr.msk.bf16.vlgmr.msra.gmra.mrb[24].mxu1 %vm4418_vm0, %v4464_v41  ;;  %v4454_v30 = vpop.xlane.xlu0 %4453 }
 0x9cb   : > { %7662 = vmatpush3.bf16.msra.mxu1 %v4610_v45  ;;  %7663 = vmatprep.mubr.msk.bf16.mxu1 %vm8949_vm4, %v8948_v52  ;;  %8342 = vrcp.f32 %v4454_v30 }
 0x9cc   : > { %7673 = vmatprep.subr.bf16.mxu1 %v8948_v52 }
 0x9cd   : > { %v8341_v21 = vpop.eup %8340 }
 0x9ce   : > { %v4461_v48 = vmul.f32 %v8341_v21, %v9978_v9  ;;  %v3566_v59 = vpop.permute.xlu0 %3565  ;;  %v4942_v9 = vcombine.high %v4917_v39, %v4933_v40  ;;  %v4943_v39 = vcombine.low %v4924_v5, %v4940_v6  ;;  %v4944_v40 = vcombine.high %v4924_v5, %v4940_v6 }
 0x9cf   : > { %v3653_v12 = vcombine.low %v3554_v60, %v3566_v59  ;;  %v3654_v46 = vcombine.high %v3554_v60, %v3566_v59 }
 0x9d0   : > { %v4465_v24 = vpack.c.bf16 %v4461_v48, %v4461_v48  ;;  %v4946_v4 = vpack.c.bf16 %v4942_v9, %v4942_v9  ;;  %v4947_v30 = vpack.c.bf16 %v4943_v39, %v4943_v39  ;;  %v4948_v21 = vpack.c.bf16 %v4944_v40, %v4944_v40 }
 0x9d1   : > { %v3661_v55 = vrot.slane %v3653_v12, %v9870_v8  ;;  %v3668_v56 = vrot.slane %v3654_v46, %v9870_v8 }
 0x9d2   : > { %7658 = vmatmul.mubr.msk.bf16.vlgmr.msra.gmra.mrb[12].mxu0 %vm4418_vm0, %v4465_v24  ;;  %v5117_v59 = vsel %vm4233_vm15, %v4947_v30, 0  ;;  %v5163_v12 = vsel %vm4233_vm15, %v4948_v21, 0 }
 0x9d3   : > { %7668 = vmatpush3.bf16.xpose.msra.mxu0 %v5025_v51  ;;  %7669 = vmatprep.mubr.msk.bf16.mxu0 %vm8949_vm4, %v8948_v52  ;;  %v3669_v50 = vcombine.low %v3645_v35, %v3661_v55  ;;  %v3670_v57 = vcombine.high %v3645_v35, %v3661_v55  ;;  %v3685_v25 = vcombine.low %v3652_v54, %v3668_v56 }
 0x9d4   : > { %v3686_v11 = vcombine.high %v3652_v54, %v3668_v56  ;;  %7679 = vmatprep.subr.bf16.mxu0 %v8948_v52 }
 0x9d5   : > { %v8343_v37 = vpop.eup %8342  ;;  %v3677_v60 = vrot.slane %v3669_v50, %v9873_v47  ;;  %v3684_v61 = vrot.slane %v3670_v57, %v9873_v47  ;;  %v3693_v62 = vrot.slane %v3685_v25, %v9873_v47 }
 0x9d6   : > { %v3700_v63 = vrot.slane %v3686_v11, %v9873_v47  ;;  %v4462_v0 = vmul.f32 %v8343_v37, %v9990_v1  ;;  %v5071_v1 = vsel %vm4233_vm15, %v4946_v4, 0 }
 0x9d7   : > { %v4805_v14 = vcombine.low %v3677_v60, %v3684_v61  ;;  %v7211_v15 = vcombine.high %v3677_v60, %v3684_v61 }
 0x9d8   : > { %v4821_v18 = vcombine.low %v3693_v62, %v3700_v63  ;;  %v7212_v19 = vcombine.high %v3693_v62, %v3700_v63  ;;  %v4466_v26 = vpack.c.bf16 %v4462_v0, %v4462_v0 }
 0x9d9   : > { %v4812_v23 = vrot.slane %v4805_v14, %v9870_v8  ;;  %v4820_v27 = vrot.slane %v7211_v15, %v9870_v8 }
 0x9da   : > { %v4828_v29 = vrot.slane %v4821_v18, %v9870_v8  ;;  %v4836_v33 = vrot.slane %v7212_v19, %v9870_v8  ;;  %7664 = vmatmul.mubr.msk.bf16.vlgmr.msra.gmra.mrb[28].mxu1 %vm4418_vm0, %v4466_v26 }
 0x9db   : > { %v4837_v34 = vcombine.low %v4812_v23, %v4820_v27  ;;  %7674 = vmatpush3.bf16.xpose.msra.mxu1 %v5071_v1  ;;  %7675 = vmatprep.mubr.msk.bf16.mxu1 %vm8949_vm4, %v8948_v52  ;;  %v4838_v2 = vcombine.high %v4812_v23, %v4820_v27 }
 0x9dc   : > { %v4853_v38 = vcombine.low %v4828_v29, %v4836_v33  ;;  %7685 = vmatprep.subr.bf16.mxu1 %v8948_v52  ;;  %v4854_v7 = vcombine.high %v4828_v29, %v4836_v33 }
 0x9dd   : > { %v4845_v41 = vrot.slane %v4837_v34, %v9873_v47  ;;  %v4852_v43 = vrot.slane %v4838_v2, %v9873_v47 }
 0x9de   : > { %v4861_v44 = vrot.slane %v4853_v38, %v9873_v47  ;;  %v4868_v32 = vrot.slane %v4854_v7, %v9873_v47 }
 0x9e0   : > { %v4869_v45 = vcombine.low %v4845_v41, %v4861_v44  ;;  %v4870_v20 = vcombine.high %v4845_v41, %v4861_v44  ;;  %v4871_v46 = vcombine.low %v4852_v43, %v4868_v32  ;;  %v4872_v24 = vcombine.high %v4852_v43, %v4868_v32 }
 0x9e2   : > { %v4873_v10 = vpack.c.bf16 %v4869_v45, %v4869_v45  ;;  %v4874_v48 = vpack.c.bf16 %v4870_v20, %v4870_v20  ;;  %v4875_v51 = vpack.c.bf16 %v4871_v46, %v4871_v46  ;;  %v4876_v35 = vpack.c.bf16 %v4872_v24, %v4872_v24 }
 0x9e4   : > { %7670 = vmatmul.mubr.msk.bf16.vlgmr.msra.gmra.mrb[16].mxu0 %vm4233_vm15, %v4873_v10  ;;  %7676 = vmatmul.mubr.msk.bf16.vlgmr.msra.gmra.mrb[32].mxu1 %vm4233_vm15, %v4874_v48 }
 0x9e5   : > { %7680 = vmatpush3.bf16.xpose.msra.mxu0 %v5117_v59  ;;  %7686 = vmatpush3.bf16.xpose.msra.mxu1 %v5163_v12 }
 0x9e6   : > { %7681 = vmatprep.mubr.msk.bf16.mxu0 %vm8949_vm4, %v8948_v52  ;;  %7687 = vmatprep.mubr.msk.bf16.mxu1 %vm8949_vm4, %v8948_v52 }
 0x9e7   : > { %7691 = vmatprep.subr.bf16.mxu0 %v8948_v52  ;;  %7697 = vmatprep.subr.bf16.mxu1 %v8948_v52 }
 0x9ec   : > { %7682 = vmatmul.mubr.msk.bf16.vlgmr.msra.gmra.mrb[20].mxu0 %vm4233_vm15, %v4875_v51  ;;  %7688 = vmatmul.mubr.msk.bf16.vlgmr.msra.gmra.mrb[36].mxu1 %vm4233_vm15, %v4876_v35 }
 0x9ed   : > { %7693 = vmatprep.mubr.msk.bf16.mxu0 %vm8949_vm4, %v8948_v52  ;;  %7699 = vmatprep.mubr.msk.bf16.mxu1 %vm8949_vm4, %v8948_v52 }
 0xa95   : > { %v4508_v54 = vpop.f32.mrb[8].mxu0 }
 0xa96   : > { %v7647_v55 = vpop.f32.mrb[9].mxu0 }
 0xa97   : > { %v4511_v56 = vpop.f32.mrb[10].mxu0 }
 0xa98   : > { %v7648_v9 = vpop.f32.mrb[11].mxu0 }
 0xa9d   : > { %v4554_v22 = vpop.f32.mrb[24].mxu1 }
 0xa9e   : > { %v7653_v16 = vpop.f32.mrb[25].mxu1 }
 0xa9f   : > { %v4557_v50 = vpop.f32.mrb[26].mxu1 }
 0xaa0   : > { %v7654_v57 = vpop.f32.mrb[27].mxu1 }
 0xaa5   : > { %v4600_v25 = vpop.f32.mrb[12].mxu0 }
 0xaa6   : > { %v4652_v11 = vcombine.low %v4508_v54, %v4600_v25  ;;  %v4653_v37 = vcombine.high %v4508_v54, %v4600_v25  ;;  %v7659_v60 = vpop.f32.mrb[13].mxu0 }
 0xaa7   : > { %v4603_v61 = vpop.f32.mrb[14].mxu0 }
 0xaa8   : > { %v7660_v62 = vpop.f32.mrb[15].mxu0  ;;  %v4660_v14 = vrot.slane %v4652_v11, %v9870_v8  ;;  %v4667_v15 = vrot.slane %v4653_v37, %v9870_v8 }
 0xaad   : > { %v4646_v63 = vpop.f32.mrb[28].mxu1 }
 0xaae   : > { %v4668_v0 = vcombine.low %v4554_v22, %v4646_v63  ;;  %v4669_v4 = vcombine.high %v4554_v22, %v4646_v63  ;;  %v7665_v5 = vpop.f32.mrb[29].mxu1 }
 0xaaf   : > { %v4649_v6 = vpop.f32.mrb[30].mxu1 }
 0xab0   : > { %v4676_v18 = vrot.slane %v4668_v0, %v9870_v8  ;;  %v4683_v19 = vrot.slane %v4669_v4, %v9870_v8  ;;  %v7666_v26 = vpop.f32.mrb[31].mxu1 }
 0xab2   : > { %v4684_v23 = vcombine.low %v4660_v14, %v4676_v18  ;;  %v4685_v27 = vcombine.high %v4660_v14, %v4676_v18  ;;  %v4700_v29 = vcombine.low %v4667_v15, %v4683_v19  ;;  %v4701_v33 = vcombine.high %v4667_v15, %v4683_v19 }
 0xab4   : > { %v4692_v1 = vrot.slane %v4684_v23, %v9873_v47  ;;  %v4699_v34 = vrot.slane %v4685_v27, %v9873_v47  ;;  %v4708_v38 = vrot.slane %v4700_v29, %v9873_v47  ;;  %v4715_v39 = vrot.slane %v4701_v33, %v9873_v47 }
 0xab6   : > { %v4720_v40 = vcombine.low %v4692_v1, %v4699_v34  ;;  %v7209_v2 = vcombine.high %v4692_v1, %v4699_v34  ;;  %v4736_v7 = vcombine.low %v4708_v38, %v4715_v39  ;;  %v7210_v41 = vcombine.high %v4708_v38, %v4715_v39 }
 0xab7   : > { %v5061_v44 = vpop.f32.mrb[16].mxu0  ;;  %v5107_v45 = vpop.f32.mrb[32].mxu1 }
 0xab8   : > { %v5062_v20 = vadd.f32 %v5061_v44, %v9936_v49  ;;  %v5108_v30 = vadd.f32 %v5107_v45, %v9940_v17  ;;  %v7671_v21 = vpop.f32.mrb[17].mxu0  ;;  %v7677_v10 = vpop.f32.mrb[33].mxu1  ;;  %v4727_v48 = vrot.slane %v4720_v40, %v9870_v8  ;;  %v4735_v43 = vrot.slane %v7209_v2, %v9870_v8 }
 0xab9   : > { %v4743_v32 = vrot.slane %v4736_v7, %v9870_v8  ;;  %v4751_v59 = vrot.slane %v7210_v41, %v9870_v8  ;;  %v5064_v12 = vpop.f32.mrb[18].mxu0  ;;  %v5110_v46 = vpop.f32.mrb[34].mxu1 }
 0xaba   : > { %v7672_v24 = vpop.f32.mrb[19].mxu0  ;;  %v7678_v51 = vpop.f32.mrb[35].mxu1  ;;  %v5205_v35 = vsel %vm4418_vm0, %v5062_v20, -inf  ;;  %v5208_v49 = vsel %vm4418_vm0, %v5108_v30, -inf  ;;  %v4753_v17 = vcombine.high %v4727_v48, %v4735_v43  ;;  %v4752_v55 = vcombine.low %v4727_v48, %v4735_v43 }
 0xabb   : > { %5206 = vmax.xlane.f32.xlu1 %v5205_v35  ;;  %5209 = vmax.xlane.f32.xlu0 %v5208_v49  ;;  %v4769_v54 = vcombine.high %v4743_v32, %v4751_v59  ;;  %v4768_v56 = vcombine.low %v4743_v32, %v4751_v59 }
 0xabc   : > { %v10119_v9 = vrot.slane %v4753_v17, %v9873_v47  ;;  %v10125_v16 = vrot.slane %v4752_v55, %v9873_v47 }
 0xabd   : > { %v10122_v22 = vrot.slane %v4769_v54, %v9873_v47  ;;  %v10128_v50 = vrot.slane %v4768_v56, %v9873_v47 }
 0xabf   : > { %v5153_v57 = vpop.f32.mrb[20].mxu0  ;;  %v5199_v25 = vpop.f32.mrb[36].mxu1  ;;  %v4786_v11 = vcombine.low %v10119_v9, %v10122_v22  ;;  %v4787_v37 = vcombine.high %v10119_v9, %v10122_v22  ;;  %v4784_v0 = vcombine.low %v10125_v16, %v10128_v50  ;;  %v4785_v4 = vcombine.high %v10125_v16, %v10128_v50  ;;  %v8244_v50 = vld [vmem:[%s9571_s29] ss:$16 sps:$4 sm:$0xff]  }
 0xac0   : > { %v5154_v60 = vadd.f32 %v5153_v57, %v9946_v58  ;;  %v5200_v61 = vadd.f32 %v5199_v25, %v9950_v3  ;;  %v7683_v62 = vpop.f32.mrb[21].mxu0  ;;  %v7689_v63 = vpop.f32.mrb[37].mxu1 }
 0xac1   : > { %v5156_v5 = vpop.f32.mrb[22].mxu0  ;;  %v5202_v6 = vpop.f32.mrb[38].mxu1 }
 0xac2   : > { %v7684_v14 = vpop.f32.mrb[23].mxu0  ;;  %v7690_v15 = vpop.f32.mrb[39].mxu1  ;;  %v5211_v18 = vsel %vm4418_vm0, %v5154_v60, -inf  ;;  %v5214_v19 = vsel %vm4418_vm0, %v5200_v61, -inf }
 0xac3   : > { %5212 = vmax.xlane.f32.xlu0 %v5211_v18  ;;  %5215 = vmax.xlane.f32.xlu1 %v5214_v19 }
 0xad4   : > { %3871 = vrot.lane.b32.xlu1 %v9865_v28, %s8952_s3 }
 0xb48   : > { %v5207_v58 = vpop.xlane.xlu1 %5206  ;;  %v5210_v3 = vpop.xlane.xlu0 %5209 }
 0xb49   : > { %v5217_v26 = vsub.f32 %v5062_v20, %v5207_v58  ;;  %v5218_v23 = vsub.f32 %v5108_v30, %v5210_v3 }
 0xb4b   : > { %v5221_v27 = vmul.f32 1.442695, %v5217_v26  ;;  %v5223_v29 = vmul.f32 1.442695, %v5218_v23 }
 0xb4d   : > { %8344 = vpow2.f32 %v5221_v27 }
 0xb4e   : > { %8346 = vpow2.f32 %v5223_v29 }
 0xb50   : > { %v5213_v39 = vpop.xlane.xlu0 %5212  ;;  %v5216_v40 = vpop.xlane.xlu1 %5215 }
 0xb51   : > { %v5219_v2 = vsub.f32 %v5154_v60, %v5213_v39  ;;  %v5220_v7 = vsub.f32 %v5200_v61, %v5216_v40 }
 0xb53   : > { %v5225_v41 = vmul.f32 1.442695, %v5219_v2  ;;  %v5227_v44 = vmul.f32 1.442695, %v5220_v7 }
 0xb54   : > { %v3872_v10 = vpop.permute.xlu1 %3871 }
 0xb55   : > { %8348 = vpow2.f32 %v5225_v41  ;;  %v3949_v32 = vcombine.low %v9865_v28, %v3872_v10  ;;  %v3950_v59 = vcombine.high %v9865_v28, %v3872_v10 }
 0xb56   : > { %8350 = vpow2.f32 %v5227_v44 }
 0xb57   : > { %v10144_v33 = vpop.eup %8344  ;;  %v3957_v35 = vrot.slane %v3949_v32, %v9870_v8  ;;  %v3964_v49 = vrot.slane %v3950_v59, %v9870_v8 }
 0xb58   : > { %v10146_v1 = vpop.eup %8346  ;;  %v5229_v34 = vsel %vm4418_vm0, %v10144_v33, 0.0 }
 0xb59   : > { %5230 = vadd.xlane.f32.xlu0 %v5229_v34  ;;  %v5232_v38 = vsel %vm4418_vm0, %v10146_v1, 0.0 }
 0xb5a   : > { %5233 = vadd.xlane.f32.xlu1 %v5232_v38 }
 0xb5f   : > { %v10156_v45 = vpop.eup %8348 }
 0xb60   : > { %v10158_v20 = vpop.eup %8350  ;;  %v5235_v30 = vsel %vm4418_vm0, %v10156_v45, 0.0 }
 0xb61   : > { %v5238_v21 = vsel %vm4418_vm0, %v10158_v20, 0.0 }
 0xb6b   : > { %3877 = vrot.lane.b32.xlu1 %v9865_v28, %s8950_s25 }
 0xb6f   : > { %3865 = vrot.lane.b32.xlu0 %v9865_v28, %s8951_s10 }
 0xb8e   : > { %5236 = vadd.xlane.f32.xlu0 %v5235_v30 }
 0xb8f   : > { %5239 = vadd.xlane.f32.xlu1 %v5238_v21 }
 0xbe6   : > { %v5231_v48 = vpop.xlane.xlu0 %5230 }
 0xbe7   : > { %v5234_v43 = vpop.xlane.xlu1 %5233  ;;  %8352 = vrcp.f32 %v5231_v48 }
 0xbe8   : > { %8354 = vrcp.f32 %v5234_v43 }
 0xbea   : > { %v3866_v12 = vpop.permute.xlu0 %3865 }
 0xbeb   : > { %v3878_v46 = vpop.permute.xlu1 %3877 }
 0xbec   : > { %v3965_v24 = vcombine.low %v3866_v12, %v3878_v46  ;;  %v3966_v51 = vcombine.high %v3866_v12, %v3878_v46 }
 0xbee   : > { %v3973_v17 = vrot.slane %v3965_v24, %v9870_v8  ;;  %v3980_v54 = vrot.slane %v3966_v51, %v9870_v8 }
 0xbf0   : > { %v3981_v55 = vcombine.low %v3957_v35, %v3973_v17  ;;  %v3982_v56 = vcombine.high %v3957_v35, %v3973_v17  ;;  %v3997_v57 = vcombine.low %v3964_v49, %v3980_v54  ;;  %v3998_v25 = vcombine.high %v3964_v49, %v3980_v54 }
 0xbf1   : > { %v8353_v38 = vpop.eup %8352 }
 0xbf2   : > { %v3989_v28 = vrot.slane %v3981_v55, %v9873_v47  ;;  %v3996_v60 = vrot.slane %v3982_v56, %v9873_v47  ;;  %v4005_v61 = vrot.slane %v3997_v57, %v9873_v47  ;;  %v4012_v62 = vrot.slane %v3998_v25, %v9873_v47  ;;  %v8355_v2 = vpop.eup %8354 }
 0xbf3   : > { %v5245_v21 = vmul.f32 %v8353_v38, %v10144_v33  ;;  %v5246_v10 = vmul.f32 %v8355_v2, %v10146_v1 }
 0xbf4   : > { %v4949_v63 = vcombine.low %v3989_v28, %v3996_v60  ;;  %v7215_v5 = vcombine.high %v3989_v28, %v3996_v60  ;;  %v4965_v6 = vcombine.low %v4005_v61, %v4012_v62  ;;  %v7216_v14 = vcombine.high %v4005_v61, %v4012_v62  ;;  %v8236_v28 = vld [vmem:[%s9569_s27] sm:$0xff]   ;;  %v8237_v60 = vld [vmem:[%s9569_s27 + $0x8] sm:$0xff]  }
 0xbf5   : > { %v5249_v24 = vpack.c.bf16 %v5245_v21, %v5245_v21  ;;  %v5250_v51 = vpack.c.bf16 %v5246_v10, %v5246_v10  ;;  %v8240_v61 = vld [vmem:[%s9569_s27 + $0x20] sm:$0xff]   ;;  %v8241_v62 = vld [vmem:[%s9569_s27 + $0x28] sm:$0xff]  }
 0xbf6   : > { %v4956_v15 = vrot.slane %v4949_v63, %v9870_v8  ;;  %v4964_v18 = vrot.slane %v7215_v5, %v9870_v8  ;;  %v4972_v19 = vrot.slane %v4965_v6, %v9870_v8  ;;  %v4980_v58 = vrot.slane %v7216_v14, %v9870_v8 }
 0xbf8   : > { %v4981_v3 = vcombine.low %v4956_v15, %v4964_v18  ;;  %v4982_v26 = vcombine.high %v4956_v15, %v4964_v18  ;;  %v4997_v23 = vcombine.low %v4972_v19, %v4980_v58  ;;  %v4998_v27 = vcombine.high %v4972_v19, %v4980_v58 }
 0xbfa   : > { %v4989_v29 = vrot.slane %v4981_v3, %v9873_v47  ;;  %v4996_v34 = vrot.slane %v4982_v26, %v9873_v47  ;;  %v5005_v39 = vrot.slane %v4997_v23, %v9873_v47  ;;  %v5012_v40 = vrot.slane %v4998_v27, %v9873_v47 }
 0xbfc   : > { %v5013_v7 = vcombine.low %v4989_v29, %v5005_v39  ;;  %v5014_v41 = vcombine.high %v4989_v29, %v5005_v39  ;;  %v5015_v44 = vcombine.low %v4996_v34, %v5012_v40  ;;  %v5016_v30 = vcombine.high %v4996_v34, %v5012_v40 }
 0xbfe   : > { %v5017_v48 = vpack.c.bf16 %v5013_v7, %v5013_v7  ;;  %v5018_v43 = vpack.c.bf16 %v5014_v41, %v5014_v41  ;;  %v5019_v12 = vpack.c.bf16 %v5015_v44, %v5015_v44  ;;  %v5020_v46 = vpack.c.bf16 %v5016_v30, %v5016_v30 }
 0xc00   : > { %v5257_v32 = vsel %vm4470_vm1, %v5017_v48, 0  ;;  %v5303_v59 = vsel %vm4470_vm1, %v5018_v43, 0  ;;  %v5349_v33 = vsel %vm4470_vm1, %v5019_v12, 0  ;;  %v5395_v1 = vsel %vm4470_vm1, %v5020_v46, 0 }
 0xc01   : > { %7692 = vmatpush3.bf16.msra.mxu0 %v5257_v32  ;;  %7698 = vmatpush3.bf16.msra.mxu1 %v5303_v59 }
 0xc02   : > { %7703 = vmatprep.subr.bf16.mxu0 %v8948_v52  ;;  %7709 = vmatprep.subr.bf16.mxu1 %v8948_v52 }
 0xc04   : > { %7694 = vmatmul.mubr.msk.bf16.vlgmr.msra.gmra.mrb[24].mxu0 %vm4418_vm0, %v5249_v24  ;;  %7700 = vmatmul.mubr.msk.bf16.vlgmr.msra.gmra.mrb[40].mxu1 %vm4418_vm0, %v5250_v51 }
 0xc05   : > { %7704 = vmatpush3.bf16.msra.mxu0 %v5349_v33  ;;  %7710 = vmatpush3.bf16.msra.mxu1 %v5395_v1 }
 0xc06   : > { %7705 = vmatprep.mubr.msk.bf16.mxu0 %vm8949_vm4, %v8948_v52  ;;  %7711 = vmatprep.mubr.msk.bf16.mxu1 %vm8949_vm4, %v8948_v52 }
 0xc07   : > { %7715 = vmatprep.subr.bf16.mxu0 %v8948_v52 }
 0xc1b   : > { %v5237_v35 = vpop.xlane.xlu0 %5236 }
 0xc1c   : > { %8356 = vrcp.f32 %v5237_v35  ;;  %v5240_v49 = vpop.xlane.xlu1 %5239 }
 0xc1d   : > { %8358 = vrcp.f32 %v5240_v49 }
 0xc26   : > { %v8357_v17 = vpop.eup %8356 }
 0xc27   : > { %v8359_v54 = vpop.eup %8358  ;;  %v5247_v55 = vmul.f32 %v8357_v17, %v10156_v45  ;;  %v8238_v45 = vld [vmem:[%s9569_s27 + $0x10] sm:$0xff]  }
 0xc28   : > { %v5248_v56 = vmul.f32 %v8359_v54, %v10158_v20  ;;  %v8239_v20 = vld [vmem:[%s9569_s27 + $0x18] sm:$0xff]   ;;  %v8242_v17 = vld [vmem:[%s9569_s27 + $0x30] sm:$0xff]  }
 0xc29   : > { %v5251_v57 = vpack.c.bf16 %v5247_v55, %v5247_v55 }
 0xc2a   : > { %v5252_v25 = vpack.c.bf16 %v5248_v56, %v5248_v56 }
 0xc2b   : > { %7706 = vmatmul.mubr.msk.bf16.vlgmr.msra.gmra.mrb[28].mxu0 %vm4418_vm0, %v5251_v57 }
 0xc2c   : > { %7712 = vmatmul.mubr.msk.bf16.vlgmr.msra.gmra.mrb[44].mxu1 %vm4418_vm0, %v5252_v25  ;;  %7731 = vmatprep.mubr.msk.bf16.mxu0 %vm8949_vm4, %v8948_v52 }
 0xc2d   : > { %7716 = vmatpush3.bf16.msra.mxu0 %v8236_v28 }
 0xc2e   : > { %7717 = vmatprep.subr.bf16.mxu0 %v8948_v52 }
 0xc31   : > { %7718 = vmatpush3.bf16.msra.mxu0 %v8237_v60 }
 0xc32   : > { %7719 = vmatprep.subr.bf16.mxu0 %v8948_v52 }
 0xc35   : > { %7720 = vmatpush3.bf16.msra.mxu0 %v8238_v45 }
 0xc36   : > { %7721 = vmatprep.subr.bf16.mxu0 %v8948_v52 }
 0xc39   : > { %7722 = vmatpush3.bf16.msra.mxu0 %v8239_v20  ;;  %v8243_v20 = vld [vmem:[%s9569_s27 + $0x38] sm:$0xff]  }
 0xc3a   : > { %7723 = vmatprep.subr.bf16.mxu0 %v8948_v52 }
 0xc3d   : > { %7724 = vmatpush3.bf16.msra.mxu0 %v8240_v61 }
 0xc3e   : > { %7725 = vmatprep.subr.bf16.mxu0 %v8948_v52 }
 0xc41   : > { %7726 = vmatpush3.bf16.msra.mxu0 %v8241_v62 }
 0xc42   : > { %7727 = vmatprep.subr.bf16.mxu0 %v8948_v52 }
 0xc45   : > { %7728 = vmatpush3.bf16.msra.mxu0 %v8242_v17 }
 0xc46   : > { %7729 = vmatprep.subr.bf16.mxu0 %v8948_v52 }
 0xc49   : > { %7730 = vmatpush3.bf16.msra.mxu0 %v8243_v20  ;;  %v8271_v20 = vld [vmem:[%s9571_s29 + $0x88] ss:$16 sps:$4 sm:$0xff]  }
 0xcd7   : > { %v5293_v63 = vpop.f32.mrb[24].mxu0  ;;  %v5339_v5 = vpop.f32.mrb[40].mxu1 }
 0xcd8   : > { %v7695_v6 = vpop.f32.mrb[25].mxu0  ;;  %v7701_v14 = vpop.f32.mrb[41].mxu1 }
 0xcd9   : > { %v5296_v15 = vpop.f32.mrb[26].mxu0  ;;  %v5342_v18 = vpop.f32.mrb[42].mxu1 }
 0xcda   : > { %v7696_v19 = vpop.f32.mrb[27].mxu0  ;;  %v7702_v58 = vpop.f32.mrb[43].mxu1 }
 0xcfe   : > { %v5385_v3 = vpop.f32.mrb[28].mxu0 }
 0xcff   : > { %v5437_v26 = vcombine.low %v5293_v63, %v5385_v3  ;;  %v5438_v23 = vcombine.high %v5293_v63, %v5385_v3  ;;  %v5431_v27 = vpop.f32.mrb[44].mxu1  ;;  %v7707_v29 = vpop.f32.mrb[29].mxu0 }
 0xd00   : > { %v5453_v34 = vcombine.low %v5339_v5, %v5431_v27  ;;  %v5454_v38 = vcombine.high %v5339_v5, %v5431_v27  ;;  %v7713_v39 = vpop.f32.mrb[45].mxu1  ;;  %v5388_v40 = vpop.f32.mrb[30].mxu0 }
 0xd01   : > { %v5445_v2 = vrot.slane %v5437_v26, %v9870_v8  ;;  %v5452_v7 = vrot.slane %v5438_v23, %v9870_v8  ;;  %v5434_v41 = vpop.f32.mrb[46].mxu1  ;;  %v7708_v44 = vpop.f32.mrb[31].mxu0  ;;  %v8247_v40 = vld [vmem:[%s9571_s29 + $0x8] ss:$16 sps:$4 sm:$0xff]  }
 0xd02   : > { %v5461_v30 = vrot.slane %v5453_v34, %v9870_v8  ;;  %v5468_v21 = vrot.slane %v5454_v38, %v9870_v8  ;;  %v7714_v10 = vpop.f32.mrb[47].mxu1  ;;  %v8255_v41 = vld [vmem:[%s9571_s29 + $0x2c] ss:$16 sps:$4 sm:$0xff]   ;;  %v8250_v44 = vld [vmem:[%s9571_s29 + $0x20] ss:$16 sps:$4 sm:$0xff]  }
 0xd03   : > { %v8261_v10 = vld [vmem:[%s9571_s29 + $0x4c] ss:$16 sps:$4 sm:$0xff]  }
 0xd04   : > { %v5469_v48 = vcombine.low %v5445_v2, %v5461_v30  ;;  %v5470_v43 = vcombine.high %v5445_v2, %v5461_v30  ;;  %v5485_v32 = vcombine.low %v5452_v7, %v5468_v21  ;;  %v5486_v59 = vcombine.high %v5452_v7, %v5468_v21  ;;  %v8249_v2 = vld [vmem:[%s9571_s29 + $0xc] ss:$16 sps:$4 sm:$0xff]   ;;  %v8252_v7 = vld [vmem:[%s9571_s29 + $0x24] ss:$16 sps:$4 sm:$0xff]   ;;  %v8253_v30 = vld [vmem:[%s9571_s29 + $0x28] ss:$16 sps:$4 sm:$0xff]  }
 0xd05   : > { %5984 = vmatprep.subr.bf16.mxu0 %v8249_v2  ;;  %v8258_v21 = vld [vmem:[%s9571_s29 + $0x44] ss:$16 sps:$4 sm:$0xff]  }
 0xd06   : > { %v5477_v12 = vrot.slane %v5469_v48, %v9873_v47  ;;  %v5484_v46 = vrot.slane %v5470_v43, %v9873_v47  ;;  %v5493_v24 = vrot.slane %v5485_v32, %v9873_v47  ;;  %v5500_v51 = vrot.slane %v5486_v59, %v9873_v47  ;;  %v8256_v48 = vld [vmem:[%s9571_s29 + $0x40] ss:$16 sps:$4 sm:$0xff]   ;;  %v8259_v43 = vld [vmem:[%s9571_s29 + $0x48] ss:$16 sps:$4 sm:$0xff]  }
 0xd07   : > { %v7227_v32 = vld [vmem:[%s1421_s12] ss:$0 sm:$0xff]  ;;  %v8294_v2 = vld [vmem:[%s9573_s0] sm:$0xff]  }
 0xd08   : > { %v5505_v33 = vcombine.low %v5477_v12, %v5484_v46  ;;  %v7225_v1 = vcombine.high %v5477_v12, %v5484_v46  ;;  %v5521_v35 = vcombine.low %v5493_v24, %v5500_v51  ;;  %v7226_v49 = vcombine.high %v5493_v24, %v5500_v51  ;;  %v8380_v51 = vld [vmem:[#allocation2] sm:$0xff] }
 0xd0a   : > { %v5512_v54 = vrot.slane %v5505_v33, %v9870_v8  ;;  %v5520_v55 = vrot.slane %v7225_v1, %v9870_v8  ;;  %v5528_v56 = vrot.slane %v5521_v35, %v9870_v8  ;;  %v5536_v57 = vrot.slane %v7226_v49, %v9870_v8  ;;  %v8381_v49 = vld [vmem:[#allocation2 + $0x8] sm:$0xff] }
 0xd0c   : > { %v5538_v25 = vcombine.high %v5512_v54, %v5520_v55  ;;  %v5554_v28 = vcombine.high %v5528_v56, %v5536_v57  ;;  %v5537_v60 = vcombine.low %v5512_v54, %v5520_v55  ;;  %v5553_v45 = vcombine.low %v5528_v56, %v5536_v57  ;;  %v8264_v56 = vld [vmem:[%s9571_s29 + $0x64] ss:$16 sps:$4 sm:$0xff]   ;;  %v8267_v57 = vld [vmem:[%s9571_s29 + $0x6c] ss:$16 sps:$4 sm:$0xff]  }
 0xd0e   : > { %v5552_v61 = vrot.slane %v5538_v25, %v9873_v47  ;;  %v5568_v62 = vrot.slane %v5554_v28, %v9873_v47  ;;  %v5545_v63 = vrot.slane %v5537_v60, %v9873_v47  ;;  %v5561_v5 = vrot.slane %v5553_v45, %v9873_v47  ;;  %v8262_v25 = vld [vmem:[%s9571_s29 + $0x60] ss:$16 sps:$4 sm:$0xff]   ;;  %v8265_v28 = vld [vmem:[%s9571_s29 + $0x68] ss:$16 sps:$4 sm:$0xff]   ;;  %v8270_v45 = vld [vmem:[%s9571_s29 + $0x84] ss:$16 sps:$4 sm:$0xff]  }
 0xd0f   : > { %v8268_v60 = vld [vmem:[%s9571_s29 + $0x80] ss:$16 sps:$4 sm:$0xff]  }
 0xd10   : > { %v5571_v6 = vcombine.low %v5552_v61, %v5568_v62  ;;  %v5570_v14 = vcombine.high %v5545_v63, %v5561_v5  ;;  %v5569_v8 = vcombine.low %v5545_v63, %v5561_v5  ;;  %v5572_v15 = vcombine.high %v5552_v61, %v5568_v62  ;;  %v8273_v61 = vld [vmem:[%s9571_s29 + $0x8c] ss:$16 sps:$4 sm:$0xff]   ;;  %v8276_v62 = vld [vmem:[%s9571_s29 + $0xa4] ss:$16 sps:$4 sm:$0xff]   ;;  %v8274_v5 = vld [vmem:[%s9571_s29 + $0xa0] ss:$16 sps:$4 sm:$0xff]  }
 0xd11   : > { %v8279_v63 = vld [vmem:[%s9571_s29 + $0xac] ss:$16 sps:$4 sm:$0xff]  }
 0xd12   : > { %v8202_v52 = vpack.i.bf16 %v5571_v6, %v4786_v11  ;;  %v8197_v18 = vpack.i.bf16 %v5570_v14, %v4785_v4  ;;  %v8207_v19 = vpack.i.bf16 %v5572_v15, %v4787_v37  ;;  %v8277_v6 = vld [vmem:[%s9571_s29 + $0xa8] ss:$16 sps:$4 sm:$0xff]   ;;  %v8282_v14 = vld [vmem:[%s9571_s29 + $0xc4] ss:$16 sps:$4 sm:$0xff]   ;;  %v8961_v15 = vmov 0  }
 0xd13   : > { %5973 = vmatprep.mubr.bf16.mxu1 %v8961_v15 }
 0xd14   : > { %8203 = vrot.lane.b32.xlu1 %v8202_v52, %s8952_s3  ;;  %8198 = vrot.lane.b32.xlu0 %v8197_v18, %s8950_s25  ;;  %v8280_v52 = vld [vmem:[%s9571_s29 + $0xc0] ss:$16 sps:$4 sm:$0xff]   ;;  %v8283_v18 = vld [vmem:[%s9571_s29 + $0xc8] ss:$16 sps:$4 sm:$0xff]  }
 0xd18   : > { %8208 = vrot.lane.b32.xlu0 %v8207_v19, %s8951_s10  ;;  %v8288_v19 = vld [vmem:[%s9571_s29 + $0xe4] ss:$16 sps:$4 sm:$0xff]  }
 0xd86   : > { %v8204_v47 = vpop.permute.xlu1 %8203  ;;  %v8199_v58 = vpop.permute.xlu0 %8198 }
 0xd87   : > { %v8201_v3 = vunpack.i.h.bf16 %v8199_v58  ;;  %v8200_v26 = vunpack.i.l.bf16 %v8199_v58  ;;  %v8206_v11 = vunpack.i.h.bf16 %v8204_v47  ;;  %v8205_v23 = vunpack.i.l.bf16 %v8204_v47  ;;  %v8291_v47 = vld [vmem:[%s9571_s29 + $0xec] ss:$16 sps:$4 sm:$0xff]   ;;  %v8286_v58 = vld [vmem:[%s9571_s29 + $0xe0] ss:$16 sps:$4 sm:$0xff]  }
 0xd89   : > { %v4800_v9 = vsel %vm4233_vm15, %v4784_v0, %v8200_v26  ;;  %v5585_v22 = vsel %vm4233_vm15, %v5569_v8, %v8201_v3  ;;  %v8246_v0 = vld [vmem:[%s9571_s29 + $0x4] ss:$16 sps:$4 sm:$0xff]   ;;  %v8285_v8 = vld [vmem:[%s9571_s29 + $0xcc] ss:$16 sps:$4 sm:$0xff]   ;;  %v8289_v3 = vld [vmem:[%s9571_s29 + $0xe8] ss:$16 sps:$4 sm:$0xff]  }
 0xd8a   : > { %v8209_v37 = vpop.permute.xlu0 %8208  ;;  %v4802_v29 = vsel %vm4801_vm2, %v4800_v9, %v8205_v23  ;;  %v5586_v34 = vsel %vm4801_vm2, %v5585_v22, %v8206_v11  ;;  %5941 = vmatprep.subr.bf16.mxu1 %v8246_v0  ;;  %v8292_v0 = vld [vmem:[%s9573_s0 + $0x40] sm:$0xff]  }
 0xd8b   : > { %v8211_v4 = vunpack.i.h.bf16 %v8209_v37  ;;  %v8210_v27 = vunpack.i.l.bf16 %v8209_v37  ;;  %5942 = vmatpush1.bf16.msra.mxu1 %v8244_v50 }
 0xd8c   : > { %5943 = vmatprep.subr.bf16.mxu1 %v8252_v7  ;;  %v8295_v7 = vld [vmem:[%s9573_s0 + $0x80] sm:$0xff]  }
 0xd8d   : > { %v4804_v38 = vsel %vm4803_vm3, %v4802_v29, %v8210_v27  ;;  %v5587_v39 = vsel %vm4803_vm3, %v5586_v34, %v8211_v4  ;;  %v7236_v34 = vld [vmem:[%s1424_s20] ss:$0 sm:$0xff] }
 0xd8e   : > { %v5588_v16 = vpack.c.bf16 %v5587_v39, %v4804_v38 }
 0xd8f   : > { %5944 = vmatpush1.bf16.msra.mxu1 %v8250_v44  ;;  %v8297_v44 = vld [vmem:[%s9573_s0 + $0xc8] sm:$0xff]  }
 0xd90   : > { %7732 = vmatmul.mubr.bf16.vlgmr.msra.gmra.mrb[32].mxu0 %v5588_v16  ;;  %5945 = vmatprep.subr.bf16.mxu1 %v8258_v21  ;;  %v8299_v21 = vld [vmem:[%s9573_s0 + $0x88] sm:$0xff]  }
 0xd91   : > { %5985 = vmatpush1.bf16.msra.mxu0 %v8247_v40  ;;  %6016 = vmatprep.mubr.bf16.mxu0 %v8961_v15  ;;  %v8293_v40 = vld [vmem:[%s9573_s0 + $0xc0] sm:$0xff]  }
 0xd92   : > { %5986 = vmatprep.subr.bf16.mxu0 %v8255_v41  ;;  %v8296_v41 = vld [vmem:[%s9573_s0 + $0x48] sm:$0xff]  }
 0xd93   : > { %5946 = vmatpush1.bf16.msra.mxu1 %v8256_v48  ;;  %v8301_v48 = vld [vmem:[%s9573_s0 + $0xd0] sm:$0xff]  }
 0xd94   : > { %5947 = vmatprep.subr.bf16.mxu1 %v8264_v56  ;;  %v8314_v56 = vld [vmem:[%s9573_s0 + $0x28] sm:$0xff]  }
 0xd95   : > { %5987 = vmatpush1.bf16.msra.mxu0 %v8253_v30  ;;  %v8298_v30 = vld [vmem:[%s9573_s0 + $0x8] sm:$0xff]  }
 0xd96   : > { %5988 = vmatprep.subr.bf16.mxu0 %v8261_v10  ;;  %v8300_v10 = vld [vmem:[%s9573_s0 + $0x50] sm:$0xff]  }
 0xd97   : > { %5948 = vmatpush1.bf16.msra.mxu1 %v8262_v25  ;;  %v8316_v25 = vld [vmem:[%s9573_s0 + $0x70] sm:$0xff]  }
 0xd98   : > { %5949 = vmatprep.subr.bf16.mxu1 %v8270_v45  ;;  %v8319_v45 = vld [vmem:[%s9573_s0 + $0xb0] sm:$0xff]  }
 0xd99   : > { %5989 = vmatpush1.bf16.msra.mxu0 %v8259_v43  ;;  %v8302_v43 = vld [vmem:[%s9573_s0 + $0x10] sm:$0xff]  }
 0xd9a   : > { %5990 = vmatprep.subr.bf16.mxu0 %v8267_v57  ;;  %v8315_v57 = vld [vmem:[%s9573_s0 + $0xa8] sm:$0xff]  }
 0xd9b   : > { %5950 = vmatpush1.bf16.msra.mxu1 %v8268_v60  ;;  %v8318_v60 = vld [vmem:[%s9573_s0 + $0x30] sm:$0xff]  }
 0xd9c   : > { %5951 = vmatprep.subr.bf16.mxu1 %v8276_v62  ;;  %v8322_v62 = vld [vmem:[%s9573_s0 + $0x38] sm:$0xff]  }
 0xd9d   : > { %5991 = vmatpush1.bf16.msra.mxu0 %v8265_v28  ;;  %v8317_v28 = vld [vmem:[%s9573_s0 + $0xf0] sm:$0xff]  }
 0xd9e   : > { %5992 = vmatprep.subr.bf16.mxu0 %v8273_v61  ;;  %v8321_v61 = vld [vmem:[%s9573_s0 + $0xf8] sm:$0xff]  }
 0xd9f   : > { %5952 = vmatpush1.bf16.msra.mxu1 %v8274_v5  ;;  %v5759_v5 = vld [vmem:[%s9561_s14] sm:$0xf] }
 0xda0   : > { %5953 = vmatprep.subr.bf16.mxu1 %v8282_v14  ;;  %v5772_v14 = vrot.slane %v5759_v5, %v2959_v42  ;;  %v5776_v15 = vrot.slane %v5759_v5, %v2960_v31 }
 0xda1   : > { %5993 = vmatpush1.bf16.msra.mxu0 %v8271_v20  ;;  %v8320_v20 = vld [vmem:[%s9573_s0 + $0x78] sm:$0xff]  }
 0xda2   : > { %5994 = vmatprep.subr.bf16.mxu0 %v8279_v63  ;;  %v8323_v63 = vld [vmem:[%s9573_s0 + $0xb8] sm:$0xff]  }
 0xda3   : > { %5954 = vmatpush1.bf16.msra.mxu1 %v8280_v52 }
 0xda4   : > { %5955 = vmatprep.subr.bf16.mxu1 %v8288_v19 }
 0xda5   : > { %5995 = vmatpush1.bf16.msra.mxu0 %v8277_v6  ;;  %v5764_v6 = vrot.slane %v5759_v5, %v2957_v13 }
 0xda6   : > { %5996 = vmatprep.subr.bf16.mxu0 %v8285_v8  ;;  %v5768_v8 = vrot.slane %v5759_v5, %v2958_v36 }
 0xda7   : > { %5956 = vmatpush1.bf16.msra.mxu1 %v8286_v58 }
 0xda8   : > { %7487 = vmatprep.subr.bf16.mxu1 %v8292_v0 }
 0xda9   : > { %5997 = vmatpush1.bf16.msra.mxu0 %v8283_v18 }
 0xdaa   : > { %5998 = vmatprep.subr.bf16.mxu0 %v8291_v47 }
 0xdad   : > { %5999 = vmatpush1.bf16.msra.mxu0 %v8289_v3 }
 0xdae   : > { %7509 = vmatprep.subr.bf16.mxu0 %v8293_v40 }
 0xe63   : > { %v5694_v59 = vpop.f32.mrb[32].mxu0 }
 0xe64   : > { %v5695_v12 = vadd.f32 %v7227_v32, %v5694_v59  ;;  %v7733_v46 = vpop.f32.mrb[33].mxu0  ;;  %v8304_v59 = vld [vmem:[%s9573_s0 + $0x58] sm:$0xff]  }
 0xe65   : > { %v5697_v24 = vpop.f32.mrb[34].mxu0  ;;  %v8306_v46 = vld [vmem:[%s9573_s0 + $0x18] sm:$0xff]  }
 0xe66   : > { %v10266_v33 = vadd.f32 %v8380_v51, %v5695_v12  ;;  %v5698_v1 = vadd.f32 %v7227_v32, %v5697_v24  ;;  %v7734_v35 = vpop.f32.mrb[35].mxu0  ;;  %v8303_v32 = vld [vmem:[%s9573_s0 + $0x90] sm:$0xff]   ;;  %v8305_v12 = vld [vmem:[%s9573_s0 + $0xd8] sm:$0xff]   ;;  %v8308_v51 = vld [vmem:[%s9573_s0 + $0x60] sm:$0xff]  }
 0xe67   : > { %v8307_v24 = vld [vmem:[%s9573_s0 + $0x98] sm:$0xff]   ;;  %v8310_v35 = vld [vmem:[%s9573_s0 + $0x20] sm:$0xff]  }
 0xe68   : > { %v10268_v17 = vadd.f32 %v8381_v49, %v5698_v1  ;;  %v5704_v54 = vmul.f32 %v10266_v33, %v10266_v33  ;;  %v8309_v1 = vld [vmem:[%s9573_s0 + $0xe0] sm:$0xff]  }
 0xe69   : > { %v8311_v49 = vld [vmem:[%s9573_s0 + $0xa0] sm:$0xff]  }
 0xe6a   : > { %5706 = vadd.xlane.f32.xlu1 %v5704_v54  ;;  %v5705_v55 = vmul.f32 %v10268_v17, %v10268_v17  ;;  %v8312_v54 = vld [vmem:[%s9573_s0 + $0x68] sm:$0xff]  }
 0xe6c   : > { %5708 = vadd.xlane.f32.xlu0 %v5705_v55  ;;  %v8313_v55 = vld [vmem:[%s9573_s0 + $0xe8] sm:$0xff]  }
 0xef7   : > { %v5707_v26 = vpop.xlane.xlu1 %5706 }
 0xef8   : > { %v5710_v11 = vmul.f32 0.0078125, %v5707_v26 }
 0xef9   : > { %v5709_v23 = vpop.xlane.xlu0 %5708 }
 0xefa   : > { %v5712_v9 = vadd.f32 1e-08, %v5710_v11  ;;  %v5711_v22 = vmul.f32 0.0078125, %v5709_v23 }
 0xefc   : > { %8360 = vrsqrt.f32 %v5712_v9  ;;  %v5713_v37 = vadd.f32 1e-08, %v5711_v22 }
 0xefe   : > { %8362 = vrsqrt.f32 %v5713_v37 }
 0xf06   : > { %v8361_v4 = vpop.eup %8360 }
 0xf07   : > { %v5716_v27 = vmul.f32 %v8361_v4, %v10266_v33 }
 0xf08   : > { %v8363_v29 = vpop.eup %8362 }
 0xf09   : > { %v5717_v38 = vmul.f32 %v8363_v29, %v10268_v17  ;;  %v5724_v39 = vmul.f32 %v7236_v34, %v5716_v27 }
 0xf0b   : > { %v5725_v16 = vmul.f32 %v7236_v34, %v5717_v38 }
 0xf0d   : > { %v5726_v50 = vpack.c.bf16 %v5725_v16, %v5724_v39 }
 0xf0f   : > { %5974 = vmatmul.mubr.bf16.vlgmr.msra.gmra.mrb[48].mxu1 %v5726_v50  ;;  %6017 = vmatmul.mubr.bf16.vlgmr.msra.gmra.mrb[36].mxu0 %v5726_v50 }
 0xf10   : > { %7488 = vmatpush3.bf16.msra.mxu1 %v8294_v2  ;;  %7510 = vmatpush3.bf16.msra.mxu0 %v8295_v7 }
 0xf11   : > { %7489 = vmatprep.subr.bf16.mxu1 %v8296_v41  ;;  %7511 = vmatprep.subr.bf16.mxu0 %v8297_v44 }
 0xf14   : > { %7490 = vmatpush3.bf16.msra.mxu1 %v8298_v30  ;;  %7512 = vmatpush3.bf16.msra.mxu0 %v8299_v21 }
 0xf15   : > { %7491 = vmatprep.subr.bf16.mxu1 %v8300_v10  ;;  %7513 = vmatprep.subr.bf16.mxu0 %v8301_v48 }
 0xf18   : > { %7492 = vmatpush3.bf16.msra.mxu1 %v8302_v43  ;;  %7514 = vmatpush3.bf16.msra.mxu0 %v8303_v32 }
 0xf19   : > { %7493 = vmatprep.subr.bf16.mxu1 %v8304_v59  ;;  %7515 = vmatprep.subr.bf16.mxu0 %v8305_v12 }
 0xf1c   : > { %7494 = vmatpush3.bf16.msra.mxu1 %v8306_v46  ;;  %7516 = vmatpush3.bf16.msra.mxu0 %v8307_v24 }
 0xf1d   : > { %7495 = vmatprep.subr.bf16.mxu1 %v8308_v51  ;;  %7517 = vmatprep.subr.bf16.mxu0 %v8309_v1 }
 0xf20   : > { %7496 = vmatpush3.bf16.msra.mxu1 %v8310_v35  ;;  %7518 = vmatpush3.bf16.msra.mxu0 %v8311_v49 }
 0xf21   : > { %7497 = vmatprep.subr.bf16.mxu1 %v8312_v54  ;;  %7519 = vmatprep.subr.bf16.mxu0 %v8313_v55 }
 0xf24   : > { %7498 = vmatpush3.bf16.msra.mxu1 %v8314_v56  ;;  %7520 = vmatpush3.bf16.msra.mxu0 %v8315_v57 }
 0xf25   : > { %7499 = vmatprep.subr.bf16.mxu1 %v8316_v25  ;;  %7521 = vmatprep.subr.bf16.mxu0 %v8317_v28 }
 0xf28   : > { %7500 = vmatpush3.bf16.msra.mxu1 %v8318_v60  ;;  %7522 = vmatpush3.bf16.msra.mxu0 %v8319_v45 }
 0xf29   : > { %7501 = vmatprep.subr.bf16.mxu1 %v8320_v20  ;;  %7523 = vmatprep.subr.bf16.mxu0 %v8321_v61 }
 0xf2c   : > { %7502 = vmatpush3.bf16.msra.mxu1 %v8322_v62  ;;  %7524 = vmatpush3.bf16.msra.mxu0 %v8323_v63 }
 0xfe2   : > { %v5975_v52 = vpop.f32.mrb[48].mxu1  ;;  %v6018_v18 = vpop.f32.mrb[36].mxu0 }
 0xfe3   : > { %v10340_v19 = vadd.f32 %v5975_v52, %v5764_v6  ;;  %v10342_v47 = vadd.f32 %v6018_v18, %v5772_v14  ;;  %v5977_v58 = vpop.f32.mrb[49].mxu1  ;;  %v6020_v3 = vpop.f32.mrb[37].mxu0 }
 0xfe4   : > { %v10344_v26 = vadd.f32 %v5977_v58, %v5768_v8  ;;  %v10346_v13 = vadd.f32 %v6020_v3, %v5776_v15  ;;  %v5979_v11 = vpop.f32.mrb[50].mxu1  ;;  %v6022_v42 = vpop.f32.mrb[38].mxu0 }
 0xfe5   : > { %v6035_v23 = vmul.f32 0.044715, %v10340_v19  ;;  %v6037_v36 = vmul.f32 0.044715, %v10342_v47  ;;  %v5980_v53 = vadd.f32 %v5979_v11, %v5764_v6  ;;  %v6023_v31 = vadd.f32 %v6022_v42, %v5772_v14  ;;  %v5981_v9 = vpop.f32.mrb[51].mxu1  ;;  %v6024_v22 = vpop.f32.mrb[39].mxu0 }
 0xfe6   : > { %v6036_v37 = vmul.f32 0.044715, %v10344_v26  ;;  %v6038_v4 = vmul.f32 0.044715, %v10346_v13  ;;  %v10352_v27 = vadd.f32 %v5981_v9, %v5768_v8  ;;  %v10354_v29 = vadd.f32 %v6024_v22, %v5776_v15 }
 0xfe7   : > { %v6043_v34 = vmul.f32 %v6035_v23, %v10340_v19  ;;  %v6045_v38 = vmul.f32 %v6037_v36, %v10342_v47  ;;  %v6039_v39 = vmul.f32 0.044715, %v5980_v53  ;;  %v6041_v16 = vmul.f32 0.044715, %v6023_v31 }
 0xfe8   : > { %v6044_v50 = vmul.f32 %v6036_v37, %v10344_v26  ;;  %v6046_v0 = vmul.f32 %v6038_v4, %v10346_v13  ;;  %v6040_v40 = vmul.f32 0.044715, %v10352_v27  ;;  %v6042_v2 = vmul.f32 0.044715, %v10354_v29 }
 0xfe9   : > { %v6051_v7 = vmul.f32 %v6043_v34, %v10340_v19  ;;  %v6053_v41 = vmul.f32 %v6045_v38, %v10342_v47  ;;  %v6047_v44 = vmul.f32 %v6039_v39, %v5980_v53  ;;  %v6049_v30 = vmul.f32 %v6041_v16, %v6023_v31 }
 0xfea   : > { %v6052_v21 = vmul.f32 %v6044_v50, %v10344_v26  ;;  %v6054_v10 = vmul.f32 %v6046_v0, %v10346_v13  ;;  %v6048_v48 = vmul.f32 %v6040_v40, %v10352_v27  ;;  %v6050_v43 = vmul.f32 %v6042_v2, %v10354_v29 }
 0xfeb   : > { %v6059_v32 = vadd.f32 %v6051_v7, %v10340_v19  ;;  %v6061_v59 = vadd.f32 %v6053_v41, %v10342_v47  ;;  %v6055_v12 = vmul.f32 %v6047_v44, %v5980_v53  ;;  %v6057_v46 = vmul.f32 %v6049_v30, %v6023_v31 }
 0xfec   : > { %v6056_v24 = vmul.f32 %v6048_v48, %v10352_v27  ;;  %v6058_v51 = vmul.f32 %v6050_v43, %v10354_v29  ;;  %v6060_v55 = vadd.f32 %v6052_v21, %v10344_v26  ;;  %v6062_v28 = vadd.f32 %v6054_v10, %v10346_v13 }
 0xfed   : > { %v6067_v1 = vmul.f32 0.7978846, %v6059_v32  ;;  %v6069_v35 = vmul.f32 0.7978846, %v6061_v59  ;;  %v6063_v49 = vadd.f32 %v6055_v12, %v5980_v53  ;;  %v6065_v54 = vadd.f32 %v6057_v46, %v6023_v31 }
 0xfee   : > { %v6064_v56 = vadd.f32 %v6056_v24, %v10352_v27  ;;  %v6068_v60 = vmul.f32 0.7978846, %v6060_v55  ;;  %v6066_v20 = vadd.f32 %v6058_v51, %v10354_v29  ;;  %v6070_v61 = vmul.f32 0.7978846, %v6062_v28 }
 0xfef   : > { %8364 = vtanh.f32 %v6067_v1  ;;  %v6071_v57 = vmul.f32 0.7978846, %v6063_v49  ;;  %v6073_v25 = vmul.f32 0.7978846, %v6065_v54  ;;  %v6027_v52 = vmul.f32 0.5, %v10340_v19 }
 0xff0   : > { %8366 = vtanh.f32 %v6069_v35  ;;  %v6072_v45 = vmul.f32 0.7978846, %v6064_v56  ;;  %v6074_v62 = vmul.f32 0.7978846, %v6066_v20  ;;  %v6031_v18 = vmul.f32 0.5, %v5980_v53 }
 0xff1   : > { %8368 = vtanh.f32 %v6071_v57  ;;  %v6029_v11 = vmul.f32 0.5, %v10342_v47  ;;  %v6033_v42 = vmul.f32 0.5, %v6023_v31  ;;  %v6028_v9 = vmul.f32 0.5, %v10344_v26 }
 0xff2   : > { %8370 = vtanh.f32 %v6073_v25  ;;  %v6032_v38 = vmul.f32 0.5, %v10352_v27  ;;  %v6030_v53 = vmul.f32 0.5, %v10346_v13  ;;  %v6034_v0 = vmul.f32 0.5, %v10354_v29  ;;  %v7269_v13 = vld [vmem:[%s1431_s17] ss:$0 sm:$0xff]  ;;  %s10589_s17 = sld [smem:[#allocation62_spill]] }
 0xff3   : > { %8372 = vtanh.f32 %v6068_v60 }
 0xff4   : > { %8374 = vtanh.f32 %v6072_v45 }
 0xff5   : > { %8376 = vtanh.f32 %v6070_v61 }
 0xff6   : > { %8378 = vtanh.f32 %v6074_v62 }
 0xff8   : > { %p7302_p13 = scmp.ne.s32.totalorder %s10589_s17, 1 }
 0xff9   : > { %v8365_v63 = vpop.eup %8364  ;;  %s10590_s14 = sld [smem:[#allocation58_spill]] (!%p7302_p13)  ;;  %v8962_v28 = vmov (!%p7302_p13), 0.0   ;;  %vm8963_vm4 = vmmov (!%p7302_p13), 0   ;;  %s10591_s27 = sld [smem:[#allocation59_spill]] (!%p7302_p13) }
 0xffa   : > { %v8367_v5 = vpop.eup %8366  ;;  %v6083_v6 = vadd.f32 1.0, %v8365_v63  ;;  %7735 = vmatprep.subr.bf16.mxu0 (!%p7302_p13), %v8962_v28 }
 0xffb   : > { %v8369_v14 = vpop.eup %8368  ;;  %v6085_v8 = vadd.f32 1.0, %v8367_v5 }
 0xffc   : > { %v8371_v15 = vpop.eup %8370  ;;  %v6087_v58 = vadd.f32 1.0, %v8369_v14  ;;  %v6091_v37 = vmul.f32 %v6083_v6, %v6027_v52 }
 0xffd   : > { %v8373_v3 = vpop.eup %8372  ;;  %v6089_v23 = vadd.f32 1.0, %v8371_v15  ;;  %v6093_v16 = vmul.f32 %v6085_v8, %v6029_v11 }
 0xffe   : > { %v8375_v36 = vpop.eup %8374  ;;  %v6084_v22 = vadd.f32 1.0, %v8373_v3  ;;  %v6095_v4 = vmul.f32 %v6087_v58, %v6031_v18 }
 0xfff   : > { %v8377_v34 = vpop.eup %8376  ;;  %v6088_v39 = vadd.f32 1.0, %v8375_v36  ;;  %v6097_v50 = vmul.f32 %v6089_v23, %v6033_v42  ;;  %v8382_v25 = vld [vmem:[%s10590_s14] sm:$0xff] (!%p7302_p13)   ;;  %v8383_v60 = vld [vmem:[%s10590_s14 + $0x8] sm:$0xff] (!%p7302_p13)   ;;  %v8388_v61 = vld [vmem:[%s10590_s14 + $0x30] sm:$0xff] (!%p7302_p13)  }
0x1000   : > { %v8379_v19 = vpop.eup %8378  ;;  %v6086_v47 = vadd.f32 1.0, %v8377_v34  ;;  %v6099_v31 = vpack.c.bf16 %v6095_v4, %v6091_v37  ;;  %v6092_v40 = vmul.f32 %v6084_v22, %v6028_v9  ;;  %v8386_v45 = vld [vmem:[%s10590_s14 + $0x20] sm:$0xff] (!%p7302_p13)   ;;  %v8387_v20 = vld [vmem:[%s10590_s14 + $0x28] sm:$0xff] (!%p7302_p13)   ;;  %v8389_v62 = vld [vmem:[%s10590_s14 + $0x38] sm:$0xff] (!%p7302_p13)  }
0x1001   : > { %v6096_v26 = vmul.f32 %v6088_v39, %v6032_v38  ;;  %v6090_v2 = vadd.f32 1.0, %v8379_v19  ;;  %v6101_v7 = vpack.c.bf16 %v6097_v50, %v6093_v16  ;;  %v7303_v5 = vld [vmem:[%s10591_s27] ss:$0 sm:$0xff] (!%p7302_p13) }
0x1002   : > { %v6094_v44 = vmul.f32 %v6086_v47, %v6030_v53 }
0x1003   : > { %v6100_v41 = vpack.c.bf16 %v6096_v26, %v6092_v40  ;;  %v6098_v30 = vmul.f32 %v6090_v2, %v6034_v0 }
0x1005   : > { %6398 = vmatprep.mubr.bf16.mxu1 %v6100_v41  ;;  %v6102_v27 = vpack.c.bf16 %v6098_v30, %v6094_v44 }
0x1006   : > { %6399 = vmatmul.mubr.bf16.vlgmr.msra.gmra.mrb[52].mxu1 %v6099_v31 }
0x1007   : > { %6439 = vmatprep.mubr.bf16.mxu0 %v6102_v27 }
0x1008   : > { %6440 = vmatmul.mubr.bf16.vlgmr.msra.gmra.mrb[40].mxu0 %v6101_v7 }
0x1009   : > { %7736 = vmatpush3.bf16.msra.mxu0 (!%p7302_p13), %v8382_v25  ;;  %7751 = vmatprep.mubr.msk.bf16.mxu0 (!%p7302_p13), %vm8963_vm4, %v8962_v28 }
0x100a   : > { %7737 = vmatprep.subr.bf16.mxu0 (!%p7302_p13), %v8962_v28 }
0x100d   : > { %7738 = vmatpush3.bf16.msra.mxu0 (!%p7302_p13), %v8383_v60 }
0x100e   : > { %7739 = vmatprep.subr.bf16.mxu0 (!%p7302_p13), %v8962_v28 }
0x10d9   : > { %v7503_v21 = vpop.f32.mrb[52].mxu1 }
0x10da   : > { %v7504_v29 = vpop.f32.mrb[53].mxu1 }
0x10db   : > { %v7525_v10 = vpop.f32.mrb[40].mxu0  ;;  %v7505_v48 = vadd.f32 %v7504_v29, %v7503_v21  ;;  %v7506_v43 = vpop.f32.mrb[54].mxu1 }
0x10dc   : > { %v7526_v32 = vpop.f32.mrb[41].mxu0  ;;  %v7507_v59 = vpop.f32.mrb[55].mxu1 }
0x10dd   : > { %v6401_v12 = vadd.f32 %v7505_v48, %v7269_v13  ;;  %v7527_v46 = vadd.f32 %v7526_v32, %v7525_v10  ;;  %v7528_v24 = vpop.f32.mrb[42].mxu0  ;;  %v7508_v51 = vadd.f32 %v7507_v59, %v7506_v43 }
0x10de   : > { %v7529_v1 = vpop.f32.mrb[43].mxu0 }
0x10df   : > { %v6442_v35 = vadd.f32 %v7527_v46, %v6401_v12  ;;  %v6404_v49 = vadd.f32 %v7508_v51, %v7269_v13  ;;  %v7530_v54 = vadd.f32 %v7529_v1, %v7528_v24  ;;  %6455 = sbr.rel (%p7302_p13) target bundleno = 4562 (0x11d2), region = 204 }
0x10e1   : > { %v6448_v55 = vadd.f32 %v6442_v35, %v10266_v33  ;;  %v6445_v56 = vadd.f32 %v7530_v54, %v6404_v49  ;;  %v8384_v33 = vld [vmem:[%s10590_s14 + $0x10] sm:$0xff] (!%p7302_p13)  }
0x10e2   : > { %7740 = vmatpush3.bf16.msra.mxu0 (!%p7302_p13), %v8384_v33 }
0x10e3   : > { %6450 = vst [vmem:[#allocation2] sm:$0xff] %v6448_v55  ;;  %v6449_v57 = vadd.f32 %v6445_v56, %v10268_v17  ;;  %v8385_v17 = vld [vmem:[%s10590_s14 + $0x18] sm:$0xff] (!%p7302_p13)   ;;  %7741 = vmatprep.subr.bf16.mxu0 (!%p7302_p13), %v8962_v28 }
0x10e5   : > { %6451 = vst [vmem:[#allocation2 + $0x8] sm:$0xff] %v6449_v57  ;;  %v6456_v63 = vpack.c.bf16 (!%p7302_p13), %v6449_v57, %v6448_v55 }
0x10e6   : > { %7742 = vmatpush3.bf16.msra.mxu0 %v8385_v17 }
0x10e7   : > { %7743 = vmatprep.subr.bf16.mxu0 %v8962_v28 }
0x10ea   : > { %7744 = vmatpush3.bf16.msra.mxu0 %v8386_v45 }
0x10eb   : > { %7745 = vmatprep.subr.bf16.mxu0 %v8962_v28 }
0x10ee   : > { %7746 = vmatpush3.bf16.msra.mxu0 %v8387_v20 }
0x10ef   : > { %7747 = vmatprep.subr.bf16.mxu0 %v8962_v28 }
0x10f2   : > { %7748 = vmatpush3.bf16.msra.mxu0 %v8388_v61 }
0x10f3   : > { %7749 = vmatprep.subr.bf16.mxu0 %v8962_v28 }
0x10f6   : > { %7750 = vmatpush3.bf16.msra.mxu0 %v8389_v62 }
0x10f9   : > { %7752 = vmatmul.mubr.bf16.vlgmr.msra.gmra.mrb[0].mxu0 %v6456_v63 }
0x11cc   : > { %v6562_v6 = vpop.f32.mrb[0].mxu0 }
0x11cd   : > { %v6563_v14 = vadd.f32 %v7303_v5, %v6562_v6  ;;  %v7753_v8 = vpop.f32.mrb[1].mxu0 }
0x11ce   : > { %v6565_v15 = vpop.f32.mrb[2].mxu0 }
0x11cf   : > { %6569 = vst [vmem:[#allocation23] sm:$0xff] %v6563_v14  ;;  %v6566_v52 = vadd.f32 %v7303_v5, %v6565_v15  ;;  %v7754_v18 = vpop.f32.mrb[3].mxu0 }
0x11d1   : > { %6570 = vst [vmem:[#allocation23 + $0x8] sm:$0xff] %v6566_v52 }
0x11d2 PF: > { %s10592_s22 = sld [smem:[#allocation64_spill]]  ;;  %s8964_s20 = smov [#allocation23]  }
0x11d3   : > { %s6580_s0 = sshll.u32 %s8964_s20, 4  ;;  %s6581_s0 = int_to_ptr.vmem [resolvable:$true] %s6580_s0 }
0x11d4   : > { %s8794_s1 = scalar_lea.vmem %s6581_s0, 256  ;;  %p8801_p0 = scmp.lt.s32.totalorder %s6581_s0, %s6581_s0 }
0x11d5   : > { %p8795_p1 = scmp.ne.s32.totalorder %s6581_s0, %s8794_s1  ;;  %p8802_p12 = scmp.lt.s32.totalorder %s8794_s1, %s8794_s1 }
0x11d7   : > { %p8803_p9 = por %p8802_p12, %p8801_p0 }
0x11d8   : > { %p7880_p3 = scmp.eq.s32.totalorder %s10592_s22, 1 }
0x11da   : > { %p8796_p8 = pnand %p8795_p1, %p7880_p3 }
0x11dc   : > { %p8797_p5 = pneg %p8796_p8 }
0x11de   : > { %p8804_p10 = pnand %p8803_p9, %p8797_p5 }
0x11e0   : > { %8807 = shalt.err (!%p8804_p10)
}
0x11e1   : > { %s10593_s15 = sld [smem:[#allocation60_spill]] }
0x11e7   : > { %s10594_s7 = smov %s10593_s15  ;;  %s8808_s19 = scalar_lea.hbm %s10593_s15, 256 }
0x11e8   : > { %p8809_p4 = scmp.ne.s32.totalorder %s10594_s7, %s8808_s19  ;;  %p8814_p11 = scmp.lt.u32.totalorder %s8808_s19, %s10594_s7 }
0x11ea   : > { %p8810_p7 = pnand %p8809_p4, %p7880_p3 }
0x11ec   : > { %p8811_p6 = pneg %p8810_p7 }
0x11ee   : > { %p8816_p2 = pnand %p8814_p11, %p8811_p6 }
0x11f0   : > { %8819 = shalt.err (!%p8816_p2)
}
0x11f1   : > { %s8965_s13 = smov 128   ;;  %s8966_s21 = smov 8  }
0x11f2   : > { %7816 = dma.vmem_to_hbm [thread:$0]  (%p7880_p3), %s6581_s0, 256, %s10594_s7, [#allocation5], %s8965_s13, %s8965_s13, %s8966_s21  }
0x11f3   : > { %8869 = dma.done.wait (%p7880_p3), [#allocation5], 256  }
0x11f4   : > { %8871 = vsyncadd (%p7880_p3), [#allocation5], 4294967040 }
0x11f5 PF: > { %s10595_s11 = sld [smem:[#allocation63_spill]]  ;;  %s10596_s15 = sld [smem:[#allocation61_spill]] }
0x11f6   : > { %s10597_s25 = sld [smem:[#allocation68_spill]]  ;;  %s10598_s10 = sld [smem:[#allocation66_spill]] }
0x11f7   : > { %s10599_s16 = smov %s8882_s18  ;;  %s10601_s22 = smov %s8890_s23 }
0x11fb   : > { %s77_s26 = sadd.s32 1, %s10595_s11  }
0x11fc   : > { %p74_p13 = scmp.ge.s32.totalorder %s77_s26, 4   ;;  %s10600_s18 = smov %s10597_s25 }
0x11fd   : > { %s10602_s23 = smov %s10598_s10 }
0x11fe   :  { %76 = sbr.rel (!%p74_p13) target bundleno = 75 (0x4b), region = 336 }
0x1205   :  { %6596 = vsyncpa [#allocation4], 1 }
0x1206   :  { %6598 = vsyncpa [#allocation4 + $0x1], 1 }
0x1207   :  { %6599 = vsyncpa [#allocation7], 1 }
0x1208   :  { %6600 = vsyncpa [#allocation10], 1 }
0x1209   :  { %6601 = vsyncpa [#allocation13], 1 }
0x120a   :  { %6602 = vsyncpa [#allocation16], 1 }
0x120b   :  { %6603 = vsyncpa [#allocation5], 1 }
0x120c   :  { %6605 = vsyncpa [#allocation5 + $0x1], 1 }

</bundles_post_ra>
